<compile_context>
chip_gen: v7x
topology: tpu7x:2x2x1
jax: 0.10.0
libtpu: 0.0.40
codegen_flags: <defaults>
</compile_context>

<pallas_src>
import functools

import jax
import jax.numpy as jnp
from jax.experimental import pallas as pl
from jax.experimental.pallas import tpu as pltpu


# ----------------------------------------------------------------------------
# Small helpers
# ----------------------------------------------------------------------------
def _round_up(x, m):
    return ((x + m - 1) // m) * m


def _pick_tile(size, candidates):
    """Largest candidate tile that evenly divides `size` (size is 128-aligned)."""
    for c in candidates:
        if size % c == 0:
            return c
    return size


_VMEM_LIMIT = 32 * 1024 * 1024  # explicit budget; tiles here use only a few MiB.
# NOTE: when scaling to the real 4096-wide classifier on v6e, raise this toward
# ~64-96 MiB and prefer tn=256 / tk>=512; on v7x keep tiles sized for 64 MiB.


# ----------------------------------------------------------------------------
# Pallas kernels
# ----------------------------------------------------------------------------
def _matmul_kernel(x_ref, w_ref, b_ref, o_ref, acc_ref, *, apply_relu):
    """Tiled o[i,j] = relu?(sum_k x[i,k] @ w[k,j] + b[j]); f32 accumulation."""
    @pl.when(pl.program_id(2) == 0)
    def _():
        acc_ref[...] = jnp.zeros_like(acc_ref)

    acc_ref[...] += jnp.dot(
        x_ref[...], w_ref[...], preferred_element_type=jnp.float32
    )

    @pl.when(pl.program_id(2) == pl.num_programs(2) - 1)
    def _():
        y = acc_ref[...] + b_ref[...]
        if apply_relu:
            y = jnp.maximum(y, 0.0)
        o_ref[...] = y.astype(o_ref.dtype)


def pallas_linear(x, w, b, *, apply_relu=False):
    """x: (M, K) f32, w: (K, N) f32, b: (N,) f32 -> (M, N) f32.

    bf16 MXU operands, f32 VMEM accumulator, grid = (M_tiles, N_tiles, K_tiles)
    with K innermost (arbitrary).  M is padded only to a multiple of 8 (up to
    128), K and N are zero-padded to 128 multiples for unmasked loads/stores.
    """
    M, K = x.shape
    N = w.shape[1]

    tm = min(_round_up(M, 8), 128)
    Mp = _round_up(M, tm)
    Kp = _round_up(K, 128)
    tk = _pick_tile(Kp, (512, 384, 256, 128))
    Np = _round_up(N, 128)
    tn = _pick_tile(Np, (256, 128))

    xp = jnp.pad(x.astype(jnp.bfloat16), ((0, Mp - M), (0, Kp - K)))
    wp = jnp.pad(w.astype(jnp.bfloat16), ((0, Kp - K), (0, Np - N)))
    bp = jnp.pad(b.astype(jnp.float32), (0, Np - N)).reshape(1, Np)

    grid = (Mp // tm, Np // tn, Kp // tk)

    out = pl.pallas_call(
        functools.partial(_matmul_kernel, apply_relu=apply_relu),
        out_shape=jax.ShapeDtypeStruct((Mp, Np), jnp.float32),
        grid=grid,
        in_specs=[
            pl.BlockSpec((tm, tk), lambda i, j, k: (i, k)),
            pl.BlockSpec((tk, tn), lambda i, j, k: (k, j)),
            pl.BlockSpec((1, tn), lambda i, j, k: (0, j)),
        ],
        out_specs=pl.BlockSpec((tm, tn), lambda i, j, k: (i, j)),
        scratch_shapes=[pltpu.VMEM((tm, tn), jnp.float32)],
        compiler_params=pltpu.CompilerParams(
            dimension_semantics=("parallel", "parallel", "arbitrary"),
            vmem_limit_bytes=_VMEM_LIMIT,
        ),
    )(xp, wp, bp)
    return out[:M, :N]


def _classifier_kernel(x_ref, w1_ref, b1_ref, w2_ref, b2_ref, w3_ref, b3_ref,
                       o_ref):
    """Fused fc1+ReLU -> fc2+ReLU -> fc3 -> log_softmax (class axis padded)."""
    x = x_ref[...]                                                  # bf16
    h = jnp.dot(x, w1_ref[...], preferred_element_type=jnp.float32) + b1_ref[...]
    h = jnp.maximum(h, 0.0)
    h = jnp.dot(h.astype(jnp.bfloat16), w2_ref[...],
                preferred_element_type=jnp.float32) + b2_ref[...]
    h = jnp.maximum(h, 0.0)
    logits = jnp.dot(h.astype(jnp.bfloat16), w3_ref[...],
                     preferred_element_type=jnp.float32) + b3_ref[...]
    # Padded class columns carry a -1e30 bias -> exp() == 0 -> exact softmax
    # over the real classes.
    m = jnp.max(logits, axis=-1, keepdims=True)
    s = logits - m
    lse = jnp.log(jnp.sum(jnp.exp(s), axis=-1, keepdims=True))
    o_ref[...] = (s - lse).astype(o_ref.dtype)


def pallas_classifier_head(x, w1, b1, w2, b2, w3, b3):
    """Single-launch classifier head.  Dropout = identity (eval mode)."""
    M, K1 = x.shape
    H1 = w1.shape[1]
    H2 = w2.shape[1]
    Ncls = w3.shape[1]
    Np = _round_up(Ncls, 128)

    tm = min(_round_up(M, 8), 128)
    Mp = _round_up(M, tm)

    xp = jnp.pad(x.astype(jnp.bfloat16), ((0, Mp - M), (0, 0)))
    w1b = w1.astype(jnp.bfloat16)
    w2b = w2.astype(jnp.bfloat16)
    w3p = jnp.pad(w3.astype(jnp.bfloat16), ((0, 0), (0, Np - Ncls)))
    b1r = b1.astype(jnp.float32).reshape(1, H1)
    b2r = b2.astype(jnp.float32).reshape(1, H2)
    b3p = jnp.pad(b3.astype(jnp.float32), (0, Np - Ncls),
                  constant_values=-1e30).reshape(1, Np)

    out = pl.pallas_call(
        _classifier_kernel,
        out_shape=jax.ShapeDtypeStruct((Mp, Np), jnp.float32),
        grid=(Mp // tm,),
        in_specs=[
            pl.BlockSpec((tm, K1), lambda i: (i, 0)),
            pl.BlockSpec((K1, H1), lambda i: (0, 0)),
            pl.BlockSpec((1, H1), lambda i: (0, 0)),
            pl.BlockSpec((H1, H2), lambda i: (0, 0)),
            pl.BlockSpec((1, H2), lambda i: (0, 0)),
            pl.BlockSpec((H2, Np), lambda i: (0, 0)),
            pl.BlockSpec((1, Np), lambda i: (0, 0)),
        ],
        out_specs=pl.BlockSpec((tm, Np), lambda i: (i, 0)),
        compiler_params=pltpu.CompilerParams(
            dimension_semantics=("parallel",),
            vmem_limit_bytes=_VMEM_LIMIT,
        ),
    )(xp, w1b, b1r, w2b, b2r, w3p, b3p)
    return out[:M, :Ncls]


# ----------------------------------------------------------------------------
# Conv / pool glue (patch extraction is one fused XLA op; matmul is Pallas)
# ----------------------------------------------------------------------------
def im2col(x_nhwc, kh, kw, stride, pad):
    """Patch extraction via lax.conv_general_dilated_patches (depthwise gather).

    Returns (B*Ho*Wo, Cin*kh*kw); feature ordering is (cin, kh, kw).
    """
    # TODO(synk): for very large feature maps, fuse patch extraction directly
    # into the matmul kernel (pl.ds into a VMEM-resident input slab).
    patches = jax.lax.conv_general_dilated_patches(
        x_nhwc,
        filter_shape=(kh, kw),
        window_strides=(stride, stride),
        padding=[(pad, pad), (pad, pad)],
        dimension_numbers=("NHWC", "HWIO", "NHWC"),
    )
    B, Ho, Wo, F = patches.shape
    return patches.reshape(B * Ho * Wo, F), (B, Ho, Wo)


def conv2d_relu(x_nhwc, w_khwcio, b, stride, pad):
    """Conv2d + ReLU via patch extraction + tiled Pallas MXU matmul."""
    kh, kw, cin, cout = w_khwcio.shape
    patches, (B, Ho, Wo) = im2col(x_nhwc, kh, kw, stride, pad)
    # Match the (cin, kh, kw) patch ordering of conv_general_dilated_patches.
    w2d = jnp.transpose(w_khwcio, (2, 0, 1, 3)).reshape(cin * kh * kw, cout)
    y = pallas_linear(patches, w2d, b, apply_relu=True)
    return y.reshape(B, Ho, Wo, cout)


def maxpool2x2(x_nhwc):
    B, H, W, C = x_nhwc.shape
    Ho, Wo = H // 2, W // 2
    x = x_nhwc[:, :Ho * 2, :Wo * 2, :].reshape(B, Ho, 2, Wo, 2, C)
    return jnp.max(x, axis=(2, 4))


# ----------------------------------------------------------------------------
# Parameter construction (deterministic, kaiming-style where the module says so)
# ----------------------------------------------------------------------------
def kaiming_normal(key, shape, fan_in):
    return jax.random.normal(key, shape, jnp.float32) * jnp.sqrt(2.0 / fan_in)


def make_params(key, hidden_size, fc_size, cls_width):
    ks = jax.random.split(key, 12)
    p = {}
    conv_cfg = [
        ("conv1", 11, 3, 64), ("conv2", 5, 64, 192), ("conv3", 3, 192, 384),
        ("conv4", 3, 384, 256), ("conv5", 3, 256, 256),
    ]
    for idx, (name, k, cin, cout) in enumerate(conv_cfg):
        fan_in = k * k * cin
        p[name + "_w"] = kaiming_normal(ks[idx], (k, k, cin, cout), fan_in)
        p[name + "_b"] = jnp.zeros((cout,), jnp.float32)
    # ClassNet.linear: fc_size -> hidden_size * 9
    p["lin_w"] = kaiming_normal(ks[5], (fc_size, hidden_size * 9), fc_size)
    p["lin_b"] = jnp.zeros((hidden_size * 9,), jnp.float32)
    # Classifier
    p["fc1_w"] = kaiming_normal(ks[6], (hidden_size, cls_width), hidden_size)
    p["fc1_b"] = jnp.zeros((cls_width,), jnp.float32)
    p["fc2_w"] = kaiming_normal(ks[7], (cls_width, cls_width), cls_width)
    p["fc2_b"] = jnp.zeros((cls_width,), jnp.float32)
    p["fc3_w"] = jax.random.normal(ks[8], (cls_width, 7), jnp.float32) * 0.01
    p["fc3_b"] = jnp.zeros((7,), jnp.float32)
    return p


# ----------------------------------------------------------------------------
# Forward pass (mirrors ClassNet.forward)
# ----------------------------------------------------------------------------
def classnet_forward(params, x_nchw, hidden_size):
    x = jnp.transpose(x_nchw, (0, 2, 3, 1))          # NCHW -> NHWC
    # Encoder.features
    x = conv2d_relu(x, params["conv1_w"], params["conv1_b"], stride=4, pad=2)
    x = maxpool2x2(x)
    x = conv2d_relu(x, params["conv2_w"], params["conv2_b"], stride=1, pad=2)
    x = maxpool2x2(x)
    x = conv2d_relu(x, params["conv3_w"], params["conv3_b"], stride=1, pad=1)
    x = conv2d_relu(x, params["conv4_w"], params["conv4_b"], stride=1, pad=1)
    x = conv2d_relu(x, params["conv5_w"], params["conv5_b"], stride=1, pad=1)
    x = maxpool2x2(x)                                # (B, h, w, 256)
    B = x.shape[0]
    # x.view(B, -1): match PyTorch NCHW flatten order (C, H, W)
    x = jnp.transpose(x, (0, 3, 1, 2)).reshape(B, -1)
    # ClassNet.linear
    x = pallas_linear(x, params["lin_w"], params["lin_b"], apply_relu=False)
    # view(B*9, hidden)
    x = x.reshape(B * 9, hidden_size)
    # Classifier, fused into one kernel (dropout = identity in eval mode).
    # TODO(synk): torch-RNG-exact training-mode dropout not reproduced.
    y = pallas_classifier_head(
        x, params["fc1_w"], params["fc1_b"], params["fc2_w"], params["fc2_b"],
        params["fc3_w"], params["fc3_b"])
    return y                                         # (B*9, 7)


if __name__ == "__main__":
    B, H, W = 2, 64, 64
    hidden_size = 128
    cls_width = 256          # stands in for the module's 4096 at small scale
    # Feature-map size for 64x64 input: 64->15->7->7->3->3->3->3->1 ; 256*1*1
    fc_size = 256 * 1 * 1

    key = jax.random.PRNGKey(0)
    kx, kp = jax.random.split(key)
    x = jax.random.normal(kx, (B, 3, H, W), jnp.float32)   # NCHW, like PyTorch
    params = make_params(kp, hidden_size, fc_size, cls_width)

    fwd = jax.jit(functools.partial(classnet_forward, hidden_size=hidden_size))
    out = fwd(params, x)
    out = jax.block_until_ready(out)

    assert out.shape == (B * 9, 7), out.shape
    # log_softmax rows should sum (in prob space) to ~1
    assert jnp.allclose(jnp.sum(jnp.exp(out), axis=-1), 1.0, atol=1e-4)
    print("KERNEL_OK")
</pallas_src>

<mosaic_0001>
module attributes {stable_mosaic.version = 11 : i64} {
  func.func @_matmul_kernel(%arg0: i32, %arg1: i32, %arg2: i32, %arg3: memref<128x384xbf16, #tpu.memory_space<vmem>>, %arg4: memref<384x128xbf16, #tpu.memory_space<vmem>>, %arg5: memref<1x128xf32, #tpu.memory_space<vmem>>, %arg6: memref<128x128xf32, #tpu.memory_space<vmem>>, %arg7: memref<128x128xf32, #tpu.memory_space<vmem>>) attributes {dimension_semantics = [#tpu.dimension_semantics<parallel>, #tpu.dimension_semantics<parallel>, #tpu.dimension_semantics<arbitrary>], iteration_bounds = array<i64: 4, 1, 1>, scalar_prefetch = 0 : i64, scratch_operands = 1 : i64, tpu.core_type = #tpu.core_type<tc>, window_params = [{transform_indices = @transform_0, window_bounds = array<i64: 128, 384>}, {transform_indices = @transform_1, window_bounds = array<i64: 384, 128>}, {transform_indices = @transform_2, window_bounds = array<i64: 1, 128>}, {transform_indices = @transform_3, window_bounds = array<i64: 128, 128>}]} {
    %c0_i32 = arith.constant 0 : i32
    %0 = arith.cmpi eq, %arg2, %c0_i32 : i32
    %1 = arith.extui %0 : i1 to i32
    %c0_i32_0 = arith.constant 0 : i32
    %2 = arith.cmpi ne, %1, %c0_i32_0 : i32
    scf.if %2 {
      %cst_10 = arith.constant 0.000000e+00 : f32
      %12 = vector.broadcast %cst_10 : f32 to vector<128x128xf32>
      %c0_11 = arith.constant 0 : index
      %c0_12 = arith.constant 0 : index
      %13 = vector.load %arg7[%c0_11, %c0_12] : memref<128x128xf32, #tpu.memory_space<vmem>>, vector<128x128xf32>
      tpu.vector_store %arg7[%c0_11, %c0_12], %12 {strides = array<i32>} : memref<128x128xf32, #tpu.memory_space<vmem>>, vector<128x128xf32>,
    } else {
    }
    %c0 = arith.constant 0 : index
    %c0_1 = arith.constant 0 : index
    %3 = vector.load %arg7[%c0, %c0_1] : memref<128x128xf32, #tpu.memory_space<vmem>>, vector<128x128xf32>
    %c0_2 = arith.constant 0 : index
    %c0_3 = arith.constant 0 : index
    %4 = vector.load %arg3[%c0_2, %c0_3] : memref<128x384xbf16, #tpu.memory_space<vmem>>, vector<128x384xbf16>
    %c0_4 = arith.constant 0 : index
    %c0_5 = arith.constant 0 : index
    %5 = vector.load %arg4[%c0_4, %c0_5] : memref<384x128xbf16, #tpu.memory_space<vmem>>, vector<384x128xbf16>
    %cst = arith.constant dense<0.000000e+00> : vector<128x128xf32>
    %6 = tpu.matmul %4, %5, %cst {dimension_numbers = #tpu.dot_dimension_numbers<[1], [0], [0], [1], [0, 0, 1, 1], [], []>} : vector<128x384xbf16>, vector<384x128xbf16>, vector<128x128xf32> -> vector<128x128xf32>
    %7 = arith.addf %3, %6 : vector<128x128xf32>
    %c0_6 = arith.constant 0 : index
    %c0_7 = arith.constant 0 : index
    %8 = vector.load %arg7[%c0_6, %c0_7] : memref<128x128xf32, #tpu.memory_space<vmem>>, vector<128x128xf32>
    tpu.vector_store %arg7[%c0_6, %c0_7], %7 {strides = array<i32>} : memref<128x128xf32, #tpu.memory_space<vmem>>, vector<128x128xf32>,
    %c0_i32_8 = arith.constant 0 : i32
    %9 = arith.cmpi eq, %arg2, %c0_i32_8 : i32
    %10 = arith.extui %9 : i1 to i32
    %c0_i32_9 = arith.constant 0 : i32
    %11 = arith.cmpi ne, %10, %c0_i32_9 : i32
    scf.if %11 {
      %c0_10 = arith.constant 0 : index
      %c0_11 = arith.constant 0 : index
      %12 = vector.load %arg7[%c0_10, %c0_11] : memref<128x128xf32, #tpu.memory_space<vmem>>, vector<128x128xf32>
      %c0_12 = arith.constant 0 : index
      %c0_13 = arith.constant 0 : index
      %13 = vector.load %arg5[%c0_12, %c0_13] : memref<1x128xf32, #tpu.memory_space<vmem>>, vector<1x128xf32>
      %14 = vector.broadcast %13 : vector<1x128xf32> to vector<128x128xf32>
      %15 = arith.addf %12, %14 : vector<128x128xf32>
      %cst_14 = arith.constant 0.000000e+00 : f32
      %16 = vector.broadcast %cst_14 : f32 to vector<128x128xf32>
      %17 = arith.maximumf %15, %16 : vector<128x128xf32>
      %c0_15 = arith.constant 0 : index
      %c0_16 = arith.constant 0 : index
      %18 = vector.load %arg6[%c0_15, %c0_16] : memref<128x128xf32, #tpu.memory_space<vmem>>, vector<128x128xf32>
      tpu.vector_store %arg6[%c0_15, %c0_16], %17 {strides = array<i32>} : memref<128x128xf32, #tpu.memory_space<vmem>>, vector<128x128xf32>,
    } else {
    }
    return
  }
  func.func @transform_0(%arg0: i32, %arg1: i32, %arg2: i32) -> (i32, i32) {
    %c0_i32 = arith.constant 0 : i32
    return %arg0, %arg2 : i32, i32
  }
  func.func @transform_1(%arg0: i32, %arg1: i32, %arg2: i32) -> (i32, i32) {
    %c0_i32 = arith.constant 0 : i32
    return %arg2, %arg1 : i32, i32
  }
  func.func @transform_2(%arg0: i32, %arg1: i32, %arg2: i32) -> (i32, i32) {
    %c0_i32 = arith.constant 0 : i32
    %c0_i32_0 = arith.constant 0 : i32
    return %c0_i32, %arg1 : i32, i32
  }
  func.func @transform_3(%arg0: i32, %arg1: i32, %arg2: i32) -> (i32, i32) {
    %c0_i32 = arith.constant 0 : i32
    return %arg0, %arg1 : i32, i32
  }
}

module attributes {stable_mosaic.version = 11 : i64} {
  func.func @_matmul_kernel(%arg0: i32, %arg1: i32, %arg2: i32, %arg3: memref<104x128xbf16, #tpu.memory_space<vmem>>, %arg4: memref<128x256xbf16, #tpu.memory_space<vmem>>, %arg5: memref<1x256xf32, #tpu.memory_space<vmem>>, %arg6: memref<104x256xf32, #tpu.memory_space<vmem>>, %arg7: memref<104x256xf32, #tpu.memory_space<vmem>>) attributes {dimension_semantics = [#tpu.dimension_semantics<parallel>, #tpu.dimension_semantics<parallel>, #tpu.dimension_semantics<arbitrary>], iteration_bounds = array<i64: 1, 1, 13>, scalar_prefetch = 0 : i64, scratch_operands = 1 : i64, tpu.core_type = #tpu.core_type<tc>, window_params = [{transform_indices = @transform_0, window_bounds = array<i64: 104, 128>}, {transform_indices = @transform_1, window_bounds = array<i64: 128, 256>}, {transform_indices = @transform_2, window_bounds = array<i64: 1, 256>}, {transform_indices = @transform_3, window_bounds = array<i64: 104, 256>}]} {
    %c0_i32 = arith.constant 0 : i32
    %0 = arith.cmpi eq, %arg2, %c0_i32 : i32
    %1 = arith.extui %0 : i1 to i32
    %c0_i32_0 = arith.constant 0 : i32
    %2 = arith.cmpi ne, %1, %c0_i32_0 : i32
    scf.if %2 {
      %cst_9 = arith.constant 0.000000e+00 : f32
      %12 = vector.broadcast %cst_9 : f32 to vector<104x256xf32>
      %c0_10 = arith.constant 0 : index
      %c0_11 = arith.constant 0 : index
      %13 = vector.load %arg7[%c0_10, %c0_11] : memref<104x256xf32, #tpu.memory_space<vmem>>, vector<104x256xf32>
      tpu.vector_store %arg7[%c0_10, %c0_11], %12 {strides = array<i32>} : memref<104x256xf32, #tpu.memory_space<vmem>>, vector<104x256xf32>,
    } else {
    }
    %c0 = arith.constant 0 : index
    %c0_1 = arith.constant 0 : index
    %3 = vector.load %arg7[%c0, %c0_1] : memref<104x256xf32, #tpu.memory_space<vmem>>, vector<104x256xf32>
    %c0_2 = arith.constant 0 : index
    %c0_3 = arith.constant 0 : index
    %4 = vector.load %arg3[%c0_2, %c0_3] : memref<104x128xbf16, #tpu.memory_space<vmem>>, vector<104x128xbf16>
    %c0_4 = arith.constant 0 : index
    %c0_5 = arith.constant 0 : index
    %5 = vector.load %arg4[%c0_4, %c0_5] : memref<128x256xbf16, #tpu.memory_space<vmem>>, vector<128x256xbf16>
    %cst = arith.constant dense<0.000000e+00> : vector<104x256xf32>
    %6 = tpu.matmul %4, %5, %cst {dimension_numbers = #tpu.dot_dimension_numbers<[1], [0], [0], [1], [0, 0, 1, 1], [], []>} : vector<104x128xbf16>, vector<128x256xbf16>, vector<104x256xf32> -> vector<104x256xf32>
    %7 = arith.addf %3, %6 : vector<104x256xf32>
    %c0_6 = arith.constant 0 : index
    %c0_7 = arith.constant 0 : index
    %8 = vector.load %arg7[%c0_6, %c0_7] : memref<104x256xf32, #tpu.memory_space<vmem>>, vector<104x256xf32>
    tpu.vector_store %arg7[%c0_6, %c0_7], %7 {strides = array<i32>} : memref<104x256xf32, #tpu.memory_space<vmem>>, vector<104x256xf32>,
    %c12_i32 = arith.constant 12 : i32
    %9 = arith.cmpi eq, %arg2, %c12_i32 : i32
    %10 = arith.extui %9 : i1 to i32
    %c0_i32_8 = arith.constant 0 : i32
    %11 = arith.cmpi ne, %10, %c0_i32_8 : i32
    scf.if %11 {
      %c0_9 = arith.constant 0 : index
      %c0_10 = arith.constant 0 : index
      %12 = vector.load %arg7[%c0_9, %c0_10] : memref<104x256xf32, #tpu.memory_space<vmem>>, vector<104x256xf32>
      %c0_11 = arith.constant 0 : index
      %c0_12 = arith.constant 0 : index
      %13 = vector.load %arg5[%c0_11, %c0_12] : memref<1x256xf32, #tpu.memory_space<vmem>>, vector<1x256xf32>
      %14 = vector.broadcast %13 : vector<1x256xf32> to vector<104x256xf32>
      %15 = arith.addf %12, %14 : vector<104x256xf32>
      %cst_13 = arith.constant 0.000000e+00 : f32
      %16 = vector.broadcast %cst_13 : f32 to vector<104x256xf32>
      %17 = arith.maximumf %15, %16 : vector<104x256xf32>
      %c0_14 = arith.constant 0 : index
      %c0_15 = arith.constant 0 : index
      %18 = vector.load %arg6[%c0_14, %c0_15] : memref<104x256xf32, #tpu.memory_space<vmem>>, vector<104x256xf32>
      tpu.vector_store %arg6[%c0_14, %c0_15], %17 {strides = array<i32>} : memref<104x256xf32, #tpu.memory_space<vmem>>, vector<104x256xf32>,
    } else {
    }
    return
  }
  func.func @transform_0(%arg0: i32, %arg1: i32, %arg2: i32) -> (i32, i32) {
    %c0_i32 = arith.constant 0 : i32
    return %arg0, %arg2 : i32, i32
  }
  func.func @transform_1(%arg0: i32, %arg1: i32, %arg2: i32) -> (i32, i32) {
    %c0_i32 = arith.constant 0 : i32
    return %arg2, %arg1 : i32, i32
  }
  func.func @transform_2(%arg0: i32, %arg1: i32, %arg2: i32) -> (i32, i32) {
    %c0_i32 = arith.constant 0 : i32
    %c0_i32_0 = arith.constant 0 : i32
    return %c0_i32, %arg1 : i32, i32
  }
  func.func @transform_3(%arg0: i32, %arg1: i32, %arg2: i32) -> (i32, i32) {
    %c0_i32 = arith.constant 0 : i32
    return %arg0, %arg1 : i32, i32
  }
}

module attributes {stable_mosaic.version = 11 : i64} {
  func.func @_matmul_kernel(%arg0: i32, %arg1: i32, %arg2: i32, %arg3: memref<24x256xbf16, #tpu.memory_space<vmem>>, %arg4: memref<256x128xbf16, #tpu.memory_space<vmem>>, %arg5: memref<1x128xf32, #tpu.memory_space<vmem>>, %arg6: memref<24x128xf32, #tpu.memory_space<vmem>>, %arg7: memref<24x128xf32, #tpu.memory_space<vmem>>) attributes {dimension_semantics = [#tpu.dimension_semantics<parallel>, #tpu.dimension_semantics<parallel>, #tpu.dimension_semantics<arbitrary>], iteration_bounds = array<i64: 1, 3, 7>, scalar_prefetch = 0 : i64, scratch_operands = 1 : i64, tpu.core_type = #tpu.core_type<tc>, window_params = [{transform_indices = @transform_0, window_bounds = array<i64: 24, 256>}, {transform_indices = @transform_1, window_bounds = array<i64: 256, 128>}, {transform_indices = @transform_2, window_bounds = array<i64: 1, 128>}, {transform_indices = @transform_3, window_bounds = array<i64: 24, 128>}]} {
    %c0_i32 = arith.constant 0 : i32
    %0 = arith.cmpi eq, %arg2, %c0_i32 : i32
    %1 = arith.extui %0 : i1 to i32
    %c0_i32_0 = arith.constant 0 : i32
    %2 = arith.cmpi ne, %1, %c0_i32_0 : i32
    scf.if %2 {
      %cst_9 = arith.constant 0.000000e+00 : f32
      %12 = vector.broadcast %cst_9 : f32 to vector<24x128xf32>
      %c0_10 = arith.constant 0 : index
      %c0_11 = arith.constant 0 : index
      %13 = vector.load %arg7[%c0_10, %c0_11] : memref<24x128xf32, #tpu.memory_space<vmem>>, vector<24x128xf32>
      tpu.vector_store %arg7[%c0_10, %c0_11], %12 {strides = array<i32>} : memref<24x128xf32, #tpu.memory_space<vmem>>, vector<24x128xf32>,
    } else {
    }
    %c0 = arith.constant 0 : index
    %c0_1 = arith.constant 0 : index
    %3 = vector.load %arg7[%c0, %c0_1] : memref<24x128xf32, #tpu.memory_space<vmem>>, vector<24x128xf32>
    %c0_2 = arith.constant 0 : index
    %c0_3 = arith.constant 0 : index
    %4 = vector.load %arg3[%c0_2, %c0_3] : memref<24x256xbf16, #tpu.memory_space<vmem>>, vector<24x256xbf16>
    %c0_4 = arith.constant 0 : index
    %c0_5 = arith.constant 0 : index
    %5 = vector.load %arg4[%c0_4, %c0_5] : memref<256x128xbf16, #tpu.memory_space<vmem>>, vector<256x128xbf16>
    %cst = arith.constant dense<0.000000e+00> : vector<24x128xf32>
    %6 = tpu.matmul %4, %5, %cst {dimension_numbers = #tpu.dot_dimension_numbers<[1], [0], [0], [1], [0, 0, 1, 1], [], []>} : vector<24x256xbf16>, vector<256x128xbf16>, vector<24x128xf32> -> vector<24x128xf32>
    %7 = arith.addf %3, %6 : vector<24x128xf32>
    %c0_6 = arith.constant 0 : index
    %c0_7 = arith.constant 0 : index
    %8 = vector.load %arg7[%c0_6, %c0_7] : memref<24x128xf32, #tpu.memory_space<vmem>>, vector<24x128xf32>
    tpu.vector_store %arg7[%c0_6, %c0_7], %7 {strides = array<i32>} : memref<24x128xf32, #tpu.memory_space<vmem>>, vector<24x128xf32>,
    %c6_i32 = arith.constant 6 : i32
    %9 = arith.cmpi eq, %arg2, %c6_i32 : i32
    %10 = arith.extui %9 : i1 to i32
    %c0_i32_8 = arith.constant 0 : i32
    %11 = arith.cmpi ne, %10, %c0_i32_8 : i32
    scf.if %11 {
      %c0_9 = arith.constant 0 : index
      %c0_10 = arith.constant 0 : index
      %12 = vector.load %arg7[%c0_9, %c0_10] : memref<24x128xf32, #tpu.memory_space<vmem>>, vector<24x128xf32>
      %c0_11 = arith.constant 0 : index
      %c0_12 = arith.constant 0 : index
      %13 = vector.load %arg5[%c0_11, %c0_12] : memref<1x128xf32, #tpu.memory_space<vmem>>, vector<1x128xf32>
      %14 = vector.broadcast %13 : vector<1x128xf32> to vector<24x128xf32>
      %15 = arith.addf %12, %14 : vector<24x128xf32>
      %cst_13 = arith.constant 0.000000e+00 : f32
      %16 = vector.broadcast %cst_13 : f32 to vector<24x128xf32>
      %17 = arith.maximumf %15, %16 : vector<24x128xf32>
      %c0_14 = arith.constant 0 : index
      %c0_15 = arith.constant 0 : index
      %18 = vector.load %arg6[%c0_14, %c0_15] : memref<24x128xf32, #tpu.memory_space<vmem>>, vector<24x128xf32>
      tpu.vector_store %arg6[%c0_14, %c0_15], %17 {strides = array<i32>} : memref<24x128xf32, #tpu.memory_space<vmem>>, vector<24x128xf32>,
    } else {
    }
    return
  }
  func.func @transform_0(%arg0: i32, %arg1: i32, %arg2: i32) -> (i32, i32) {
    %c0_i32 = arith.constant 0 : i32
    return %arg0, %arg2 : i32, i32
  }
  func.func @transform_1(%arg0: i32, %arg1: i32, %arg2: i32) -> (i32, i32) {
    %c0_i32 = arith.constant 0 : i32
    return %arg2, %arg1 : i32, i32
  }
  func.func @transform_2(%arg0: i32, %arg1: i32, %arg2: i32) -> (i32, i32) {
    %c0_i32 = arith.constant 0 : i32
    %c0_i32_0 = arith.constant 0 : i32
    return %c0_i32, %arg1 : i32, i32
  }
  func.func @transform_3(%arg0: i32, %arg1: i32, %arg2: i32) -> (i32, i32) {
    %c0_i32 = arith.constant 0 : i32
    return %arg0, %arg1 : i32, i32
  }
}

module attributes {stable_mosaic.version = 11 : i64} {
  func.func @_matmul_kernel(%arg0: i32, %arg1: i32, %arg2: i32, %arg3: memref<24x384xbf16, #tpu.memory_space<vmem>>, %arg4: memref<384x256xbf16, #tpu.memory_space<vmem>>, %arg5: memref<1x256xf32, #tpu.memory_space<vmem>>, %arg6: memref<24x256xf32, #tpu.memory_space<vmem>>, %arg7: memref<24x256xf32, #tpu.memory_space<vmem>>) attributes {dimension_semantics = [#tpu.dimension_semantics<parallel>, #tpu.dimension_semantics<parallel>, #tpu.dimension_semantics<arbitrary>], iteration_bounds = array<i64: 1, 1, 9>, scalar_prefetch = 0 : i64, scratch_operands = 1 : i64, tpu.core_type = #tpu.core_type<tc>, window_params = [{transform_indices = @transform_0, window_bounds = array<i64: 24, 384>}, {transform_indices = @transform_1, window_bounds = array<i64: 384, 256>}, {transform_indices = @transform_2, window_bounds = array<i64: 1, 256>}, {transform_indices = @transform_3, window_bounds = array<i64: 24, 256>}]} {
    %c0_i32 = arith.constant 0 : i32
    %0 = arith.cmpi eq, %arg2, %c0_i32 : i32
    %1 = arith.extui %0 : i1 to i32
    %c0_i32_0 = arith.constant 0 : i32
    %2 = arith.cmpi ne, %1, %c0_i32_0 : i32
    scf.if %2 {
      %cst_9 = arith.constant 0.000000e+00 : f32
      %12 = vector.broadcast %cst_9 : f32 to vector<24x256xf32>
      %c0_10 = arith.constant 0 : index
      %c0_11 = arith.constant 0 : index
      %13 = vector.load %arg7[%c0_10, %c0_11] : memref<24x256xf32, #tpu.memory_space<vmem>>, vector<24x256xf32>
      tpu.vector_store %arg7[%c0_10, %c0_11], %12 {strides = array<i32>} : memref<24x256xf32, #tpu.memory_space<vmem>>, vector<24x256xf32>,
    } else {
    }
    %c0 = arith.constant 0 : index
    %c0_1 = arith.constant 0 : index
    %3 = vector.load %arg7[%c0, %c0_1] : memref<24x256xf32, #tpu.memory_space<vmem>>, vector<24x256xf32>
    %c0_2 = arith.constant 0 : index
    %c0_3 = arith.constant 0 : index
    %4 = vector.load %arg3[%c0_2, %c0_3] : memref<24x384xbf16, #tpu.memory_space<vmem>>, vector<24x384xbf16>
    %c0_4 = arith.constant 0 : index
    %c0_5 = arith.constant 0 : index
    %5 = vector.load %arg4[%c0_4, %c0_5] : memref<384x256xbf16, #tpu.memory_space<vmem>>, vector<384x256xbf16>
    %cst = arith.constant dense<0.000000e+00> : vector<24x256xf32>
    %6 = tpu.matmul %4, %5, %cst {dimension_numbers = #tpu.dot_dimension_numbers<[1], [0], [0], [1], [0, 0, 1, 1], [], []>} : vector<24x384xbf16>, vector<384x256xbf16>, vector<24x256xf32> -> vector<24x256xf32>
    %7 = arith.addf %3, %6 : vector<24x256xf32>
    %c0_6 = arith.constant 0 : index
    %c0_7 = arith.constant 0 : index
    %8 = vector.load %arg7[%c0_6, %c0_7] : memref<24x256xf32, #tpu.memory_space<vmem>>, vector<24x256xf32>
    tpu.vector_store %arg7[%c0_6, %c0_7], %7 {strides = array<i32>} : memref<24x256xf32, #tpu.memory_space<vmem>>, vector<24x256xf32>,
    %c8_i32 = arith.constant 8 : i32
    %9 = arith.cmpi eq, %arg2, %c8_i32 : i32
    %10 = arith.extui %9 : i1 to i32
    %c0_i32_8 = arith.constant 0 : i32
    %11 = arith.cmpi ne, %10, %c0_i32_8 : i32
    scf.if %11 {
      %c0_9 = arith.constant 0 : index
      %c0_10 = arith.constant 0 : index
      %12 = vector.load %arg7[%c0_9, %c0_10] : memref<24x256xf32, #tpu.memory_space<vmem>>, vector<24x256xf32>
      %c0_11 = arith.constant 0 : index
      %c0_12 = arith.constant 0 : index
      %13 = vector.load %arg5[%c0_11, %c0_12] : memref<1x256xf32, #tpu.memory_space<vmem>>, vector<1x256xf32>
      %14 = vector.broadcast %13 : vector<1x256xf32> to vector<24x256xf32>
      %15 = arith.addf %12, %14 : vector<24x256xf32>
      %cst_13 = arith.constant 0.000000e+00 : f32
      %16 = vector.broadcast %cst_13 : f32 to vector<24x256xf32>
      %17 = arith.maximumf %15, %16 : vector<24x256xf32>
      %c0_14 = arith.constant 0 : index
      %c0_15 = arith.constant 0 : index
      %18 = vector.load %arg6[%c0_14, %c0_15] : memref<24x256xf32, #tpu.memory_space<vmem>>, vector<24x256xf32>
      tpu.vector_store %arg6[%c0_14, %c0_15], %17 {strides = array<i32>} : memref<24x256xf32, #tpu.memory_space<vmem>>, vector<24x256xf32>,
    } else {
    }
    return
  }
  func.func @transform_0(%arg0: i32, %arg1: i32, %arg2: i32) -> (i32, i32) {
    %c0_i32 = arith.constant 0 : i32
    return %arg0, %arg2 : i32, i32
  }
  func.func @transform_1(%arg0: i32, %arg1: i32, %arg2: i32) -> (i32, i32) {
    %c0_i32 = arith.constant 0 : i32
    return %arg2, %arg1 : i32, i32
  }
  func.func @transform_2(%arg0: i32, %arg1: i32, %arg2: i32) -> (i32, i32) {
    %c0_i32 = arith.constant 0 : i32
    %c0_i32_0 = arith.constant 0 : i32
    return %c0_i32, %arg1 : i32, i32
  }
  func.func @transform_3(%arg0: i32, %arg1: i32, %arg2: i32) -> (i32, i32) {
    %c0_i32 = arith.constant 0 : i32
    return %arg0, %arg1 : i32, i32
  }
}

module attributes {stable_mosaic.version = 11 : i64} {
  func.func @_matmul_kernel(%arg0: i32, %arg1: i32, %arg2: i32, %arg3: memref<24x384xbf16, #tpu.memory_space<vmem>>, %arg4: memref<384x256xbf16, #tpu.memory_space<vmem>>, %arg5: memref<1x256xf32, #tpu.memory_space<vmem>>, %arg6: memref<24x256xf32, #tpu.memory_space<vmem>>, %arg7: memref<24x256xf32, #tpu.memory_space<vmem>>) attributes {dimension_semantics = [#tpu.dimension_semantics<parallel>, #tpu.dimension_semantics<parallel>, #tpu.dimension_semantics<arbitrary>], iteration_bounds = array<i64: 1, 1, 6>, scalar_prefetch = 0 : i64, scratch_operands = 1 : i64, tpu.core_type = #tpu.core_type<tc>, window_params = [{transform_indices = @transform_0, window_bounds = array<i64: 24, 384>}, {transform_indices = @transform_1, window_bounds = array<i64: 384, 256>}, {transform_indices = @transform_2, window_bounds = array<i64: 1, 256>}, {transform_indices = @transform_3, window_bounds = array<i64: 24, 256>}]} {
    %c0_i32 = arith.constant 0 : i32
    %0 = arith.cmpi eq, %arg2, %c0_i32 : i32
    %1 = arith.extui %0 : i1 to i32
    %c0_i32_0 = arith.constant 0 : i32
    %2 = arith.cmpi ne, %1, %c0_i32_0 : i32
    scf.if %2 {
      %cst_9 = arith.constant 0.000000e+00 : f32
      %12 = vector.broadcast %cst_9 : f32 to vector<24x256xf32>
      %c0_10 = arith.constant 0 : index
      %c0_11 = arith.constant 0 : index
      %13 = vector.load %arg7[%c0_10, %c0_11] : memref<24x256xf32, #tpu.memory_space<vmem>>, vector<24x256xf32>
      tpu.vector_store %arg7[%c0_10, %c0_11], %12 {strides = array<i32>} : memref<24x256xf32, #tpu.memory_space<vmem>>, vector<24x256xf32>,
    } else {
    }
    %c0 = arith.constant 0 : index
    %c0_1 = arith.constant 0 : index
    %3 = vector.load %arg7[%c0, %c0_1] : memref<24x256xf32, #tpu.memory_space<vmem>>, vector<24x256xf32>
    %c0_2 = arith.constant 0 : index
    %c0_3 = arith.constant 0 : index
    %4 = vector.load %arg3[%c0_2, %c0_3] : memref<24x384xbf16, #tpu.memory_space<vmem>>, vector<24x384xbf16>
    %c0_4 = arith.constant 0 : index
    %c0_5 = arith.constant 0 : index
    %5 = vector.load %arg4[%c0_4, %c0_5] : memref<384x256xbf16, #tpu.memory_space<vmem>>, vector<384x256xbf16>
    %cst = arith.constant dense<0.000000e+00> : vector<24x256xf32>
    %6 = tpu.matmul %4, %5, %cst {dimension_numbers = #tpu.dot_dimension_numbers<[1], [0], [0], [1], [0, 0, 1, 1], [], []>} : vector<24x384xbf16>, vector<384x256xbf16>, vector<24x256xf32> -> vector<24x256xf32>
    %7 = arith.addf %3, %6 : vector<24x256xf32>
    %c0_6 = arith.constant 0 : index
    %c0_7 = arith.constant 0 : index
    %8 = vector.load %arg7[%c0_6, %c0_7] : memref<24x256xf32, #tpu.memory_space<vmem>>, vector<24x256xf32>
    tpu.vector_store %arg7[%c0_6, %c0_7], %7 {strides = array<i32>} : memref<24x256xf32, #tpu.memory_space<vmem>>, vector<24x256xf32>,
    %c5_i32 = arith.constant 5 : i32
    %9 = arith.cmpi eq, %arg2, %c5_i32 : i32
    %10 = arith.extui %9 : i1 to i32
    %c0_i32_8 = arith.constant 0 : i32
    %11 = arith.cmpi ne, %10, %c0_i32_8 : i32
    scf.if %11 {
      %c0_9 = arith.constant 0 : index
      %c0_10 = arith.constant 0 : index
      %12 = vector.load %arg7[%c0_9, %c0_10] : memref<24x256xf32, #tpu.memory_space<vmem>>, vector<24x256xf32>
      %c0_11 = arith.constant 0 : index
      %c0_12 = arith.constant 0 : index
      %13 = vector.load %arg5[%c0_11, %c0_12] : memref<1x256xf32, #tpu.memory_space<vmem>>, vector<1x256xf32>
      %14 = vector.broadcast %13 : vector<1x256xf32> to vector<24x256xf32>
      %15 = arith.addf %12, %14 : vector<24x256xf32>
      %cst_13 = arith.constant 0.000000e+00 : f32
      %16 = vector.broadcast %cst_13 : f32 to vector<24x256xf32>
      %17 = arith.maximumf %15, %16 : vector<24x256xf32>
      %c0_14 = arith.constant 0 : index
      %c0_15 = arith.constant 0 : index
      %18 = vector.load %arg6[%c0_14, %c0_15] : memref<24x256xf32, #tpu.memory_space<vmem>>, vector<24x256xf32>
      tpu.vector_store %arg6[%c0_14, %c0_15], %17 {strides = array<i32>} : memref<24x256xf32, #tpu.memory_space<vmem>>, vector<24x256xf32>,
    } else {
    }
    return
  }
  func.func @transform_0(%arg0: i32, %arg1: i32, %arg2: i32) -> (i32, i32) {
    %c0_i32 = arith.constant 0 : i32
    return %arg0, %arg2 : i32, i32
  }
  func.func @transform_1(%arg0: i32, %arg1: i32, %arg2: i32) -> (i32, i32) {
    %c0_i32 = arith.constant 0 : i32
    return %arg2, %arg1 : i32, i32
  }
  func.func @transform_2(%arg0: i32, %arg1: i32, %arg2: i32) -> (i32, i32) {
    %c0_i32 = arith.constant 0 : i32
    %c0_i32_0 = arith.constant 0 : i32
    return %c0_i32, %arg1 : i32, i32
  }
  func.func @transform_3(%arg0: i32, %arg1: i32, %arg2: i32) -> (i32, i32) {
    %c0_i32 = arith.constant 0 : i32
    return %arg0, %arg1 : i32, i32
  }
}

module attributes {stable_mosaic.version = 11 : i64} {
  func.func @_matmul_kernel(%arg0: i32, %arg1: i32, %arg2: i32, %arg3: memref<8x256xbf16, #tpu.memory_space<vmem>>, %arg4: memref<256x128xbf16, #tpu.memory_space<vmem>>, %arg5: memref<1x128xf32, #tpu.memory_space<vmem>>, %arg6: memref<8x128xf32, #tpu.memory_space<vmem>>, %arg7: memref<8x128xf32, #tpu.memory_space<vmem>>) attributes {dimension_semantics = [#tpu.dimension_semantics<parallel>, #tpu.dimension_semantics<parallel>, #tpu.dimension_semantics<arbitrary>], iteration_bounds = array<i64: 1, 9, 1>, scalar_prefetch = 0 : i64, scratch_operands = 1 : i64, tpu.core_type = #tpu.core_type<tc>, window_params = [{transform_indices = @transform_0, window_bounds = array<i64: 8, 256>}, {transform_indices = @transform_1, window_bounds = array<i64: 256, 128>}, {transform_indices = @transform_2, window_bounds = array<i64: 1, 128>}, {transform_indices = @transform_3, window_bounds = array<i64: 8, 128>}]} {
    %c0_i32 = arith.constant 0 : i32
    %0 = arith.cmpi eq, %arg2, %c0_i32 : i32
    %1 = arith.extui %0 : i1 to i32
    %c0_i32_0 = arith.constant 0 : i32
    %2 = arith.cmpi ne, %1, %c0_i32_0 : i32
    scf.if %2 {
      %cst_10 = arith.constant 0.000000e+00 : f32
      %12 = vector.broadcast %cst_10 : f32 to vector<8x128xf32>
      %c0_11 = arith.constant 0 : index
      %c0_12 = arith.constant 0 : index
      %13 = vector.load %arg7[%c0_11, %c0_12] : memref<8x128xf32, #tpu.memory_space<vmem>>, vector<8x128xf32>
      tpu.vector_store %arg7[%c0_11, %c0_12], %12 {strides = array<i32>} : memref<8x128xf32, #tpu.memory_space<vmem>>, vector<8x128xf32>,
    } else {
    }
    %c0 = arith.constant 0 : index
    %c0_1 = arith.constant 0 : index
    %3 = vector.load %arg7[%c0, %c0_1] : memref<8x128xf32, #tpu.memory_space<vmem>>, vector<8x128xf32>
    %c0_2 = arith.constant 0 : index
    %c0_3 = arith.constant 0 : index
    %4 = vector.load %arg3[%c0_2, %c0_3] : memref<8x256xbf16, #tpu.memory_space<vmem>>, vector<8x256xbf16>
    %c0_4 = arith.constant 0 : index
    %c0_5 = arith.constant 0 : index
    %5 = vector.load %arg4[%c0_4, %c0_5] : memref<256x128xbf16, #tpu.memory_space<vmem>>, vector<256x128xbf16>
    %cst = arith.constant dense<0.000000e+00> : vector<8x128xf32>
    %6 = tpu.matmul %4, %5, %cst {dimension_numbers = #tpu.dot_dimension_numbers<[1], [0], [0], [1], [0, 0, 1, 1], [], []>} : vector<8x256xbf16>, vector<256x128xbf16>, vector<8x128xf32> -> vector<8x128xf32>
    %7 = arith.addf %3, %6 : vector<8x128xf32>
    %c0_6 = arith.constant 0 : index
    %c0_7 = arith.constant 0 : index
    %8 = vector.load %arg7[%c0_6, %c0_7] : memref<8x128xf32, #tpu.memory_space<vmem>>, vector<8x128xf32>
    tpu.vector_store %arg7[%c0_6, %c0_7], %7 {strides = array<i32>} : memref<8x128xf32, #tpu.memory_space<vmem>>, vector<8x128xf32>,
    %c0_i32_8 = arith.constant 0 : i32
    %9 = arith.cmpi eq, %arg2, %c0_i32_8 : i32
    %10 = arith.extui %9 : i1 to i32
    %c0_i32_9 = arith.constant 0 : i32
    %11 = arith.cmpi ne, %10, %c0_i32_9 : i32
    scf.if %11 {
      %c0_10 = arith.constant 0 : index
      %c0_11 = arith.constant 0 : index
      %12 = vector.load %arg7[%c0_10, %c0_11] : memref<8x128xf32, #tpu.memory_space<vmem>>, vector<8x128xf32>
      %c0_12 = arith.constant 0 : index
      %c0_13 = arith.constant 0 : index
      %13 = vector.load %arg5[%c0_12, %c0_13] : memref<1x128xf32, #tpu.memory_space<vmem>>, vector<1x128xf32>
      %14 = vector.broadcast %13 : vector<1x128xf32> to vector<8x128xf32>
      %15 = arith.addf %12, %14 : vector<8x128xf32>
      %c0_14 = arith.constant 0 : index
      %c0_15 = arith.constant 0 : index
      %16 = vector.load %arg6[%c0_14, %c0_15] : memref<8x128xf32, #tpu.memory_space<vmem>>, vector<8x128xf32>
      tpu.vector_store %arg6[%c0_14, %c0_15], %15 {strides = array<i32>} : memref<8x128xf32, #tpu.memory_space<vmem>>, vector<8x128xf32>,
    } else {
    }
    return
  }
  func.func @transform_0(%arg0: i32, %arg1: i32, %arg2: i32) -> (i32, i32) {
    %c0_i32 = arith.constant 0 : i32
    return %arg0, %arg2 : i32, i32
  }
  func.func @transform_1(%arg0: i32, %arg1: i32, %arg2: i32) -> (i32, i32) {
    %c0_i32 = arith.constant 0 : i32
    return %arg2, %arg1 : i32, i32
  }
  func.func @transform_2(%arg0: i32, %arg1: i32, %arg2: i32) -> (i32, i32) {
    %c0_i32 = arith.constant 0 : i32
    %c0_i32_0 = arith.constant 0 : i32
    return %c0_i32, %arg1 : i32, i32
  }
  func.func @transform_3(%arg0: i32, %arg1: i32, %arg2: i32) -> (i32, i32) {
    %c0_i32 = arith.constant 0 : i32
    return %arg0, %arg1 : i32, i32
  }
}

module attributes {stable_mosaic.version = 11 : i64} {
  func.func @_classifier_kernel(%arg0: i32, %arg1: memref<24x128xbf16, #tpu.memory_space<vmem>>, %arg2: memref<128x256xbf16, #tpu.memory_space<vmem>>, %arg3: memref<1x256xf32, #tpu.memory_space<vmem>>, %arg4: memref<256x256xbf16, #tpu.memory_space<vmem>>, %arg5: memref<1x256xf32, #tpu.memory_space<vmem>>, %arg6: memref<256x128xbf16, #tpu.memory_space<vmem>>, %arg7: memref<1x128xf32, #tpu.memory_space<vmem>>, %arg8: memref<24x128xf32, #tpu.memory_space<vmem>>) attributes {dimension_semantics = [#tpu.dimension_semantics<parallel>], iteration_bounds = array<i64: 1>, scalar_prefetch = 0 : i64, scratch_operands = 0 : i64, tpu.core_type = #tpu.core_type<tc>, window_params = [{transform_indices = @transform_0, window_bounds = array<i64: 24, 128>}, {pipeline_mode = #tpu.pipeline_mode<synchronous>, transform_indices = @transform_1, window_bounds = array<i64: 128, 256>}, {pipeline_mode = #tpu.pipeline_mode<synchronous>, transform_indices = @transform_2, window_bounds = array<i64: 1, 256>}, {pipeline_mode = #tpu.pipeline_mode<synchronous>, transform_indices = @transform_3, window_bounds = array<i64: 256, 256>}, {pipeline_mode = #tpu.pipeline_mode<synchronous>, transform_indices = @transform_4, window_bounds = array<i64: 1, 256>}, {pipeline_mode = #tpu.pipeline_mode<synchronous>, transform_indices = @transform_5, window_bounds = array<i64: 256, 128>}, {pipeline_mode = #tpu.pipeline_mode<synchronous>, transform_indices = @transform_6, window_bounds = array<i64: 1, 128>}, {transform_indices = @transform_7, window_bounds = array<i64: 24, 128>}]} {
    %c0 = arith.constant 0 : index
    %c0_0 = arith.constant 0 : index
    %0 = vector.load %arg1[%c0, %c0_0] : memref<24x128xbf16, #tpu.memory_space<vmem>>, vector<24x128xbf16>
    %c0_1 = arith.constant 0 : index
    %c0_2 = arith.constant 0 : index
    %1 = vector.load %arg2[%c0_1, %c0_2] : memref<128x256xbf16, #tpu.memory_space<vmem>>, vector<128x256xbf16>
    %cst = arith.constant dense<0.000000e+00> : vector<24x256xf32>
    %2 = tpu.matmul %0, %1, %cst {dimension_numbers = #tpu.dot_dimension_numbers<[1], [0], [0], [1], [0, 0, 1, 1], [], []>} : vector<24x128xbf16>, vector<128x256xbf16>, vector<24x256xf32> -> vector<24x256xf32>
    %c0_3 = arith.constant 0 : index
    %c0_4 = arith.constant 0 : index
    %3 = vector.load %arg3[%c0_3, %c0_4] : memref<1x256xf32, #tpu.memory_space<vmem>>, vector<1x256xf32>
    %4 = vector.broadcast %3 : vector<1x256xf32> to vector<24x256xf32>
    %5 = arith.addf %2, %4 : vector<24x256xf32>
    %cst_5 = arith.constant 0.000000e+00 : f32
    %6 = vector.broadcast %cst_5 : f32 to vector<24x256xf32>
    %7 = arith.maximumf %5, %6 : vector<24x256xf32>
    %8 = arith.truncf %7 : vector<24x256xf32> to vector<24x256xbf16>
    %c0_6 = arith.constant 0 : index
    %c0_7 = arith.constant 0 : index
    %9 = vector.load %arg4[%c0_6, %c0_7] : memref<256x256xbf16, #tpu.memory_space<vmem>>, vector<256x256xbf16>
    %cst_8 = arith.constant dense<0.000000e+00> : vector<24x256xf32>
    %10 = tpu.matmul %8, %9, %cst_8 {dimension_numbers = #tpu.dot_dimension_numbers<[1], [0], [0], [1], [0, 0, 1, 1], [], []>} : vector<24x256xbf16>, vector<256x256xbf16>, vector<24x256xf32> -> vector<24x256xf32>
    %c0_9 = arith.constant 0 : index
    %c0_10 = arith.constant 0 : index
    %11 = vector.load %arg5[%c0_9, %c0_10] : memref<1x256xf32, #tpu.memory_space<vmem>>, vector<1x256xf32>
    %12 = vector.broadcast %11 : vector<1x256xf32> to vector<24x256xf32>
    %13 = arith.addf %10, %12 : vector<24x256xf32>
    %cst_11 = arith.constant 0.000000e+00 : f32
    %14 = vector.broadcast %cst_11 : f32 to vector<24x256xf32>
    %15 = arith.maximumf %13, %14 : vector<24x256xf32>
    %16 = arith.truncf %15 : vector<24x256xf32> to vector<24x256xbf16>
    %c0_12 = arith.constant 0 : index
    %c0_13 = arith.constant 0 : index
    %17 = vector.load %arg6[%c0_12, %c0_13] : memref<256x128xbf16, #tpu.memory_space<vmem>>, vector<256x128xbf16>
    %cst_14 = arith.constant dense<0.000000e+00> : vector<24x128xf32>
    %18 = tpu.matmul %16, %17, %cst_14 {dimension_numbers = #tpu.dot_dimension_numbers<[1], [0], [0], [1], [0, 0, 1, 1], [], []>} : vector<24x256xbf16>, vector<256x128xbf16>, vector<24x128xf32> -> vector<24x128xf32>
    %c0_15 = arith.constant 0 : index
    %c0_16 = arith.constant 0 : index
    %19 = vector.load %arg7[%c0_15, %c0_16] : memref<1x128xf32, #tpu.memory_space<vmem>>, vector<1x128xf32>
    %20 = vector.broadcast %19 : vector<1x128xf32> to vector<24x128xf32>
    %21 = arith.addf %18, %20 : vector<24x128xf32>
    %cst_17 = arith.constant dense<0xFF800000> : vector<24xf32>
    %22 = vector.multi_reduction <maximumf>, %21, %cst_17 [1] : vector<24x128xf32> to vector<24xf32>
    %23 = vector.shape_cast %22 : vector<24xf32> to vector<24x1xf32>
    %24 = vector.broadcast %23 : vector<24x1xf32> to vector<24x128xf32>
    %25 = arith.subf %21, %24 : vector<24x128xf32>
    %26 = math.exp %25 : vector<24x128xf32>
    %cst_18 = arith.constant dense<0.000000e+00> : vector<24xf32>
    %27 = vector.multi_reduction <add>, %26, %cst_18 [1] : vector<24x128xf32> to vector<24xf32>
    %28 = vector.shape_cast %27 : vector<24xf32> to vector<24x1xf32>
    %29 = math.log %28 : vector<24x1xf32>
    %30 = vector.broadcast %29 : vector<24x1xf32> to vector<24x128xf32>
    %31 = arith.subf %25, %30 : vector<24x128xf32>
    %c0_19 = arith.constant 0 : index
    %c0_20 = arith.constant 0 : index
    %32 = vector.load %arg8[%c0_19, %c0_20] : memref<24x128xf32, #tpu.memory_space<vmem>>, vector<24x128xf32>
    tpu.vector_store %arg8[%c0_19, %c0_20], %31 {strides = array<i32>} : memref<24x128xf32, #tpu.memory_space<vmem>>, vector<24x128xf32>,
    return
  }
  func.func @transform_0(%arg0: i32) -> (i32, i32) {
    %c0_i32 = arith.constant 0 : i32
    %c0_i32_0 = arith.constant 0 : i32
    return %arg0, %c0_i32 : i32, i32
  }
  func.func @transform_1(%arg0: i32) -> (i32, i32) {
    %c0_i32 = arith.constant 0 : i32
    %c0_i32_0 = arith.constant 0 : i32
    %c0_i32_1 = arith.constant 0 : i32
    return %c0_i32, %c0_i32_0 : i32, i32
  }
  func.func @transform_2(%arg0: i32) -> (i32, i32) {
    %c0_i32 = arith.constant 0 : i32
    %c0_i32_0 = arith.constant 0 : i32
    %c0_i32_1 = arith.constant 0 : i32
    return %c0_i32, %c0_i32_0 : i32, i32
  }
  func.func @transform_3(%arg0: i32) -> (i32, i32) {
    %c0_i32 = arith.constant 0 : i32
    %c0_i32_0 = arith.constant 0 : i32
    %c0_i32_1 = arith.constant 0 : i32
    return %c0_i32, %c0_i32_0 : i32, i32
  }
  func.func @transform_4(%arg0: i32) -> (i32, i32) {
    %c0_i32 = arith.constant 0 : i32
    %c0_i32_0 = arith.constant 0 : i32
    %c0_i32_1 = arith.constant 0 : i32
    return %c0_i32, %c0_i32_0 : i32, i32
  }
  func.func @transform_5(%arg0: i32) -> (i32, i32) {
    %c0_i32 = arith.constant 0 : i32
    %c0_i32_0 = arith.constant 0 : i32
    %c0_i32_1 = arith.constant 0 : i32
    return %c0_i32, %c0_i32_0 : i32, i32
  }
  func.func @transform_6(%arg0: i32) -> (i32, i32) {
    %c0_i32 = arith.constant 0 : i32
    %c0_i32_0 = arith.constant 0 : i32
    %c0_i32_1 = arith.constant 0 : i32
    return %c0_i32, %c0_i32_0 : i32, i32
  }
  func.func @transform_7(%arg0: i32) -> (i32, i32) {
    %c0_i32 = arith.constant 0 : i32
    %c0_i32_0 = arith.constant 0 : i32
    return %arg0, %c0_i32 : i32, i32
  }
}

</mosaic_0001>

<bundles_post_ra>
// kernel: classnet_forward.7
= control target key start
LH: loop header
LB: loop body
LE: loop exit
PB: predicated region body
PF: predicated region fallthrough
CT: control target
= control target key end

     0   :  { %s1369_s12 = smov 0   ;;  %s1371_s13 = smov 0   ;;  %s1546_s0 = inlined_call_operand.vmem [shape: bf16[512,384], index: 0, kind: input, shape index: {}]   ;;  %s1547_s1 = inlined_call_operand.vmem [shape: bf16[384,128], index: 1, kind: input, shape index: {}]   ;;  %s1548_s2 = inlined_call_operand.vmem [shape: f32[1,128], index: 2, kind: input, shape index: {}]   ;;  %s1549_s3 = inlined_call_operand.vmem [shape: f32[512,128], index: 3, kind: output, shape index: {}]  }
   0x1   :  { %s1373_s14 = smov 0  }
   0x2 LB: > { %s32_s15 = sadd.s32 1, %s1343_s13  ;;  %p1076_p0 = scmp.ge.s32.totalorder %s1347_s14, 1  ;;  %s1347_s14 = sphi %s1373_s14, %s13_s14   ;;  %s1343_s13 = sphi %s1371_s13, %s1551_s13   ;;  %s1339_s12 = sphi %s1369_s12, %s1550_s12  }
   0x3   : > { %p34_p1 = scmp.ge.s32.totalorder %s32_s15, 4  ;;  %p191_p2 = scmp.lt.s32.totalorder %s1347_s14, 5 }
   0x5   : > { %s1553_s15 = smov (%p34_p1, %s32_s15), 0  ;;  %p192_p3 = pnand %p1076_p0, %p191_p2 }
   0x6   : > { %v1269_v0 = vld [vmem:[%s1547_s1 + $0x40] sm:$0xff] (!%p192_p3)   ;;  %v1272_v3 = vld [vmem:[%s1547_s1 + $0x48] sm:$0xff] (!%p192_p3)   ;;  %v1275_v6 = vld [vmem:[%s1547_s1 + $0x50] sm:$0xff] (!%p192_p3)   ;;  %s1077_s5 = sshll.u32 (!%p192_p3), %s1339_s12, 4 }
   0x7   : > { %195 = sbr.rel (%p192_p3) target bundleno = 319 (0x13f), region = 32  ;;  %v1270_v1 = vld [vmem:[%s1547_s1] sm:$0xff] (!%p192_p3)   ;;  %1132 = vmatprep.subr.bf16.mxu0 (!%p192_p3), %v1269_v0  ;;  %v1273_v4 = vld [vmem:[%s1547_s1 + $0x8] sm:$0xff] (!%p192_p3)   ;;  %v1276_v7 = vld [vmem:[%s1547_s1 + $0x10] sm:$0xff] (!%p192_p3)   ;;  %p236_p4 = scmp.lt.s32.totalorder (!%p192_p3), %s1077_s5, 63 }
   0x8   : > { %v1271_v2 = vld [vmem:[%s1547_s1 + $0x80] sm:$0xff] (!%p192_p3)   ;;  %1133 = vmatpush3.bf16.msra.mxu0 (!%p192_p3), %v1270_v1  ;;  %v1274_v5 = vld [vmem:[%s1547_s1 + $0x88] sm:$0xff] (!%p192_p3)   ;;  %v1277_v8 = vld [vmem:[%s1547_s1 + $0x90] sm:$0xff] (!%p192_p3)  }
   0x9   : > { %1212 = vmatprep.subr.bf16.mxu1 (!%p192_p3), %v1271_v2  ;;  %1134 = vmatprep.subr.bf16.mxu0 (!%p192_p3), %v1272_v3  ;;  %v1278_v9 = vld [vmem:[%s1547_s1 + $0x58] sm:$0xff] (!%p192_p3)   ;;  %v1281_v12 = vld [vmem:[%s1547_s1 + $0x60] sm:$0xff] (!%p192_p3)   ;;  %v1284_v15 = vld [vmem:[%s1547_s1 + $0x68] sm:$0xff] (!%p192_p3)  }
   0xa   : > { %1213 = vmatpush3.bf16.msra.mxu1 (!%p192_p3), %v1271_v2  ;;  %v1279_v10 = vld [vmem:[%s1547_s1 + $0x18] sm:$0xff] (!%p192_p3)   ;;  %v1283_v13 = vld [vmem:[%s1547_s1 + $0xa0] sm:$0xff] (!%p192_p3)   ;;  %v1286_v16 = vld [vmem:[%s1547_s1 + $0xa8] sm:$0xff] (!%p192_p3)  }
   0xb   : > { %1214 = vmatprep.subr.bf16.mxu1 (!%p192_p3), %v1274_v5  ;;  %v1280_v11 = vld [vmem:[%s1547_s1 + $0x98] sm:$0xff] (!%p192_p3)   ;;  %v1282_v14 = vld [vmem:[%s1547_s1 + $0x20] sm:$0xff] (!%p192_p3)   ;;  %v1285_v17 = vld [vmem:[%s1547_s1 + $0x28] sm:$0xff] (!%p192_p3)  }
   0xc   : > { %1135 = vmatpush3.bf16.msra.mxu0 (!%p192_p3), %v1273_v4  ;;  %v1287_v18 = vld [vmem:[%s1547_s1 + $0x70] sm:$0xff] (!%p192_p3)   ;;  %v1290_v21 = vld [vmem:[%s1547_s1 + $0x78] sm:$0xff] (!%p192_p3)   ;;  %v1497_v55 = vld [vmem:[%s1548_s2] ss:$0 sm:$0xff] (!%p192_p3) }
   0xd   : > { %1136 = vmatprep.subr.bf16.mxu0 (!%p192_p3), %v1275_v6  ;;  %v1288_v19 = vld [vmem:[%s1547_s1 + $0x30] sm:$0xff] (!%p192_p3)   ;;  %v1292_v22 = vld [vmem:[%s1547_s1 + $0xb8] sm:$0xff] (!%p192_p3)  }
   0xe   : > { %1215 = vmatpush3.bf16.msra.mxu1 %v1274_v5  ;;  %s1555_s5 = smov (!%p236_p4, %s1077_s5), 63  ;;  %v1289_v20 = vld [vmem:[%s1547_s1 + $0xb0] sm:$0xff]   ;;  %v1291_v25 = vld [vmem:[%s1547_s1 + $0x38] sm:$0xff]  }
   0xf   : > { %1216 = vmatprep.subr.bf16.mxu1 %v1277_v8  ;;  %s1244_s27 = smul.u32 12, %s1555_s5  ;;  %s1080_s24 = sshll.u32 %s1555_s5, 3 }
  0x10   : > { %1137 = vmatpush3.bf16.msra.mxu0 %v1276_v7 }
  0x11   : > { %1138 = vmatprep.subr.bf16.mxu0 %v1278_v9  ;;  %s1459_s16 = scalar_lea.vmem %s1546_s0, %s1244_s27  ;;  %s1504_s27 = scalar_lea.vmem %s1549_s3, %s1080_s24 }
  0x12   : > { %1217 = vmatpush3.bf16.msra.mxu1 %v1277_v8  ;;  %v1295_v23 = vld [vmem:[%s1459_s16 + $0x4] ss:$12 sps:$4 sm:$0xff]   ;;  %v1296_v24 = vld [vmem:[%s1459_s16 + $0x8] ss:$12 sps:$4 sm:$0xff]   ;;  %v1293_v26 = vld [vmem:[%s1459_s16] ss:$12 sps:$4 sm:$0xff]  }
  0x13   : > { %1218 = vmatprep.subr.bf16.mxu1 %v1280_v11  ;;  %688 = vmatprep.mubr.bf16.mxu0 %v1295_v23  ;;  %v1298_v27 = vld [vmem:[%s1459_s16 + $0x1c] ss:$12 sps:$4 sm:$0xff]   ;;  %v1297_v28 = vld [vmem:[%s1459_s16 + $0x20] ss:$12 sps:$4 sm:$0xff]   ;;  %v1304_v29 = vld [vmem:[%s1459_s16 + $0x38] ss:$12 sps:$4 sm:$0xff]  }
  0x14   : > { %1139 = vmatpush3.bf16.msra.mxu0 %v1279_v10  ;;  %1228 = vmatprep.mubr.bf16.mxu1 %v1296_v24  ;;  %v1300_v30 = vld [vmem:[%s1459_s16 + $0x18] ss:$12 sps:$4 sm:$0xff]   ;;  %v1301_v31 = vld [vmem:[%s1459_s16 + $0x34] ss:$12 sps:$4 sm:$0xff]   ;;  %v1305_v32 = vld [vmem:[%s1459_s16 + $0x50] ss:$12 sps:$4 sm:$0xff]  }
  0x15   : > { %1140 = vmatprep.subr.bf16.mxu0 %v1281_v12  ;;  %v1312_v33 = vld [vmem:[%s1459_s16 + $0x68] ss:$12 sps:$4 sm:$0xff]   ;;  %v1303_v34 = vld [vmem:[%s1459_s16 + $0x30] ss:$12 sps:$4 sm:$0xff]   ;;  %v1306_v35 = vld [vmem:[%s1459_s16 + $0x4c] ss:$12 sps:$4 sm:$0xff]  }
  0x16   : > { %1219 = vmatpush3.bf16.msra.mxu1 %v1280_v11  ;;  %v1313_v36 = vld [vmem:[%s1459_s16 + $0x80] ss:$12 sps:$4 sm:$0xff]   ;;  %v1320_v37 = vld [vmem:[%s1459_s16 + $0x98] ss:$12 sps:$4 sm:$0xff]   ;;  %v1308_v38 = vld [vmem:[%s1459_s16 + $0x48] ss:$12 sps:$4 sm:$0xff]  }
  0x17   : > { %1220 = vmatprep.subr.bf16.mxu1 %v1283_v13  ;;  %v1309_v39 = vld [vmem:[%s1459_s16 + $0x64] ss:$12 sps:$4 sm:$0xff]   ;;  %v1311_v41 = vld [vmem:[%s1459_s16 + $0x60] ss:$12 sps:$4 sm:$0xff]   ;;  %v1314_v42 = vld [vmem:[%s1459_s16 + $0x7c] ss:$12 sps:$4 sm:$0xff]  }
  0x18   : > { %1141 = vmatpush3.bf16.msra.mxu0 %v1282_v14  ;;  %v1321_v40 = vld [vmem:[%s1459_s16 + $0xb0] ss:$12 sps:$4 sm:$0xff]   ;;  %v1316_v43 = vld [vmem:[%s1459_s16 + $0x78] ss:$12 sps:$4 sm:$0xff]   ;;  %v1317_v44 = vld [vmem:[%s1459_s16 + $0x94] ss:$12 sps:$4 sm:$0xff]  }
  0x19   : > { %1142 = vmatprep.subr.bf16.mxu0 %v1284_v15  ;;  %v1319_v45 = vld [vmem:[%s1459_s16 + $0x90] ss:$12 sps:$4 sm:$0xff]   ;;  %v1322_v46 = vld [vmem:[%s1459_s16 + $0xac] ss:$12 sps:$4 sm:$0xff]   ;;  %v1324_v47 = vld [vmem:[%s1459_s16 + $0xa8] ss:$12 sps:$4 sm:$0xff]  }
  0x1a   : > { %1221 = vmatpush3.bf16.msra.mxu1 %v1283_v13 }
  0x1b   : > { %1222 = vmatprep.subr.bf16.mxu1 %v1286_v16 }
  0x1c   : > { %1143 = vmatpush3.bf16.msra.mxu0 %v1285_v17 }
  0x1d   : > { %1144 = vmatprep.subr.bf16.mxu0 %v1287_v18 }
  0x1e   : > { %1223 = vmatpush3.bf16.msra.mxu1 %v1286_v16 }
  0x1f   : > { %1224 = vmatprep.subr.bf16.mxu1 %v1289_v20 }
  0x20   : > { %1145 = vmatpush3.bf16.msra.mxu0 %v1288_v19 }
  0x21   : > { %1146 = vmatprep.subr.bf16.mxu0 %v1290_v21 }
  0x22   : > { %1225 = vmatpush3.bf16.msra.mxu1 %v1289_v20 }
  0x23   : > { %1226 = vmatprep.subr.bf16.mxu1 %v1292_v22 }
  0x24   : > { %1147 = vmatpush3.bf16.msra.mxu0 %v1291_v25 }
  0x26   : > { %1227 = vmatpush3.bf16.msra.mxu1 %v1292_v22 }
  0x27   : > { %689 = vmatmul.mubr.bf16.vlgmr.msra.gmra.mrb[0].mxu0 %v1293_v26 }
  0x28   : > { %696 = vmatprep.mubr.bf16.mxu0 %v1298_v27 }
  0x29   : > { %1229 = vmatmul.mubr.bf16.vlgmr.msra.gmra.mrb[0].mxu1 %v1297_v28 }
  0x2a   : > { %1232 = vmatprep.mubr.bf16.mxu1 %v1304_v29 }
  0x2f   : > { %697 = vmatmul.mubr.bf16.gmra.mrb[4].mxu0 %v1300_v30 }
  0x30   : > { %704 = vmatprep.mubr.bf16.mxu0 %v1301_v31 }
  0x31   : > { %1233 = vmatmul.mubr.bf16.gmra.mrb[4].mxu1 %v1305_v32 }
  0x32   : > { %1236 = vmatprep.mubr.bf16.mxu1 %v1312_v33 }
  0x37   : > { %705 = vmatmul.mubr.bf16.gmra.mrb[8].mxu0 %v1303_v34 }
  0x38   : > { %712 = vmatprep.mubr.bf16.mxu0 %v1306_v35 }
  0x39   : > { %1237 = vmatmul.mubr.bf16.gmra.mrb[8].mxu1 %v1313_v36 }
  0x3a   : > { %1240 = vmatprep.mubr.bf16.mxu1 %v1320_v37 }
  0x3f   : > { %713 = vmatmul.mubr.bf16.gmra.mrb[12].mxu0 %v1308_v38 }
  0x40   : > { %720 = vmatprep.mubr.bf16.mxu0 %v1309_v39 }
  0x41   : > { %1241 = vmatmul.mubr.bf16.gmra.mrb[12].mxu1 %v1321_v40 }
  0x47   : > { %721 = vmatmul.mubr.bf16.gmra.mrb[16].mxu0 %v1311_v41 }
  0x48   : > { %728 = vmatprep.mubr.bf16.mxu0 %v1314_v42 }
  0x4f   : > { %729 = vmatmul.mubr.bf16.gmra.mrb[20].mxu0 %v1316_v43 }
  0x50   : > { %736 = vmatprep.mubr.bf16.mxu0 %v1317_v44 }
  0x57   : > { %737 = vmatmul.mubr.bf16.gmra.mrb[24].mxu0 %v1319_v45 }
  0x58   : > { %744 = vmatprep.mubr.bf16.mxu0 %v1322_v46 }
  0x5f   : > { %745 = vmatmul.mubr.bf16.gmra.mrb[28].mxu0 %v1324_v47 }
  0xfa   : > { %v1148_v48 = vpop.f32.mrb[0].mxu0 }
  0xfb   : > { %v1149_v49 = vpop.f32.mrb[1].mxu0 }
  0xfc   : > { %v1150_v50 = vadd.f32 %v1149_v49, %v1148_v48  ;;  %v1151_v51 = vpop.f32.mrb[2].mxu0  ;;  %v1230_v52 = vpop.f32.mrb[0].mxu1 }
  0xfd   : > { %v1152_v53 = vpop.f32.mrb[3].mxu0  ;;  %v787_v54 = vpop.f32.mrb[1].mxu1 }
  0xfe   : > { %v1153_v56 = vadd.f32 %v1152_v53, %v1151_v51  ;;  %v788_v57 = vadd.f32 %v1150_v50, %v787_v54  ;;  %v1231_v58 = vpop.f32.mrb[2].mxu1 }
  0xff   : > { %v790_v59 = vpop.f32.mrb[3].mxu1 }
 0x100   : > { %v908_v60 = vadd.f32 %v1497_v55, %v788_v57  ;;  %v791_v61 = vadd.f32 %v1153_v56, %v790_v59 }
 0x102   : > { %v924_v62 = vmax.f32 %v908_v60, 0.0  ;;  %v909_v63 = vadd.f32 %v1497_v55, %v791_v61  ;;  %v1154_v0 = vpop.f32.mrb[4].mxu0 }
 0x103   : > { %v1155_v1 = vpop.f32.mrb[5].mxu0 }
 0x104   : > { %940 = vst [vmem:[%s1504_s27] sm:$0xff] %v924_v62  ;;  %v925_v2 = vmax.f32 %v909_v63, 0.0  ;;  %v1156_v3 = vadd.f32 %v1155_v1, %v1154_v0  ;;  %v1157_v4 = vpop.f32.mrb[6].mxu0  ;;  %v1234_v5 = vpop.f32.mrb[4].mxu1 }
 0x105   : > { %v1158_v6 = vpop.f32.mrb[7].mxu0  ;;  %v803_v7 = vpop.f32.mrb[5].mxu1 }
 0x106   : > { %941 = vst [vmem:[%s1504_s27 + $0x8] sm:$0xff] %v925_v2  ;;  %v796_v8 = vadd.f32 %v1230_v52, %v1156_v3  ;;  %v1159_v9 = vadd.f32 %v1158_v6, %v1157_v4  ;;  %v1235_v10 = vpop.f32.mrb[6].mxu1 }
 0x107   : > { %v806_v11 = vpop.f32.mrb[7].mxu1 }
 0x108   : > { %v910_v12 = vadd.f32 %v1497_v55, %v796_v8  ;;  %v799_v13 = vadd.f32 %v1231_v58, %v1159_v9 }
 0x10a   : > { %v926_v14 = vmax.f32 %v910_v12, 0.0  ;;  %v911_v15 = vadd.f32 %v1497_v55, %v799_v13  ;;  %v1160_v16 = vpop.f32.mrb[8].mxu0 }
 0x10b   : > { %v1161_v17 = vpop.f32.mrb[9].mxu0 }
 0x10c   : > { %942 = vst [vmem:[%s1504_s27 + $0x10] sm:$0xff] %v926_v14  ;;  %v927_v18 = vmax.f32 %v911_v15, 0.0  ;;  %v1162_v19 = vadd.f32 %v1161_v17, %v1160_v16  ;;  %v1163_v20 = vpop.f32.mrb[10].mxu0  ;;  %v1238_v21 = vpop.f32.mrb[8].mxu1 }
 0x10d   : > { %v1164_v22 = vpop.f32.mrb[11].mxu0  ;;  %v819_v23 = vpop.f32.mrb[9].mxu1 }
 0x10e   : > { %943 = vst [vmem:[%s1504_s27 + $0x18] sm:$0xff] %v927_v18  ;;  %v1165_v24 = vadd.f32 %v1164_v22, %v1163_v20  ;;  %v804_v25 = vadd.f32 %v1162_v19, %v803_v7  ;;  %v1239_v26 = vpop.f32.mrb[10].mxu1 }
 0x10f   : > { %v822_v27 = vpop.f32.mrb[11].mxu1 }
 0x110   : > { %v912_v28 = vadd.f32 %v1497_v55, %v804_v25  ;;  %v807_v29 = vadd.f32 %v1165_v24, %v806_v11 }
 0x112   : > { %v928_v30 = vmax.f32 %v912_v28, 0.0  ;;  %v913_v31 = vadd.f32 %v1497_v55, %v807_v29  ;;  %v1166_v32 = vpop.f32.mrb[12].mxu0 }
 0x113   : > { %v1167_v33 = vpop.f32.mrb[13].mxu0 }
 0x114   : > { %944 = vst [vmem:[%s1504_s27 + $0x20] sm:$0xff] %v928_v30  ;;  %v929_v34 = vmax.f32 %v913_v31, 0.0  ;;  %v1168_v35 = vadd.f32 %v1167_v33, %v1166_v32  ;;  %v1169_v36 = vpop.f32.mrb[14].mxu0  ;;  %v1242_v37 = vpop.f32.mrb[12].mxu1 }
 0x115   : > { %v1170_v38 = vpop.f32.mrb[15].mxu0  ;;  %v835_v39 = vpop.f32.mrb[13].mxu1 }
 0x116   : > { %945 = vst [vmem:[%s1504_s27 + $0x28] sm:$0xff] %v929_v34  ;;  %v812_v40 = vadd.f32 %v1234_v5, %v1168_v35  ;;  %v1171_v41 = vadd.f32 %v1170_v38, %v1169_v36  ;;  %v1243_v42 = vpop.f32.mrb[14].mxu1 }
 0x117   : > { %v838_v43 = vpop.f32.mrb[15].mxu1 }
 0x118   : > { %v914_v44 = vadd.f32 %v1497_v55, %v812_v40  ;;  %v815_v45 = vadd.f32 %v1235_v10, %v1171_v41 }
 0x11a   : > { %v930_v46 = vmax.f32 %v914_v44, 0.0  ;;  %v915_v47 = vadd.f32 %v1497_v55, %v815_v45  ;;  %v1172_v48 = vpop.f32.mrb[16].mxu0 }
 0x11b   : > { %v1173_v49 = vpop.f32.mrb[17].mxu0 }
 0x11c   : > { %946 = vst [vmem:[%s1504_s27 + $0x30] sm:$0xff] %v930_v46  ;;  %v931_v50 = vmax.f32 %v915_v47, 0.0  ;;  %v1174_v51 = vadd.f32 %v1173_v49, %v1172_v48  ;;  %v1175_v52 = vpop.f32.mrb[18].mxu0 }
 0x11d   : > { %v1176_v53 = vpop.f32.mrb[19].mxu0 }
 0x11e   : > { %947 = vst [vmem:[%s1504_s27 + $0x38] sm:$0xff] %v931_v50  ;;  %v1177_v54 = vadd.f32 %v1176_v53, %v1175_v52  ;;  %v820_v56 = vadd.f32 %v1174_v51, %v819_v23 }
 0x120   : > { %v916_v57 = vadd.f32 %v1497_v55, %v820_v56  ;;  %v823_v58 = vadd.f32 %v1177_v54, %v822_v27 }
 0x122   : > { %v932_v59 = vmax.f32 %v916_v57, 0.0  ;;  %v917_v60 = vadd.f32 %v1497_v55, %v823_v58  ;;  %v1178_v61 = vpop.f32.mrb[20].mxu0 }
 0x123   : > { %v1179_v62 = vpop.f32.mrb[21].mxu0 }
 0x124   : > { %948 = vst [vmem:[%s1504_s27 + $0x40] sm:$0xff] %v932_v59  ;;  %v933_v63 = vmax.f32 %v917_v60, 0.0  ;;  %v1180_v0 = vadd.f32 %v1179_v62, %v1178_v61  ;;  %v1181_v1 = vpop.f32.mrb[22].mxu0 }
 0x125   : > { %v1182_v2 = vpop.f32.mrb[23].mxu0 }
 0x126   : > { %949 = vst [vmem:[%s1504_s27 + $0x48] sm:$0xff] %v933_v63  ;;  %v828_v3 = vadd.f32 %v1238_v21, %v1180_v0  ;;  %v1183_v4 = vadd.f32 %v1182_v2, %v1181_v1 }
 0x128   : > { %v918_v5 = vadd.f32 %v1497_v55, %v828_v3  ;;  %v831_v6 = vadd.f32 %v1239_v26, %v1183_v4 }
 0x12a   : > { %v934_v7 = vmax.f32 %v918_v5, 0.0  ;;  %v919_v8 = vadd.f32 %v1497_v55, %v831_v6  ;;  %v1184_v9 = vpop.f32.mrb[24].mxu0 }
 0x12b   : > { %v1185_v10 = vpop.f32.mrb[25].mxu0 }
 0x12c   : > { %950 = vst [vmem:[%s1504_s27 + $0x50] sm:$0xff] %v934_v7  ;;  %v935_v11 = vmax.f32 %v919_v8, 0.0  ;;  %v1186_v12 = vadd.f32 %v1185_v10, %v1184_v9  ;;  %v1187_v13 = vpop.f32.mrb[26].mxu0 }
 0x12d   : > { %v1188_v14 = vpop.f32.mrb[27].mxu0 }
 0x12e   : > { %951 = vst [vmem:[%s1504_s27 + $0x58] sm:$0xff] %v935_v11  ;;  %v1189_v15 = vadd.f32 %v1188_v14, %v1187_v13  ;;  %v836_v16 = vadd.f32 %v1186_v12, %v835_v39 }
 0x130   : > { %v920_v17 = vadd.f32 %v1497_v55, %v836_v16  ;;  %v839_v18 = vadd.f32 %v1189_v15, %v838_v43 }
 0x132   : > { %v936_v19 = vmax.f32 %v920_v17, 0.0  ;;  %v921_v20 = vadd.f32 %v1497_v55, %v839_v18  ;;  %v1190_v21 = vpop.f32.mrb[28].mxu0 }
 0x133   : > { %v1191_v22 = vpop.f32.mrb[29].mxu0 }
 0x134   : > { %952 = vst [vmem:[%s1504_s27 + $0x60] sm:$0xff] %v936_v19  ;;  %v937_v23 = vmax.f32 %v921_v20, 0.0  ;;  %v1192_v24 = vadd.f32 %v1191_v22, %v1190_v21  ;;  %v1193_v25 = vpop.f32.mrb[30].mxu0 }
 0x135   : > { %v1194_v26 = vpop.f32.mrb[31].mxu0 }
 0x136   : > { %953 = vst [vmem:[%s1504_s27 + $0x68] sm:$0xff] %v937_v23  ;;  %v844_v27 = vadd.f32 %v1242_v37, %v1192_v24  ;;  %v1195_v28 = vadd.f32 %v1194_v26, %v1193_v25 }
 0x138   : > { %v922_v29 = vadd.f32 %v1497_v55, %v844_v27  ;;  %v847_v30 = vadd.f32 %v1243_v42, %v1195_v28 }
 0x13a   : > { %v938_v31 = vmax.f32 %v922_v29, 0.0  ;;  %v923_v32 = vadd.f32 %v1497_v55, %v847_v30 }
 0x13c   : > { %954 = vst [vmem:[%s1504_s27 + $0x70] sm:$0xff] %v938_v31  ;;  %v939_v33 = vmax.f32 %v923_v32, 0.0 }
 0x13e   : > { %955 = vst [vmem:[%s1504_s27 + $0x78] sm:$0xff] %v939_v33 }
 0x13f PF: > { %s13_s14 = sadd.s32 1, %s1347_s14   ;;  %s1550_s12 = smov %s1343_s13 }
 0x140   : > { %p10_p5 = scmp.ge.s32.totalorder %s13_s14, 6   ;;  %s1551_s13 = smov %s1553_s15 }
 0x142   :  { %12 = sbr.rel (!%p10_p5) target bundleno = 2 (0x2), region = 76 }

// kernel: classnet_forward.8
= control target key start
LH: loop header
LB: loop body
LE: loop exit
PB: predicated region body
PF: predicated region fallthrough
CT: control target
= control target key end

     0   :  { %s1152_s12 = smov 0   ;;  %s1154_s13 = smov 0   ;;  %s1364_s0 = inlined_call_operand.vmem [shape: bf16[104,1664], index: 0, kind: input, shape index: {}]   ;;  %s1365_s1 = inlined_call_operand.vmem [shape: bf16[1664,256], index: 1, kind: input, shape index: {}]   ;;  %s1366_s2 = inlined_call_operand.vmem [shape: f32[1,256], index: 2, kind: input, shape index: {}]   ;;  %s1367_s3 = inlined_call_operand.vmem [shape: f32[104,256], index: 3, kind: output, shape index: {}]  }
   0x1   :  { %s1156_s14 = smov 0   ;;  %s1158_s15 = smov 0  }
   0x2   :  { %s1160_s16 = smov 0  }
   0x3 LB: > { %s25_s17 = sadd.s32 1, %s1124_s15  ;;  %p48_p1 = scmp.ne.s32.totalorder %s1116_s13, %s1112_s12  ;;  %s1128_s16 = sphi %s1160_s16, %s13_s16   ;;  %s1124_s15 = sphi %s1158_s15, %s1371_s15   ;;  %s1120_s14 = sphi %s1156_s14, %s1370_s14   ;;  %s1116_s13 = sphi %s1154_s13, %s1369_s13   ;;  %s1112_s12 = sphi %s1152_s12, %s1368_s12  }
   0x4   : > { %p26_p0 = scmp.ge.s32.totalorder %s25_s17, 13  ;;  %p49_p2 = scmp.eq.s32.totalorder %s1128_s16, 0 }
   0x5   : > { %s41_s19 = sadd.s32 1, %s1116_s13  ;;  %p963_p5 = scmp.ge.s32.totalorder %s1128_s16, 13 }
   0x6   : > { %s1373_s17 = smov (%p26_p0, %s25_s17), 0  ;;  %p50_p3 = por %p49_p2, %p48_p1 }
   0x7   : > { %s37_s18 = ssub.s32 %s1124_s15, %s1373_s17  ;;  %164 = sbr.rel (%p963_p5) target bundleno = 27 (0x1b), region = 20 }
   0x8   : > { %p39_p4 = scmp.eq.s32.totalorder %s37_s18, 0 }
   0xa   : > { %s1187_s20 = scalar_select %p39_p4, %s1116_s13, %s41_s19  }
   0xe   : > { %167 = sbr.rel (!%p50_p3) target bundleno = 27 (0x1b), region = 24  ;;  %s169_s21 = sand.u32 (%p50_p3), 1, %s1116_s13  }
   0xf   : > { %s964_s22 = sshll.u32 (%p50_p3), %s1124_s15, 2  ;;  %s1015_s23 = smul.u32 (%p50_p3), 52, %s169_s21 }
  0x10   : > { %s176_s26 = scalar_lea.vmem (%p50_p3), %s1364_s0, %s964_s22 }
  0x11   : > { %v192_v0 = vld [vmem:[%s176_s26] sm:$0xf] (%p50_p3)  ;;  %v194_v1 = vld [vmem:[%s176_s26 + $0x34] sm:$0xf] (%p50_p3)  ;;  %v196_v2 = vld [vmem:[%s176_s26 + $0x68] sm:$0xf] (%p50_p3) }
  0x12   : > { %v198_v3 = vld [vmem:[%s176_s26 + $0x9c] sm:$0xf] (%p50_p3)  ;;  %v200_v4 = vld [vmem:[%s176_s26 + $0xd0] sm:$0xf] (%p50_p3)  ;;  %s171_s27 = scalar_lea.vmem (%p50_p3), [#allocation3], %s1015_s23 }
  0x13   : > { %193 = vst [vmem:[%s171_s27] sm:$0xf] (%p50_p3), %v192_v0  ;;  %195 = vst [vmem:[%s171_s27 + $0x4] sm:$0xf] (%p50_p3), %v194_v1  ;;  %v202_v5 = vld [vmem:[%s176_s26 + $0x104] sm:$0xf] (%p50_p3) }
  0x14   : > { %197 = vst [vmem:[%s171_s27 + $0x8] sm:$0xf] (%p50_p3), %v196_v2  ;;  %199 = vst [vmem:[%s171_s27 + $0xc] sm:$0xf] (%p50_p3), %v198_v3  ;;  %v204_v6 = vld [vmem:[%s176_s26 + $0x138] sm:$0xf] (%p50_p3) }
  0x15   : > { %201 = vst [vmem:[%s171_s27 + $0x10] sm:$0xf] %v200_v4  ;;  %v206_v7 = vld [vmem:[%s176_s26 + $0x16c] sm:$0xf]  ;;  %203 = vst [vmem:[%s171_s27 + $0x14] sm:$0xf] %v202_v5 }
  0x16   : > { %205 = vst [vmem:[%s171_s27 + $0x18] sm:$0xf] %v204_v6  ;;  %207 = vst [vmem:[%s171_s27 + $0x1c] sm:$0xf] %v206_v7  ;;  %v208_v8 = vld [vmem:[%s176_s26 + $0x1a0] sm:$0xf] }
  0x17   : > { %v210_v9 = vld [vmem:[%s176_s26 + $0x1d4] sm:$0xf]  ;;  %v212_v10 = vld [vmem:[%s176_s26 + $0x208] sm:$0xf]  ;;  %209 = vst [vmem:[%s171_s27 + $0x20] sm:$0xf] %v208_v8 }
  0x18   : > { %211 = vst [vmem:[%s171_s27 + $0x24] sm:$0xf] %v210_v9  ;;  %213 = vst [vmem:[%s171_s27 + $0x28] sm:$0xf] %v212_v10  ;;  %v214_v11 = vld [vmem:[%s176_s26 + $0x23c] sm:$0xf] }
  0x19   : > { %v216_v12 = vld [vmem:[%s176_s26 + $0x270] sm:$0xf]  ;;  %215 = vst [vmem:[%s171_s27 + $0x2c] sm:$0xf] %v214_v11 }
  0x1a   : > { %217 = vst [vmem:[%s171_s27 + $0x30] sm:$0xf] %v216_v12 }
  0x1b PF: > { %p965_p6 = scmp.ge.s32.totalorder %s1128_s16, 1  ;;  %p280_p7 = scmp.lt.s32.totalorder %s1128_s16, 14 }
  0x1d   : > { %p281_p8 = pnand %p965_p6, %p280_p7 }
  0x1e   : > { %s287_s28 = sand.u32 (!%p281_p8), 1, %s1112_s12   ;;  %s966_s29 = sshll.u32 (!%p281_p8), %s1120_s14, 4 }
  0x1f   : > { %284 = sbr.rel (%p281_p8) target bundleno = 341 (0x155), region = 69  ;;  %p332_p9 = scmp.lt.s32.totalorder (!%p281_p8), %s966_s29, 207 }
  0x20   : > { %s1016_s30 = smul.u32 (!%p281_p8), 52, %s287_s28  ;;  %p969_p10 = scmp.ne.s32.totalorder (!%p281_p8), %s1120_s14, 0 }
  0x22   : > { %s1204_s8 = scalar_lea.vmem (!%p281_p8), [#allocation3], %s1016_s30 }
  0x26   : > { %s1375_s29 = smov (!%p332_p9, %s966_s29), 207  ;;  %363 = sbr.rel (%p969_p10) target bundleno = 53 (0x35), region = 77 }
  0x27   : > { %s998_s4 = sshll.u32 %s1375_s29, 3  ;;  %v1130_v13 = vmov (!%p969_p10), 0.0  }
  0x28   : > { %s1202_s7 = scalar_lea.vmem %s1365_s1, %s998_s4  ;;  %364 = vst [vmem:[#allocation2] sm:$0xff] (!%p969_p10), %v1130_v13  ;;  %365 = vst [vmem:[#allocation2 + $0x8] sm:$0xff] (!%p969_p10), %v1130_v13 }
  0x29   : > { %366 = vst [vmem:[#allocation2 + $0x10] sm:$0xff] (!%p969_p10), %v1130_v13  ;;  %367 = vst [vmem:[#allocation2 + $0x18] sm:$0xff] (!%p969_p10), %v1130_v13 }
  0x2a   : > { %368 = vst [vmem:[#allocation2 + $0x20] sm:$0xff] (!%p969_p10), %v1130_v13  ;;  %369 = vst [vmem:[#allocation2 + $0x28] sm:$0xff] (!%p969_p10), %v1130_v13 }
  0x2b   : > { %370 = vst [vmem:[#allocation2 + $0x30] sm:$0xff] (!%p969_p10), %v1130_v13  ;;  %371 = vst [vmem:[#allocation2 + $0x38] sm:$0xff] (!%p969_p10), %v1130_v13 }
  0x2c   : > { %372 = vst [vmem:[#allocation2 + $0x40] sm:$0xff] (!%p969_p10), %v1130_v13  ;;  %373 = vst [vmem:[#allocation2 + $0x48] sm:$0xff] (!%p969_p10), %v1130_v13 }
  0x2d   : > { %374 = vst [vmem:[#allocation2 + $0x50] sm:$0xff] %v1130_v13  ;;  %375 = vst [vmem:[#allocation2 + $0x58] sm:$0xff] %v1130_v13 }
  0x2e   : > { %376 = vst [vmem:[#allocation2 + $0x60] sm:$0xff] %v1130_v13  ;;  %377 = vst [vmem:[#allocation2 + $0x68] sm:$0xff] %v1130_v13 }
  0x2f   : > { %378 = vst [vmem:[#allocation2 + $0x70] sm:$0xff] %v1130_v13  ;;  %379 = vst [vmem:[#allocation2 + $0x78] sm:$0xff] %v1130_v13 }
  0x30   : > { %380 = vst [vmem:[#allocation2 + $0x80] sm:$0xff] %v1130_v13  ;;  %381 = vst [vmem:[#allocation2 + $0x88] sm:$0xff] %v1130_v13 }
  0x31   : > { %382 = vst [vmem:[#allocation2 + $0x90] sm:$0xff] %v1130_v13  ;;  %383 = vst [vmem:[#allocation2 + $0x98] sm:$0xff] %v1130_v13 }
  0x32   : > { %384 = vst [vmem:[#allocation2 + $0xa0] sm:$0xff] %v1130_v13  ;;  %385 = vst [vmem:[#allocation2 + $0xa8] sm:$0xff] %v1130_v13 }
  0x33   : > { %386 = vst [vmem:[#allocation2 + $0xb0] sm:$0xff] %v1130_v13  ;;  %387 = vst [vmem:[#allocation2 + $0xb8] sm:$0xff] %v1130_v13 }
  0x34   : > { %388 = vst [vmem:[#allocation2 + $0xc0] sm:$0xff] %v1130_v13  ;;  %389 = vst [vmem:[#allocation2 + $0xc8] sm:$0xff] %v1130_v13 }
  0x35 PF: > { %v1059_v14 = vld [vmem:[%s1202_s7 + $0x4] ss:$8 sps:$4 sm:$0xff]   ;;  %v1061_v15 = vld [vmem:[%s1202_s7] ss:$8 sps:$4 sm:$0xff]   ;;  %v1131_v16 = vmov 0   ;;  %p993_p11 = scmp.ne.s32.totalorder %s1120_s14, 12 }
  0x36   : > { %597 = vmatprep.mubr.bf16.mxu0 %v1131_v16  ;;  %637 = vmatprep.mubr.bf16.mxu1 %v1131_v16  ;;  %v1062_v17 = vld [vmem:[%s1202_s7 + $0x14] ss:$8 sps:$4 sm:$0xff]   ;;  %v1064_v18 = vld [vmem:[%s1202_s7 + $0x10] ss:$8 sps:$4 sm:$0xff]   ;;  %v1065_v19 = vld [vmem:[%s1202_s7 + $0x24] ss:$8 sps:$4 sm:$0xff]  }
  0x37   : > { %565 = vmatprep.subr.bf16.mxu0 %v1059_v14  ;;  %999 = vmatprep.subr.bf16.mxu1 %v1059_v14  ;;  %v1067_v20 = vld [vmem:[%s1202_s7 + $0x20] ss:$8 sps:$4 sm:$0xff]   ;;  %v1068_v21 = vld [vmem:[%s1202_s7 + $0x34] ss:$8 sps:$4 sm:$0xff]   ;;  %v1070_v22 = vld [vmem:[%s1202_s7 + $0x30] ss:$8 sps:$4 sm:$0xff]  }
  0x38   : > { %566 = vmatpush1.bf16.msra.mxu0 %v1061_v15  ;;  %1007 = vmatpush1.bf16.msra.mxu1 %v1061_v15  ;;  %v1071_v23 = vld [vmem:[%s1202_s7 + $0x44] ss:$8 sps:$4 sm:$0xff]   ;;  %v1073_v24 = vld [vmem:[%s1202_s7 + $0x40] ss:$8 sps:$4 sm:$0xff]   ;;  %v1074_v25 = vld [vmem:[%s1202_s7 + $0x54] ss:$8 sps:$4 sm:$0xff]  }
  0x39   : > { %567 = vmatprep.subr.bf16.mxu0 %v1062_v17  ;;  %1000 = vmatprep.subr.bf16.mxu1 %v1062_v17  ;;  %v1076_v26 = vld [vmem:[%s1202_s7 + $0x50] ss:$8 sps:$4 sm:$0xff]   ;;  %v1077_v27 = vld [vmem:[%s1202_s7 + $0x64] ss:$8 sps:$4 sm:$0xff]   ;;  %v1079_v28 = vld [vmem:[%s1202_s7 + $0x60] ss:$8 sps:$4 sm:$0xff]  }
  0x3a   : > { %v1080_v29 = vld [vmem:[%s1202_s7 + $0x74] ss:$8 sps:$4 sm:$0xff]   ;;  %v1082_v30 = vld [vmem:[%s1202_s7 + $0x70] ss:$8 sps:$4 sm:$0xff]   ;;  %v390_v38 = vld [vmem:[#allocation2] sm:$0xff] }
  0x3b   : > { %v1083_v31 = vld [vmem:[%s1204_s8] sm:$0xff]   ;;  %v1085_v33 = vld [vmem:[%s1204_s8 + $0x8] sm:$0xff]   ;;  %v1087_v35 = vld [vmem:[%s1204_s8 + $0x10] sm:$0xff]  }
  0x3c   : > { %568 = vmatpush1.bf16.msra.mxu0 %v1064_v18  ;;  %1008 = vmatpush1.bf16.msra.mxu1 %v1064_v18  ;;  %v1084_v32 = vld [vmem:[%s1204_s8 + $0x20] sm:$0xff]   ;;  %v1086_v34 = vld [vmem:[%s1204_s8 + $0x28] sm:$0xff]   ;;  %v1088_v36 = vld [vmem:[%s1204_s8 + $0x30] ss:$0 sps:$4 sm:$0xff]  }
  0x3d   : > { %569 = vmatprep.subr.bf16.mxu0 %v1065_v19  ;;  %1001 = vmatprep.subr.bf16.mxu1 %v1065_v19  ;;  %v1089_v37 = vld [vmem:[%s1204_s8 + $0x18] sm:$0xff]   ;;  %v392_v43 = vld [vmem:[#allocation2 + $0x10] sm:$0xff] }
  0x3e   : > { %v406_v39 = vld [vmem:[#allocation2 + $0x80] sm:$0xff]  ;;  %v391_v40 = vld [vmem:[#allocation2 + $0x8] sm:$0xff]  ;;  %v408_v45 = vld [vmem:[#allocation2 + $0x90] sm:$0xff] }
  0x3f   : > { %v407_v41 = vld [vmem:[#allocation2 + $0x88] sm:$0xff]  ;;  %v393_v48 = vld [vmem:[#allocation2 + $0x18] sm:$0xff]  ;;  %v394_v62 = vld [vmem:[#allocation2 + $0x20] sm:$0xff] }
  0x40   : > { %570 = vmatpush1.bf16.msra.mxu0 %v1067_v20  ;;  %1009 = vmatpush1.bf16.msra.mxu1 %v1067_v20  ;;  %v409_v51 = vld [vmem:[#allocation2 + $0x98] sm:$0xff]  ;;  %v410_v63 = vld [vmem:[#allocation2 + $0xa0] sm:$0xff]  ;;  %v395_v0 = vld [vmem:[#allocation2 + $0x28] sm:$0xff] }
  0x41   : > { %571 = vmatprep.subr.bf16.mxu0 %v1068_v21  ;;  %1002 = vmatprep.subr.bf16.mxu1 %v1068_v21  ;;  %v411_v1 = vld [vmem:[#allocation2 + $0xa8] sm:$0xff]  ;;  %v396_v3 = vld [vmem:[#allocation2 + $0x30] sm:$0xff]  ;;  %v397_v8 = vld [vmem:[#allocation2 + $0x38] sm:$0xff] }
  0x42   : > { %v412_v5 = vld [vmem:[#allocation2 + $0xb0] sm:$0xff]  ;;  %v413_v11 = vld [vmem:[#allocation2 + $0xb8] sm:$0xff] }
  0x44   : > { %572 = vmatpush1.bf16.msra.mxu0 %v1070_v22  ;;  %1010 = vmatpush1.bf16.msra.mxu1 %v1070_v22  ;;  %v398_v22 = vld [vmem:[#allocation2 + $0x40] sm:$0xff] }
  0x45   : > { %573 = vmatprep.subr.bf16.mxu0 %v1071_v23  ;;  %1003 = vmatprep.subr.bf16.mxu1 %v1071_v23  ;;  %v414_v23 = vld [vmem:[#allocation2 + $0xc0] sm:$0xff] }
  0x48   : > { %574 = vmatpush1.bf16.msra.mxu0 %v1073_v24  ;;  %1011 = vmatpush1.bf16.msra.mxu1 %v1073_v24  ;;  %v399_v24 = vld [vmem:[#allocation2 + $0x48] sm:$0xff] }
  0x49   : > { %575 = vmatprep.subr.bf16.mxu0 %v1074_v25  ;;  %1004 = vmatprep.subr.bf16.mxu1 %v1074_v25  ;;  %v415_v25 = vld [vmem:[#allocation2 + $0xc8] sm:$0xff] }
  0x4c   : > { %576 = vmatpush1.bf16.msra.mxu0 %v1076_v26  ;;  %1012 = vmatpush1.bf16.msra.mxu1 %v1076_v26 }
  0x4d   : > { %577 = vmatprep.subr.bf16.mxu0 %v1077_v27  ;;  %1005 = vmatprep.subr.bf16.mxu1 %v1077_v27  ;;  %v400_v27 = vld [vmem:[#allocation2 + $0x50] sm:$0xff] }
  0x50   : > { %578 = vmatpush1.bf16.msra.mxu0 %v1079_v28  ;;  %1013 = vmatpush1.bf16.msra.mxu1 %v1079_v28 }
  0x51   : > { %579 = vmatprep.subr.bf16.mxu0 %v1080_v29  ;;  %1006 = vmatprep.subr.bf16.mxu1 %v1080_v29 }
  0x54   : > { %580 = vmatpush1.bf16.msra.mxu0 %v1082_v30  ;;  %1014 = vmatpush1.bf16.msra.mxu1 %v1082_v30 }
  0x57   : > { %598 = vmatmul.mubr.bf16.vlgmr.msra.gmra.mrb[0].mxu0 %v1083_v31  ;;  %638 = vmatmul.mubr.bf16.vlgmr.msra.gmra.mrb[0].mxu1 %v1084_v32  ;;  %v401_v31 = vld [vmem:[#allocation2 + $0x58] sm:$0xff] }
  0x58   : > { %607 = vmatprep.mubr.bf16.mxu0 %v1131_v16  ;;  %647 = vmatprep.mubr.bf16.mxu1 %v1131_v16 }
  0x5f   : > { %608 = vmatmul.mubr.bf16.gmra.mrb[4].mxu0 %v1085_v33  ;;  %648 = vmatmul.mubr.bf16.gmra.mrb[4].mxu1 %v1086_v34 }
  0x60   : > { %617 = vmatprep.mubr.bf16.mxu0 %v1131_v16  ;;  %657 = vmatprep.mubr.bf16.mxu1 %v1131_v16 }
  0x67   : > { %618 = vmatmul.mubr.bf16.gmra.mrb[8].mxu0 %v1087_v35  ;;  %658 = vmatmul.mubr.bf16.gmra.mrb[8].mxu1 %v1088_v36 }
  0x68   : > { %627 = vmatprep.mubr.bf16.mxu0 %v1131_v16 }
  0x6f   : > { %628 = vmatmul.mubr.bf16.gmra.mrb[12].mxu0 %v1089_v37 }
 0x12a   : > { %v599_v42 = vpop.f32.mrb[0].mxu0  ;;  %v639_v44 = vpop.f32.mrb[0].mxu1 }
 0x12b   : > { %v666_v46 = vadd.f32 %v599_v42, %v390_v38  ;;  %v601_v47 = vpop.f32.mrb[1].mxu0  ;;  %v682_v49 = vadd.f32 %v639_v44, %v406_v39  ;;  %v641_v50 = vpop.f32.mrb[1].mxu1  ;;  %v402_v42 = vld [vmem:[#allocation2 + $0x60] sm:$0xff] }
 0x12c   : > { %v667_v52 = vadd.f32 %v601_v47, %v391_v40  ;;  %v603_v53 = vpop.f32.mrb[2].mxu0  ;;  %v683_v54 = vadd.f32 %v641_v50, %v407_v41  ;;  %v643_v55 = vpop.f32.mrb[2].mxu1 }
 0x12d   : > { %692 = vst [vmem:[#allocation2] sm:$0xff] %v666_v46  ;;  %v668_v56 = vadd.f32 %v603_v53, %v392_v43  ;;  %v605_v57 = vpop.f32.mrb[3].mxu0  ;;  %708 = vst [vmem:[#allocation2 + $0x80] sm:$0xff] %v682_v49  ;;  %v684_v58 = vadd.f32 %v643_v55, %v408_v45  ;;  %v645_v59 = vpop.f32.mrb[3].mxu1  ;;  %v403_v43 = vld [vmem:[#allocation2 + $0x68] sm:$0xff]  ;;  %v404_v45 = vld [vmem:[#allocation2 + $0x70] sm:$0xff] }
 0x12e   : > { %693 = vst [vmem:[#allocation2 + $0x8] sm:$0xff] %v667_v52  ;;  %v669_v60 = vadd.f32 %v605_v57, %v393_v48  ;;  %709 = vst [vmem:[#allocation2 + $0x88] sm:$0xff] %v683_v54  ;;  %v685_v61 = vadd.f32 %v645_v59, %v409_v51  ;;  %v405_v48 = vld [vmem:[#allocation2 + $0x78] sm:$0xff]  ;;  %v750_v54 = vlaneseq (!%p993_p11) }
 0x12f   : > { %694 = vst [vmem:[#allocation2 + $0x10] sm:$0xff] %v668_v56  ;;  %710 = vst [vmem:[#allocation2 + $0x90] sm:$0xff] %v684_v58  ;;  %v748_v56 = vld [vmem:[%s1366_s2] sm:$0x3] (!%p993_p11) }
 0x130   : > { %695 = vst [vmem:[#allocation2 + $0x18] sm:$0xff] %v669_v60  ;;  %711 = vst [vmem:[#allocation2 + $0x98] sm:$0xff] %v685_v61  ;;  %v751_v55 = vshrl.u32 (!%p993_p11), %v750_v54, 7 }
 0x132   : > { %v609_v2 = vpop.f32.mrb[4].mxu0  ;;  %v649_v4 = vpop.f32.mrb[4].mxu1  ;;  %v752_v58 = vsub.s32 (!%p993_p11), 0, %v751_v55  ;;  %v756_v60 = vsub.s32 (!%p993_p11), 1, %v751_v55 }
 0x133   : > { %v670_v6 = vadd.f32 %v609_v2, %v394_v62  ;;  %v611_v7 = vpop.f32.mrb[5].mxu0  ;;  %v686_v9 = vadd.f32 %v649_v4, %v410_v63  ;;  %v651_v10 = vpop.f32.mrb[5].mxu1 }
 0x134   : > { %v671_v12 = vadd.f32 %v611_v7, %v395_v0  ;;  %v613_v13 = vpop.f32.mrb[6].mxu0  ;;  %v687_v14 = vadd.f32 %v651_v10, %v411_v1  ;;  %v653_v15 = vpop.f32.mrb[6].mxu1  ;;  %v722_v57 = vld [vmem:[#allocation2] sm:$0xff] (!%p993_p11)  ;;  %v1241_v0 = vrot.slane (!%p993_p11), %v748_v56, %v752_v58  ;;  %v1243_v1 = vrot.slane (!%p993_p11), %v748_v56, %v756_v60 }
 0x135   : > { %696 = vst [vmem:[#allocation2 + $0x20] sm:$0xff] %v670_v6  ;;  %v672_v16 = vadd.f32 %v613_v13, %v396_v3  ;;  %v615_v17 = vpop.f32.mrb[7].mxu0  ;;  %712 = vst [vmem:[#allocation2 + $0xa0] sm:$0xff] %v686_v9  ;;  %v688_v18 = vadd.f32 %v653_v15, %v412_v5  ;;  %v655_v19 = vpop.f32.mrb[7].mxu1  ;;  %v723_v59 = vld [vmem:[#allocation2 + $0x8] sm:$0xff] (!%p993_p11) }
 0x136   : > { %697 = vst [vmem:[#allocation2 + $0x28] sm:$0xff] %v671_v12  ;;  %v673_v20 = vadd.f32 %v615_v17, %v397_v8  ;;  %713 = vst [vmem:[#allocation2 + $0xa8] sm:$0xff] %v687_v14  ;;  %v689_v21 = vadd.f32 %v655_v19, %v413_v11  ;;  %v724_v61 = vld [vmem:[#allocation2 + $0x10] sm:$0xff] (!%p993_p11)  ;;  %v760_v5 = vadd.f32 (!%p993_p11), %v1241_v0, %v722_v57 }
 0x137   : > { %698 = vst [vmem:[#allocation2 + $0x30] sm:$0xff] %v672_v16  ;;  %714 = vst [vmem:[#allocation2 + $0xb0] sm:$0xff] %v688_v18  ;;  %v725_v62 = vld [vmem:[#allocation2 + $0x18] sm:$0xff] (!%p993_p11)  ;;  %v761_v6 = vadd.f32 (!%p993_p11), %v1243_v1, %v723_v59  ;;  %v762_v7 = vadd.f32 (!%p993_p11), %v1241_v0, %v724_v61 }
 0x138   : > { %699 = vst [vmem:[#allocation2 + $0x38] sm:$0xff] %v673_v20  ;;  %715 = vst [vmem:[#allocation2 + $0xb8] sm:$0xff] %v689_v21  ;;  %v763_v8 = vadd.f32 (!%p993_p11), %v1243_v1, %v725_v62  ;;  %v786_v19 = vmax.f32 (!%p993_p11), %v760_v5, 0.0 }
 0x139   : > { %v787_v20 = vmax.f32 (!%p993_p11), %v761_v6, 0.0  ;;  %v788_v21 = vmax.f32 (!%p993_p11), %v762_v7, 0.0 }
 0x13a   : > { %v619_v26 = vpop.f32.mrb[8].mxu0  ;;  %v659_v28 = vpop.f32.mrb[8].mxu1  ;;  %812 = vst [vmem:[%s1367_s3] sm:$0xff] (!%p993_p11), %v786_v19 }
 0x13b   : > { %v674_v29 = vadd.f32 %v619_v26, %v398_v22  ;;  %v621_v30 = vpop.f32.mrb[9].mxu0  ;;  %v690_v32 = vadd.f32 %v659_v28, %v414_v23  ;;  %v661_v33 = vpop.f32.mrb[9].mxu1  ;;  %v789_v22 = vmax.f32 (!%p993_p11), %v763_v8, 0.0  ;;  %813 = vst [vmem:[%s1367_s3 + $0x8] sm:$0xff] (!%p993_p11), %v787_v20  ;;  %814 = vst [vmem:[%s1367_s3 + $0x10] sm:$0xff] (!%p993_p11), %v788_v21 }
 0x13c   : > { %v675_v34 = vadd.f32 %v621_v30, %v399_v24  ;;  %v623_v35 = vpop.f32.mrb[10].mxu0  ;;  %v691_v36 = vadd.f32 %v661_v33, %v415_v25  ;;  %v663_v37 = vpop.f32.mrb[10].mxu1  ;;  %v726_v63 = vld [vmem:[#allocation2 + $0x20] sm:$0xff] (!%p993_p11) }
 0x13d   : > { %700 = vst [vmem:[#allocation2 + $0x40] sm:$0xff] %v674_v29  ;;  %v676_v38 = vadd.f32 %v623_v35, %v400_v27  ;;  %v625_v39 = vpop.f32.mrb[11].mxu0  ;;  %716 = vst [vmem:[#allocation2 + $0xc0] sm:$0xff] %v690_v32  ;;  %v664_v40 = vpop.f32.mrb[11].mxu1  ;;  %v727_v2 = vld [vmem:[#allocation2 + $0x28] sm:$0xff] (!%p993_p11)  ;;  %v764_v12 = vadd.f32 (!%p993_p11), %v1241_v0, %v726_v63  ;;  %v738_v33 = vld [vmem:[#allocation2 + $0x80] sm:$0xff] (!%p993_p11) }
 0x13e   : > { %701 = vst [vmem:[#allocation2 + $0x48] sm:$0xff] %v675_v34  ;;  %v677_v41 = vadd.f32 %v625_v39, %v401_v31  ;;  %717 = vst [vmem:[#allocation2 + $0xc8] sm:$0xff] %v691_v36  ;;  %v728_v3 = vld [vmem:[#allocation2 + $0x30] sm:$0xff] (!%p993_p11)  ;;  %v765_v13 = vadd.f32 (!%p993_p11), %v1243_v1, %v727_v2  ;;  %v739_v34 = vld [vmem:[#allocation2 + $0x88] sm:$0xff] (!%p993_p11) }
 0x13f   : > { %702 = vst [vmem:[#allocation2 + $0x50] sm:$0xff] %v676_v38  ;;  %v729_v4 = vld [vmem:[#allocation2 + $0x38] sm:$0xff] (!%p993_p11)  ;;  %v766_v14 = vadd.f32 (!%p993_p11), %v1241_v0, %v728_v3  ;;  %v790_v25 = vmax.f32 (!%p993_p11), %v764_v12, 0.0  ;;  %815 = vst [vmem:[%s1367_s3 + $0x18] sm:$0xff] (!%p993_p11), %v789_v22  ;;  %v740_v35 = vld [vmem:[#allocation2 + $0x90] sm:$0xff] (!%p993_p11)  ;;  %v777_v54 = vadd.f32 (!%p993_p11), %v1243_v1, %v739_v34 }
 0x140   : > { %703 = vst [vmem:[#allocation2 + $0x58] sm:$0xff] %v677_v41  ;;  %v767_v15 = vadd.f32 (!%p993_p11), %v1243_v1, %v729_v4  ;;  %v791_v26 = vmax.f32 (!%p993_p11), %v765_v13, 0.0  ;;  %v741_v40 = vld [vmem:[#allocation2 + $0x98] sm:$0xff] (!%p993_p11)  ;;  %v742_v41 = vld [vmem:[#allocation2 + $0xa0] sm:$0xff] (!%p993_p11)  ;;  %v778_v55 = vadd.f32 (!%p993_p11), %v1241_v0, %v740_v35 }
 0x141   : > { %v792_v27 = vmax.f32 (!%p993_p11), %v766_v14, 0.0  ;;  %816 = vst [vmem:[%s1367_s3 + $0x20] sm:$0xff] (!%p993_p11), %v790_v25  ;;  %v779_v56 = vadd.f32 (!%p993_p11), %v1243_v1, %v741_v40  ;;  %v780_v57 = vadd.f32 (!%p993_p11), %v1241_v0, %v742_v41  ;;  %v803_v2 = vmax.f32 (!%p993_p11), %v777_v54, 0.0 }
 0x142   : > { %v629_v44 = vpop.f32.mrb[12].mxu0  ;;  %721 = sbr.rel (%p993_p11) target bundleno = 341 (0x155), region = 81  ;;  %v793_v28 = vmax.f32 (!%p993_p11), %v767_v15, 0.0  ;;  %817 = vst [vmem:[%s1367_s3 + $0x28] sm:$0xff] (!%p993_p11), %v791_v26  ;;  %v804_v3 = vmax.f32 (!%p993_p11), %v778_v55, 0.0 }
 0x143   : > { %v678_v46 = vadd.f32 %v629_v44, %v402_v42  ;;  %v631_v47 = vpop.f32.mrb[13].mxu0  ;;  %818 = vst [vmem:[%s1367_s3 + $0x30] sm:$0xff] (!%p993_p11), %v792_v27  ;;  %v743_v42 = vld [vmem:[#allocation2 + $0xa8] sm:$0xff] (!%p993_p11)  ;;  %v805_v4 = vmax.f32 (!%p993_p11), %v779_v56, 0.0  ;;  %v806_v5 = vmax.f32 (!%p993_p11), %v780_v57, 0.0  ;;  %829 = vst [vmem:[%s1367_s3 + $0x88] sm:$0xff] (!%p993_p11), %v803_v2 }
 0x144   : > { %v679_v49 = vadd.f32 %v631_v47, %v403_v43  ;;  %v633_v50 = vpop.f32.mrb[14].mxu0  ;;  %v730_v9 = vld [vmem:[#allocation2 + $0x40] sm:$0xff] (!%p993_p11)  ;;  %819 = vst [vmem:[%s1367_s3 + $0x38] sm:$0xff] (!%p993_p11), %v793_v28  ;;  %v744_v47 = vld [vmem:[#allocation2 + $0xb0] sm:$0xff] (!%p993_p11)  ;;  %v781_v58 = vadd.f32 (!%p993_p11), %v1243_v1, %v743_v42  ;;  %830 = vst [vmem:[%s1367_s3 + $0x90] sm:$0xff] (!%p993_p11), %v804_v3 }
 0x145   : > { %704 = vst [vmem:[#allocation2 + $0x60] sm:$0xff] %v678_v46  ;;  %v680_v51 = vadd.f32 %v633_v50, %v404_v45  ;;  %v635_v52 = vpop.f32.mrb[15].mxu0  ;;  %v731_v10 = vld [vmem:[#allocation2 + $0x48] sm:$0xff] (!%p993_p11)  ;;  %v768_v29 = vadd.f32 (!%p993_p11), %v1241_v0, %v730_v9  ;;  %v782_v59 = vadd.f32 (!%p993_p11), %v1241_v0, %v744_v47  ;;  %v746_v61 = vld [vmem:[#allocation2 + $0xc0] sm:$0xff] (!%p993_p11)  ;;  %831 = vst [vmem:[%s1367_s3 + $0x98] sm:$0xff] (!%p993_p11), %v805_v4 }
 0x146   : > { %705 = vst [vmem:[#allocation2 + $0x68] sm:$0xff] %v679_v49  ;;  %v681_v53 = vadd.f32 %v635_v52, %v405_v48  ;;  %v732_v11 = vld [vmem:[#allocation2 + $0x50] sm:$0xff] (!%p993_p11)  ;;  %v769_v30 = vadd.f32 (!%p993_p11), %v1243_v1, %v731_v10  ;;  %v745_v48 = vld [vmem:[#allocation2 + $0xb8] sm:$0xff] (!%p993_p11)  ;;  %v747_v62 = vld [vmem:[#allocation2 + $0xc8] sm:$0xff] (!%p993_p11)  ;;  %v807_v6 = vmax.f32 (!%p993_p11), %v781_v58, 0.0  ;;  %v784_v9 = vadd.f32 (!%p993_p11), %v1241_v0, %v746_v61 }
 0x147   : > { %706 = vst [vmem:[#allocation2 + $0x70] sm:$0xff] %v680_v51  ;;  %v733_v16 = vld [vmem:[#allocation2 + $0x58] sm:$0xff] (!%p993_p11)  ;;  %v770_v31 = vadd.f32 (!%p993_p11), %v1241_v0, %v732_v11  ;;  %v794_v43 = vmax.f32 (!%p993_p11), %v768_v29, 0.0  ;;  %v783_v60 = vadd.f32 (!%p993_p11), %v1243_v1, %v745_v48  ;;  %v808_v7 = vmax.f32 (!%p993_p11), %v782_v59, 0.0  ;;  %832 = vst [vmem:[%s1367_s3 + $0xa0] sm:$0xff] (!%p993_p11), %v806_v5 }
 0x148   : > { %707 = vst [vmem:[#allocation2 + $0x78] sm:$0xff] %v681_v53  ;;  %v771_v32 = vadd.f32 (!%p993_p11), %v1243_v1, %v733_v16  ;;  %v795_v44 = vmax.f32 (!%p993_p11), %v769_v30, 0.0  ;;  %v776_v53 = vadd.f32 (!%p993_p11), %v1241_v0, %v738_v33  ;;  %v785_v10 = vadd.f32 (!%p993_p11), %v1243_v1, %v747_v62  ;;  %833 = vst [vmem:[%s1367_s3 + $0xa8] sm:$0xff] (!%p993_p11), %v807_v6 }
 0x149   : > { %v796_v45 = vmax.f32 %v770_v31, 0.0  ;;  %820 = vst [vmem:[%s1367_s3 + $0x40] sm:$0xff] %v794_v43  ;;  %v809_v8 = vmax.f32 %v783_v60, 0.0  ;;  %834 = vst [vmem:[%s1367_s3 + $0xb0] sm:$0xff] %v808_v7  ;;  %v810_v11 = vmax.f32 %v784_v9, 0.0 }
 0x14a   : > { %v797_v46 = vmax.f32 %v771_v32, 0.0  ;;  %821 = vst [vmem:[%s1367_s3 + $0x48] sm:$0xff] %v795_v44  ;;  %v802_v63 = vmax.f32 %v776_v53, 0.0 }
 0x14b   : > { %822 = vst [vmem:[%s1367_s3 + $0x50] sm:$0xff] %v796_v45  ;;  %835 = vst [vmem:[%s1367_s3 + $0xb8] sm:$0xff] %v809_v8 }
 0x14c   : > { %v734_v17 = vld [vmem:[#allocation2 + $0x60] sm:$0xff]  ;;  %823 = vst [vmem:[%s1367_s3 + $0x58] sm:$0xff] %v797_v46  ;;  %828 = vst [vmem:[%s1367_s3 + $0x80] sm:$0xff] %v802_v63 }
 0x14d   : > { %v735_v18 = vld [vmem:[#allocation2 + $0x68] sm:$0xff]  ;;  %v772_v36 = vadd.f32 %v1241_v0, %v734_v17  ;;  %836 = vst [vmem:[%s1367_s3 + $0xc0] sm:$0xff] %v810_v11 }
 0x14e   : > { %v736_v23 = vld [vmem:[#allocation2 + $0x70] sm:$0xff]  ;;  %v773_v37 = vadd.f32 %v1243_v1, %v735_v18 }
 0x14f   : > { %v737_v24 = vld [vmem:[#allocation2 + $0x78] sm:$0xff]  ;;  %v774_v38 = vadd.f32 %v1241_v0, %v736_v23  ;;  %v798_v49 = vmax.f32 %v772_v36, 0.0  ;;  %v811_v0 = vmax.f32 %v785_v10, 0.0 }
 0x150   : > { %v775_v39 = vadd.f32 %v1243_v1, %v737_v24  ;;  %v799_v50 = vmax.f32 %v773_v37, 0.0 }
 0x151   : > { %v800_v51 = vmax.f32 %v774_v38, 0.0  ;;  %824 = vst [vmem:[%s1367_s3 + $0x60] sm:$0xff] %v798_v49  ;;  %837 = vst [vmem:[%s1367_s3 + $0xc8] sm:$0xff] %v811_v0 }
 0x152   : > { %v801_v52 = vmax.f32 %v775_v39, 0.0  ;;  %825 = vst [vmem:[%s1367_s3 + $0x68] sm:$0xff] %v799_v50 }
 0x153   : > { %826 = vst [vmem:[%s1367_s3 + $0x70] sm:$0xff] %v800_v51 }
 0x154   : > { %827 = vst [vmem:[%s1367_s3 + $0x78] sm:$0xff] %v801_v52 }
 0x155 PF: > { %s13_s16 = sadd.s32 1, %s1128_s16   ;;  %s1368_s12 = smov %s1116_s13 }
 0x156   : > { %p10_p12 = scmp.ge.s32.totalorder %s13_s16, 15   ;;  %s1369_s13 = smov %s1187_s20 }
 0x157   : > { %s1370_s14 = smov %s1124_s15  ;;  %s1371_s15 = smov %s1373_s17 }
 0x158   :  { %12 = sbr.rel (!%p10_p12) target bundleno = 3 (0x3), region = 122 }

// kernel: classnet_forward.9
= control target key start
LH: loop header
LB: loop body
LE: loop exit
PB: predicated region body
PF: predicated region fallthrough
CT: control target
= control target key end

     0   :  { %s1413_s0 = inlined_call_operand.vmem [shape: bf16[24,1792], index: 0, kind: input, shape index: {}]   ;;  %s1414_s1 = inlined_call_operand.vmem [shape: bf16[1792,384], index: 1, kind: input, shape index: {}]   ;;  %s1415_s2 = inlined_call_operand.vmem [shape: f32[1,384], index: 2, kind: input, shape index: {}]   ;;  %s1416_s3 = inlined_call_operand.vmem [shape: f32[24,384], index: 3, kind: output, shape index: {}]  }
   0x1   :  { %1418 = sst [smem:[#allocation7_spill]] %s1413_s0 }
   0x2   :  { %1419 = sst [smem:[#allocation8_spill]] %s1414_s1 }
   0x3   :  { %s1141_s12 = smov 0   ;;  %s1143_s13 = smov 0  }
   0x4   :  { %s1145_s14 = smov 0   ;;  %s1147_s15 = smov 0  }
   0x5   :  { %s1149_s16 = smov 0   ;;  %s1151_s17 = smov 0  }
   0x6   :  { %s1153_s18 = smov 0   ;;  %s1155_s19 = smov 0  }
   0x7   :  { %s1157_s20 = smov 0   ;;  %s1159_s21 = smov 0  }
   0x8   :  { %s1161_s22 = smov 0  }
   0x9 LB: > { %s835_s23 = sadd.s32 4294967295, %s1118_s22   ;;  %s25_s24 = sadd.s32 1, %s1110_s20  ;;  %s1118_s22 = sphi %s1161_s22, %s13_s22   ;;  %s1114_s21 = sphi %s1159_s21, %s1436_s21   ;;  %s1110_s20 = sphi %s1157_s20, %s1435_s20   ;;  %s1106_s19 = sphi %s1155_s19, %s1434_s19   ;;  %s1102_s18 = sphi %s1153_s18, %s1433_s18   ;;  %s1098_s17 = sphi %s1151_s17, %s1432_s17   ;;  %s1094_s16 = sphi %s1149_s16, %s1431_s16   ;;  %s1090_s15 = sphi %s1147_s15, %s1430_s15   ;;  %s1086_s14 = sphi %s1145_s14, %s1429_s14   ;;  %s1082_s13 = sphi %s1143_s13, %s1428_s13   ;;  %s1078_s12 = sphi %s1141_s12, %s1427_s12  }
   0xa   : > { %p26_p0 = scmp.ge.s32.totalorder %s25_s24, 7  ;;  %s28_s25 = sadd.s32 1, %s1114_s21 }
   0xb   : > { %s41_s26 = sadd.s32 1, %s1098_s17  ;;  %p48_p1 = scmp.ne.s32.totalorder %s1098_s17, %s1094_s16 }
   0xc   : > { %s1438_s24 = smov (%p26_p0, %s25_s24), 0  ;;  %s1440_s25 = smov (!%p26_p0, %s28_s25), %s1114_s21 }
   0xd   : > { %s37_s27 = ssub.s32 %s1110_s20, %s1438_s24  ;;  %p49_p2 = scmp.eq.s32.totalorder %s1118_s22, 0 }
   0xe   : > { %p30_p3 = scmp.ge.s32.totalorder %s1440_s25, 3  ;;  %p39_p4 = scmp.eq.s32.totalorder %s37_s27, 0 }
   0xf   : > { %p1208_p5 = por %p49_p2, %p48_p1  ;;  %s69_s29 = sadd.s32 1, %s1090_s15 }
  0x10   : > { %s1442_s25 = smov (%p30_p3, %s1440_s25), 0  ;;  %p76_p6 = scmp.ne.s32.totalorder %s1090_s15, %s1086_s14 }
  0x11   : > { %1421 = sst [smem:[#allocation6_spill]] %s1442_s25  ;;  %s65_s4 = ssub.s32 %s1114_s21, %s1442_s25 }
  0x12   : > { %s1216_s30 = scalar_select %p39_p4, %s1098_s17, %s41_s26  }
  0x13   : > { %s66_s5 = sor.u32 %s65_s4, %s37_s27  ;;  %p121_p7 = scmp.eq.s32.totalorder %s65_s4, 0 }
  0x14   : > { %p67_p8 = scmp.eq.s32.totalorder %s66_s5, 0  ;;  %p1222_p9 = por %p76_p6, %p49_p2 }
  0x15   : > { %s123_s7 = sadd.s32 1, %s1082_s13  ;;  %p133_p10 = scmp.ne.s32.totalorder %s1082_s13, %s1078_s12 }
  0x16   : > { %s1230_s8 = scalar_select %p67_p8, %s1090_s15, %s69_s29  }
  0x17   : > { %s1233_s9 = scalar_select %p121_p7, %s1082_s13, %s123_s7  }
  0x18   : > { %p134_p11 = scmp.eq.s32.totalorder %s835_s23, 20  ;;  %p838_p13 = scmp.ge.s32.totalorder %s1118_s22, 21 }
  0x1a   : > { %p1235_p12 = por %p134_p11, %p133_p10  ;;  %156 = sbr.rel (%p838_p13) target bundleno = 76 (0x4c), region = 16 }
  0x21   : > { %159 = sbr.rel (!%p1208_p5) target bundleno = 45 (0x2d), region = 20  ;;  %s161_s11 = sand.u32 (%p1208_p5), 1, %s1098_s17  }
  0x22   : > { %s873_s26 = sshll.u32 (%p1208_p5), %s1110_s20, 3  ;;  %s918_s27 = smul.u32 (%p1208_p5), 24, %s161_s11 }
  0x23   : > { %s1424_s0 = sld [smem:[#allocation7_spill]] (%p1208_p5) }
  0x24   : > { %s163_s23 = scalar_lea.vmem (%p1208_p5), [#allocation3], %s918_s27 }
  0x29   : > { %s169_s5 = scalar_lea.vmem %s1424_s0, %s873_s26 }
  0x2a   : > { %v201_v0 = vld [vmem:[%s169_s5] sm:$0xff]  ;;  %v203_v1 = vld [vmem:[%s169_s5 + $0x38] sm:$0xff]  ;;  %v205_v2 = vld [vmem:[%s169_s5 + $0x70] sm:$0xff] }
  0x2b   : > { %202 = vst [vmem:[%s163_s23] sm:$0xff] %v201_v0  ;;  %204 = vst [vmem:[%s163_s23 + $0x8] sm:$0xff] %v203_v1 }
  0x2c   : > { %206 = vst [vmem:[%s163_s23 + $0x10] sm:$0xff] %v205_v2 }
  0x2d PF: > { %212 = sbr.rel (!%p1222_p9) target bundleno = 76 (0x4c), region = 58  ;;  %s214_s28 = sand.u32 (%p1222_p9), 1, %s1090_s15  }
  0x2e   : > { %s919_s7 = smul.u32 (%p1222_p9), 96, %s1110_s20  ;;  %s841_s11 = sshll.u32 (%p1222_p9), %s214_s28, 7 }
  0x2f   : > { %s1425_s1 = sld [smem:[#allocation8_spill]] (%p1222_p9)  ;;  %s1260_s6 = scalar_lea.vmem (%p1222_p9), [#allocation4], %s841_s11 }
  0x30   : > { %s219_s25 = sadd.s32 (%p1222_p9), %s1114_s21, %s919_s7 }
  0x31   : > { %s844_s29 = sshll.u32 (%p1222_p9), %s219_s25, 2 }
  0x35   : > { %s1255_s5 = scalar_lea.vmem %s1425_s1, %s844_s29 }
  0x36   : > { %v237_v3 = vld [vmem:[%s1255_s5] sm:$0xf]  ;;  %v239_v4 = vld [vmem:[%s1255_s5 + $0xc] sm:$0xf]  ;;  %v241_v5 = vld [vmem:[%s1255_s5 + $0x18] sm:$0xf] }
  0x37   : > { %238 = vst [vmem:[%s1260_s6] sm:$0xf] %v237_v3  ;;  %240 = vst [vmem:[%s1260_s6 + $0x4] sm:$0xf] %v239_v4  ;;  %v243_v6 = vld [vmem:[%s1255_s5 + $0x24] sm:$0xf] }
  0x38   : > { %242 = vst [vmem:[%s1260_s6 + $0x8] sm:$0xf] %v241_v5  ;;  %v245_v7 = vld [vmem:[%s1255_s5 + $0x30] sm:$0xf]  ;;  %v247_v8 = vld [vmem:[%s1255_s5 + $0x3c] sm:$0xf] }
  0x39   : > { %244 = vst [vmem:[%s1260_s6 + $0xc] sm:$0xf] %v243_v6  ;;  %246 = vst [vmem:[%s1260_s6 + $0x10] sm:$0xf] %v245_v7  ;;  %v249_v9 = vld [vmem:[%s1255_s5 + $0x48] sm:$0xf] }
  0x3a   : > { %248 = vst [vmem:[%s1260_s6 + $0x14] sm:$0xf] %v247_v8  ;;  %v251_v10 = vld [vmem:[%s1255_s5 + $0x54] sm:$0xf]  ;;  %v253_v11 = vld [vmem:[%s1255_s5 + $0x60] sm:$0xf] }
  0x3b   : > { %250 = vst [vmem:[%s1260_s6 + $0x18] sm:$0xf] %v249_v9  ;;  %252 = vst [vmem:[%s1260_s6 + $0x1c] sm:$0xf] %v251_v10  ;;  %v255_v12 = vld [vmem:[%s1255_s5 + $0x6c] sm:$0xf] }
  0x3c   : > { %254 = vst [vmem:[%s1260_s6 + $0x20] sm:$0xf] %v253_v11  ;;  %v257_v13 = vld [vmem:[%s1255_s5 + $0x78] sm:$0xf]  ;;  %v259_v14 = vld [vmem:[%s1255_s5 + $0x84] sm:$0xf] }
  0x3d   : > { %256 = vst [vmem:[%s1260_s6 + $0x24] sm:$0xf] %v255_v12  ;;  %258 = vst [vmem:[%s1260_s6 + $0x28] sm:$0xf] %v257_v13  ;;  %v261_v15 = vld [vmem:[%s1255_s5 + $0x90] sm:$0xf] }
  0x3e   : > { %260 = vst [vmem:[%s1260_s6 + $0x2c] sm:$0xf] %v259_v14  ;;  %v263_v16 = vld [vmem:[%s1255_s5 + $0x9c] sm:$0xf]  ;;  %v265_v17 = vld [vmem:[%s1255_s5 + $0xa8] sm:$0xf] }
  0x3f   : > { %262 = vst [vmem:[%s1260_s6 + $0x30] sm:$0xf] %v261_v15  ;;  %264 = vst [vmem:[%s1260_s6 + $0x34] sm:$0xf] %v263_v16  ;;  %v267_v18 = vld [vmem:[%s1255_s5 + $0xb4] sm:$0xf] }
  0x40   : > { %266 = vst [vmem:[%s1260_s6 + $0x38] sm:$0xf] %v265_v17  ;;  %v269_v19 = vld [vmem:[%s1255_s5 + $0xc0] sm:$0xf]  ;;  %v271_v20 = vld [vmem:[%s1255_s5 + $0xcc] sm:$0xf] }
  0x41   : > { %268 = vst [vmem:[%s1260_s6 + $0x3c] sm:$0xf] %v267_v18  ;;  %270 = vst [vmem:[%s1260_s6 + $0x40] sm:$0xf] %v269_v19  ;;  %v273_v21 = vld [vmem:[%s1255_s5 + $0xd8] sm:$0xf] }
  0x42   : > { %272 = vst [vmem:[%s1260_s6 + $0x44] sm:$0xf] %v271_v20  ;;  %v275_v22 = vld [vmem:[%s1255_s5 + $0xe4] sm:$0xf]  ;;  %v277_v23 = vld [vmem:[%s1255_s5 + $0xf0] sm:$0xf] }
  0x43   : > { %274 = vst [vmem:[%s1260_s6 + $0x48] sm:$0xf] %v273_v21  ;;  %276 = vst [vmem:[%s1260_s6 + $0x4c] sm:$0xf] %v275_v22  ;;  %v279_v24 = vld [vmem:[%s1255_s5 + $0xfc] sm:$0xf] }
  0x44   : > { %278 = vst [vmem:[%s1260_s6 + $0x50] sm:$0xf] %v277_v23  ;;  %v281_v25 = vld [vmem:[%s1255_s5 + $0x108] sm:$0xf]  ;;  %v283_v26 = vld [vmem:[%s1255_s5 + $0x114] sm:$0xf] }
  0x45   : > { %280 = vst [vmem:[%s1260_s6 + $0x54] sm:$0xf] %v279_v24  ;;  %282 = vst [vmem:[%s1260_s6 + $0x58] sm:$0xf] %v281_v25  ;;  %v285_v27 = vld [vmem:[%s1255_s5 + $0x120] sm:$0xf] }
  0x46   : > { %284 = vst [vmem:[%s1260_s6 + $0x5c] sm:$0xf] %v283_v26  ;;  %v287_v28 = vld [vmem:[%s1255_s5 + $0x12c] sm:$0xf]  ;;  %v289_v29 = vld [vmem:[%s1255_s5 + $0x138] sm:$0xf] }
  0x47   : > { %286 = vst [vmem:[%s1260_s6 + $0x60] sm:$0xf] %v285_v27  ;;  %288 = vst [vmem:[%s1260_s6 + $0x64] sm:$0xf] %v287_v28  ;;  %v291_v30 = vld [vmem:[%s1255_s5 + $0x144] sm:$0xf] }
  0x48   : > { %290 = vst [vmem:[%s1260_s6 + $0x68] sm:$0xf] %v289_v29  ;;  %v293_v31 = vld [vmem:[%s1255_s5 + $0x150] sm:$0xf]  ;;  %v295_v32 = vld [vmem:[%s1255_s5 + $0x15c] sm:$0xf] }
  0x49   : > { %292 = vst [vmem:[%s1260_s6 + $0x6c] sm:$0xf] %v291_v30  ;;  %294 = vst [vmem:[%s1260_s6 + $0x70] sm:$0xf] %v293_v31  ;;  %v297_v33 = vld [vmem:[%s1255_s5 + $0x168] sm:$0xf] }
  0x4a   : > { %296 = vst [vmem:[%s1260_s6 + $0x74] sm:$0xf] %v295_v32  ;;  %v299_v34 = vld [vmem:[%s1255_s5 + $0x174] sm:$0xf]  ;;  %298 = vst [vmem:[%s1260_s6 + $0x78] sm:$0xf] %v297_v33 }
  0x4b   : > { %300 = vst [vmem:[%s1260_s6 + $0x7c] sm:$0xf] %v299_v34 }
  0x4c PF: > { %p845_p0 = scmp.ge.s32.totalorder %s1118_s22, 1  ;;  %p392_p1 = scmp.lt.s32.totalorder %s1118_s22, 22 }
  0x4e   : > { %p393_p2 = pnand %p845_p0, %p392_p1 }
  0x4f   : > { %s399_s25 = sand.u32 (!%p393_p2), 1, %s1094_s16   ;;  %s406_s27 = sand.u32 (!%p393_p2), 1, %s1086_s14  }
  0x50   : > { %396 = sbr.rel (%p393_p2) target bundleno = 368 (0x170), region = 103  ;;  %s846_s28 = sshll.u32 (!%p393_p2), %s406_s27, 7 }
  0x51   : > { %s920_s23 = smul.u32 (!%p393_p2), 24, %s399_s25  ;;  %s432_s7 = sand.u32 (!%p393_p2), 1, %s1078_s12  }
  0x52   : > { %s921_s11 = smul.u32 (!%p393_p2), 24, %s432_s7  ;;  %p438_p3 = scmp.lt.s32.totalorder (!%p393_p2), %s1106_s19, 2 }
  0x53   : > { %s1336_s6 = scalar_lea.vmem (!%p393_p2), [#allocation3], %s920_s23  ;;  %s1338_s0 = scalar_lea.vmem (!%p393_p2), [#allocation4], %s846_s28 }
  0x54   : > { %s1340_s1 = scalar_lea.vmem (!%p393_p2), [#allocation5], %s921_s11  ;;  %p847_p4 = scmp.ne.s32.totalorder (!%p393_p2), %s1102_s18, 0 }
  0x57   : > { %s1330_s29 = scalar_select %p438_p3, %s1106_s19, 2 }
  0x58   : > { %446 = sbr.rel (%p847_p4) target bundleno = 95 (0x5f), region = 115  ;;  %v1120_v35 = vmov (!%p847_p4), 0.0  }
  0x59   : > { %s440_s5 = scalar_lea.vmem %s1415_s2, %s1330_s29  ;;  %447 = vst [vmem:[#allocation2] sm:$0xff] (!%p847_p4), %v1120_v35  ;;  %448 = vst [vmem:[#allocation2 + $0x8] sm:$0xff] (!%p847_p4), %v1120_v35 }
  0x5a   : > { %449 = vst [vmem:[#allocation2 + $0x10] sm:$0xff] (!%p847_p4), %v1120_v35 }
  0x5f PF: > { %v1011_v36 = vld [vmem:[%s1338_s0 + $0x40] sm:$0xff]   ;;  %v1013_v38 = vld [vmem:[%s1338_s0 + $0x48] sm:$0xff]   ;;  %v1015_v40 = vld [vmem:[%s1338_s0 + $0x50] sm:$0xff]   ;;  %p868_p5 = scmp.ne.s32.totalorder %s1102_s18, 6 }
  0x60   : > { %v1012_v37 = vld [vmem:[%s1338_s0] sm:$0xff]   ;;  %874 = vmatprep.subr.bf16.mxu0 %v1011_v36  ;;  %902 = vmatprep.subr.bf16.mxu1 %v1011_v36  ;;  %v1014_v39 = vld [vmem:[%s1338_s0 + $0x8] sm:$0xff]   ;;  %v1016_v41 = vld [vmem:[%s1338_s0 + $0x10] sm:$0xff]  }
  0x61   : > { %875 = vmatpush3.bf16.msra.mxu0 %v1012_v37  ;;  %910 = vmatpush3.bf16.msra.mxu1 %v1012_v37  ;;  %v1017_v42 = vld [vmem:[%s1338_s0 + $0x58] sm:$0xff]   ;;  %v1019_v44 = vld [vmem:[%s1338_s0 + $0x60] sm:$0xff]   ;;  %v1021_v46 = vld [vmem:[%s1338_s0 + $0x68] sm:$0xff]  }
  0x62   : > { %876 = vmatprep.subr.bf16.mxu0 %v1013_v38  ;;  %903 = vmatprep.subr.bf16.mxu1 %v1013_v38  ;;  %v1018_v43 = vld [vmem:[%s1338_s0 + $0x18] sm:$0xff]   ;;  %v1020_v45 = vld [vmem:[%s1338_s0 + $0x20] sm:$0xff]   ;;  %v1022_v50 = vld [vmem:[%s1338_s0 + $0x28] sm:$0xff]  }
  0x63   : > { %v1029_v47 = vld [vmem:[%s1336_s6 + $0x4] ss:$8 sps:$4 sm:$0xff]   ;;  %v455_v48 = vld [vmem:[%s1336_s6 + $0x10] sm:$0xff]  ;;  %v1027_v55 = vld [vmem:[%s1336_s6] ss:$8 sps:$4 sm:$0xff]  }
  0x64   : > { %v851_v49 = vcombine.high %v455_v48, %v455_v48  ;;  %v1023_v51 = vld [vmem:[%s1338_s0 + $0x70] sm:$0xff]   ;;  %633 = vmatprep.mubr.bf16.mxu0 %v1029_v47  ;;  %v1025_v53 = vld [vmem:[%s1338_s0 + $0x78] sm:$0xff]   ;;  %v850_v56 = vcombine.low %v455_v48, %v455_v48  ;;  %v452_v61 = vld [vmem:[#allocation2 + $0x10] sm:$0xff] }
  0x65   : > { %877 = vmatpush3.bf16.msra.mxu0 %v1014_v39  ;;  %911 = vmatpush3.bf16.msra.mxu1 %v1014_v39  ;;  %v1024_v52 = vld [vmem:[%s1338_s0 + $0x30] sm:$0xff]   ;;  %v1026_v54 = vld [vmem:[%s1338_s0 + $0x38] sm:$0xff]   ;;  %v451_v3 = vld [vmem:[#allocation2 + $0x8] sm:$0xff] }
  0x66   : > { %878 = vmatprep.subr.bf16.mxu0 %v1015_v40  ;;  %904 = vmatprep.subr.bf16.mxu1 %v1015_v40  ;;  %v450_v59 = vld [vmem:[#allocation2] sm:$0xff] }
  0x67   : > { %641 = vmatprep.mubr.bf16.mxu1 %v851_v49  ;;  %v869_v11 = vld [vmem:[%s440_s5] ss:$0 sm:$0xff] (!%p868_p5) }
  0x69   : > { %879 = vmatpush3.bf16.msra.mxu0 %v1016_v41  ;;  %912 = vmatpush3.bf16.msra.mxu1 %v1016_v41 }
  0x6a   : > { %880 = vmatprep.subr.bf16.mxu0 %v1017_v42  ;;  %905 = vmatprep.subr.bf16.mxu1 %v1017_v42 }
  0x6d   : > { %881 = vmatpush3.bf16.msra.mxu0 %v1018_v43  ;;  %913 = vmatpush3.bf16.msra.mxu1 %v1018_v43 }
  0x6e   : > { %882 = vmatprep.subr.bf16.mxu0 %v1019_v44  ;;  %906 = vmatprep.subr.bf16.mxu1 %v1019_v44 }
  0x71   : > { %883 = vmatpush3.bf16.msra.mxu0 %v1020_v45  ;;  %914 = vmatpush3.bf16.msra.mxu1 %v1020_v45 }
  0x72   : > { %884 = vmatprep.subr.bf16.mxu0 %v1021_v46  ;;  %907 = vmatprep.subr.bf16.mxu1 %v1021_v46 }
  0x75   : > { %885 = vmatpush3.bf16.msra.mxu0 %v1022_v50  ;;  %915 = vmatpush3.bf16.msra.mxu1 %v1022_v50 }
  0x76   : > { %886 = vmatprep.subr.bf16.mxu0 %v1023_v51  ;;  %908 = vmatprep.subr.bf16.mxu1 %v1023_v51 }
  0x79   : > { %887 = vmatpush3.bf16.msra.mxu0 %v1024_v52  ;;  %916 = vmatpush3.bf16.msra.mxu1 %v1024_v52 }
  0x7a   : > { %888 = vmatprep.subr.bf16.mxu0 %v1025_v53  ;;  %909 = vmatprep.subr.bf16.mxu1 %v1025_v53 }
  0x7d   : > { %889 = vmatpush3.bf16.msra.mxu0 %v1026_v54  ;;  %917 = vmatpush3.bf16.msra.mxu1 %v1026_v54 }
  0x80   : > { %634 = vmatmul.mubr.bf16.vlgmr.msra.gmra.mrb[0].mxu0 %v1027_v55  ;;  %642 = vmatmul.mubr.bf16.vlgmr.msra.gmra.mrb[0].mxu1 %v850_v56 }
 0x153   : > { %v890_v57 = vpop.f32.mrb[0].mxu0  ;;  %v896_v58 = vpop.f32.mrb[0].mxu1 }
 0x154   : > { %v891_v60 = vpop.f32.mrb[1].mxu0  ;;  %v897_v62 = vpop.f32.mrb[1].mxu1 }
 0x155   : > { %v892_v63 = vadd.f32 %v891_v60, %v890_v57  ;;  %v898_v0 = vadd.f32 %v897_v62, %v896_v58  ;;  %v893_v1 = vpop.f32.mrb[2].mxu0  ;;  %v899_v2 = vpop.f32.mrb[2].mxu1  ;;  %658 = sbr.rel (%p868_p5) target bundleno = 360 (0x168), region = 119 }
 0x156   : > { %v894_v4 = vpop.f32.mrb[3].mxu0  ;;  %v900_v5 = vpop.f32.mrb[3].mxu1 }
 0x157   : > { %v649_v6 = vadd.f32 %v892_v63, %v450_v59  ;;  %v651_v7 = vadd.f32 %v898_v0, %v452_v61  ;;  %v895_v8 = vadd.f32 %v894_v4, %v893_v1 }
 0x159   : > { %652 = vst [vmem:[#allocation2] sm:$0xff] %v649_v6  ;;  %654 = vst [vmem:[#allocation2 + $0x10] sm:$0xff] %v651_v7  ;;  %v650_v9 = vadd.f32 %v895_v8, %v451_v3 }
 0x15b   : > { %653 = vst [vmem:[#allocation2 + $0x8] sm:$0xff] %v650_v9 }
 0x160   : > { %v659_v10 = vld [vmem:[#allocation2] sm:$0xff]  ;;  %v661_v15 = vld [vmem:[#allocation2 + $0x10] sm:$0xff] }
 0x161   : > { %v669_v13 = vadd.f32 %v869_v11, %v659_v10  ;;  %v671_v16 = vadd.f32 %v869_v11, %v661_v15 }
 0x162   : > { %v660_v12 = vld [vmem:[#allocation2 + $0x8] sm:$0xff] }
 0x163   : > { %v670_v14 = vadd.f32 %v869_v11, %v660_v12  ;;  %v672_v17 = vmax.f32 %v669_v13, 0.0  ;;  %v674_v19 = vmax.f32 %v671_v16, 0.0 }
 0x165   : > { %v673_v18 = vmax.f32 %v670_v14, 0.0  ;;  %675 = vst [vmem:[%s1340_s1] sm:$0xff] %v672_v17  ;;  %677 = vst [vmem:[%s1340_s1 + $0x10] sm:$0xff] %v674_v19 }
 0x167   : > { %676 = vst [vmem:[%s1340_s1 + $0x8] sm:$0xff] %v673_v18 }
 0x168 PF: > { %684 = sbr.rel (!%p1235_p12) target bundleno = 368 (0x170), region = 123  ;;  %s870_s14 = sshll.u32 (%p1235_p12), %s1106_s19, 3 }
 0x169   : > { %s689_s25 = scalar_lea.vmem (%p1235_p12), %s1416_s3, %s870_s14 }
 0x16c   : > { %v721_v20 = vld [vmem:[%s1340_s1] sm:$0xff] (%p1235_p12)  ;;  %v725_v22 = vld [vmem:[%s1340_s1 + $0x10] sm:$0xff] (%p1235_p12) }
 0x16d   : > { %722 = vst [vmem:[%s689_s25] sm:$0xff] (%p1235_p12), %v721_v20  ;;  %726 = vst [vmem:[%s689_s25 + $0x30] sm:$0xff] (%p1235_p12), %v725_v22 }
 0x16e   : > { %v723_v21 = vld [vmem:[%s1340_s1 + $0x8] sm:$0xff] (%p1235_p12) }
 0x16f   : > { %724 = vst [vmem:[%s689_s25 + $0x18] sm:$0xff] %v723_v21 }
 0x170 PF: > { %s13_s22 = sadd.s32 1, %s1118_s22   ;;  %s1426_s1 = sld [smem:[#allocation6_spill]] }
 0x171   : > { %p10_p6 = scmp.ge.s32.totalorder %s13_s22, 23   ;;  %s1427_s12 = smov %s1082_s13 }
 0x172   : > { %s1428_s13 = smov %s1233_s9  ;;  %s1429_s14 = smov %s1090_s15 }
 0x173   : > { %s1430_s15 = smov %s1230_s8  ;;  %s1431_s16 = smov %s1098_s17 }
 0x174   : > { %s1432_s17 = smov %s1216_s30  ;;  %s1433_s18 = smov %s1110_s20 }
 0x175   : > { %s1434_s19 = smov %s1114_s21  ;;  %s1435_s20 = smov %s1438_s24 }
 0x176   : > { %s1436_s21 = smov %s1426_s1  ;;  %12 = sbr.rel (!%p10_p6) target bundleno = 9 (0x9), region = 203 }

// kernel: classnet_forward.10
= control target key start
LH: loop header
LB: loop body
LE: loop exit
PB: predicated region body
PF: predicated region fallthrough
CT: control target
= control target key end

     0   :  { %s1194_s12 = smov 0   ;;  %s1196_s13 = smov 0   ;;  %s1341_s0 = inlined_call_operand.vmem [shape: bf16[24,3456], index: 0, kind: input, shape index: {}]   ;;  %s1342_s1 = inlined_call_operand.vmem [shape: bf16[3456,256], index: 1, kind: input, shape index: {}]   ;;  %s1343_s2 = inlined_call_operand.vmem [shape: f32[1,256], index: 2, kind: input, shape index: {}]   ;;  %s1344_s3 = inlined_call_operand.vmem [shape: f32[24,256], index: 3, kind: output, shape index: {}]  }
   0x1   :  { %s1198_s14 = smov 0   ;;  %s1200_s15 = smov 0  }
   0x2   :  { %s1202_s16 = smov 0  }
   0x3 LB: > { %s25_s17 = sadd.s32 1, %s1166_s15  ;;  %p48_p1 = scmp.ne.s32.totalorder %s1158_s13, %s1154_s12  ;;  %s1170_s16 = sphi %s1202_s16, %s13_s16   ;;  %s1166_s15 = sphi %s1200_s15, %s1348_s15   ;;  %s1162_s14 = sphi %s1198_s14, %s1347_s14   ;;  %s1158_s13 = sphi %s1196_s13, %s1346_s13   ;;  %s1154_s12 = sphi %s1194_s12, %s1345_s12  }
   0x4   : > { %p26_p0 = scmp.ge.s32.totalorder %s25_s17, 9  ;;  %p49_p2 = scmp.eq.s32.totalorder %s1170_s16, 0 }
   0x5   : > { %s41_s19 = sadd.s32 1, %s1158_s13  ;;  %p932_p5 = scmp.ge.s32.totalorder %s1170_s16, 9 }
   0x6   : > { %s1350_s17 = smov (%p26_p0, %s25_s17), 0  ;;  %p50_p3 = por %p49_p2, %p48_p1 }
   0x7   : > { %s37_s18 = ssub.s32 %s1166_s15, %s1350_s17  ;;  %164 = sbr.rel (%p932_p5) target bundleno = 22 (0x16), region = 20 }
   0x8   : > { %p39_p4 = scmp.eq.s32.totalorder %s37_s18, 0 }
   0xa   : > { %s1229_s20 = scalar_select %p39_p4, %s1158_s13, %s41_s19  }
   0xe   : > { %167 = sbr.rel (!%p50_p3) target bundleno = 22 (0x16), region = 24  ;;  %s169_s21 = sand.u32 (%p50_p3), 1, %s1158_s13  }
   0xf   : > { %s1003_s22 = smul.u32 (%p50_p3), 12, %s1166_s15 }
  0x10   : > { %s1009_s23 = smul.u32 (%p50_p3), 36, %s169_s21 }
  0x11   : > { %s177_s26 = scalar_lea.vmem (%p50_p3), %s1341_s0, %s1003_s22 }
  0x12   : > { %v192_v0 = vld [vmem:[%s177_s26] sm:$0xff] (%p50_p3)  ;;  %v194_v1 = vld [vmem:[%s177_s26 + $0x6c] sm:$0xff] (%p50_p3)  ;;  %v196_v2 = vld [vmem:[%s177_s26 + $0xd8] sm:$0xff] (%p50_p3)  ;;  %s171_s27 = scalar_lea.vmem (%p50_p3), [#allocation3], %s1009_s23 }
  0x13   : > { %193 = vst [vmem:[%s171_s27] sm:$0xff] (%p50_p3), %v192_v0  ;;  %195 = vst [vmem:[%s171_s27 + $0xc] sm:$0xff] (%p50_p3), %v194_v1  ;;  %v934_v3 = vld [vmem:[%s177_s26 + $0x8] sm:$0xf] (%p50_p3)  ;;  %v936_v4 = vld [vmem:[%s177_s26 + $0x74] sm:$0xf] (%p50_p3) }
  0x14   : > { %197 = vst [vmem:[%s171_s27 + $0x18] sm:$0xff] (%p50_p3), %v196_v2  ;;  %v938_v5 = vld [vmem:[%s177_s26 + $0xe0] sm:$0xf] (%p50_p3)  ;;  %935 = vst [vmem:[%s171_s27 + $0x8] sm:$0xf] (%p50_p3), %v934_v3 }
  0x15   : > { %937 = vst [vmem:[%s171_s27 + $0x14] sm:$0xf] %v936_v4  ;;  %939 = vst [vmem:[%s171_s27 + $0x20] sm:$0xf] %v938_v5 }
  0x16 PF: > { %p940_p6 = scmp.ge.s32.totalorder %s1170_s16, 1  ;;  %p230_p7 = scmp.lt.s32.totalorder %s1170_s16, 10 }
  0x18   : > { %p231_p8 = pnand %p940_p6, %p230_p7 }
  0x19   : > { %s237_s28 = sand.u32 (!%p231_p8), 1, %s1154_s12   ;;  %s281_s29 = smul.u32 (!%p231_p8), 48, %s1162_s14 }
  0x1a   : > { %234 = sbr.rel (%p231_p8) target bundleno = 343 (0x157), region = 54  ;;  %p943_p10 = scmp.ne.s32.totalorder (!%p231_p8), %s1162_s14, 0 }
  0x1b   : > { %s1010_s30 = smul.u32 (!%p231_p8), 36, %s237_s28  ;;  %p283_p9 = scmp.lt.s32.totalorder (!%p231_p8), %s281_s29, 431 }
  0x1d   : > { %s1246_s8 = scalar_lea.vmem (!%p231_p8), [#allocation3], %s1010_s30 }
  0x21   : > { %s1352_s29 = smov (!%p283_p9, %s281_s29), 431  ;;  %314 = sbr.rel (%p943_p10) target bundleno = 40 (0x28), region = 62 }
  0x22   : > { %s1004_s4 = sshll.u32 %s1352_s29, 3  ;;  %v1172_v6 = vmov (!%p943_p10), 0.0  }
  0x23   : > { %s1244_s7 = scalar_lea.vmem %s1342_s1, %s1004_s4  ;;  %315 = vst [vmem:[#allocation2] sm:$0xff] (!%p943_p10), %v1172_v6  ;;  %316 = vst [vmem:[#allocation2 + $0x8] sm:$0xff] (!%p943_p10), %v1172_v6 }
  0x24   : > { %317 = vst [vmem:[#allocation2 + $0x10] sm:$0xff] (!%p943_p10), %v1172_v6  ;;  %318 = vst [vmem:[#allocation2 + $0x18] sm:$0xff] (!%p943_p10), %v1172_v6 }
  0x25   : > { %319 = vst [vmem:[#allocation2 + $0x20] sm:$0xff] (!%p943_p10), %v1172_v6  ;;  %320 = vst [vmem:[#allocation2 + $0x28] sm:$0xff] (!%p943_p10), %v1172_v6 }
  0x28 PF: > { %v1053_v7 = vld [vmem:[%s1244_s7 + $0x4] ss:$8 sps:$4 sm:$0xff]   ;;  %v1055_v8 = vld [vmem:[%s1244_s7] ss:$8 sps:$4 sm:$0xff]   ;;  %v1173_v9 = vmov 0   ;;  %p998_p11 = scmp.ne.s32.totalorder %s1162_s14, 8 }
  0x29   : > { %731 = vmatprep.mubr.bf16.mxu0 %v1173_v9  ;;  %648 = vmatprep.subr.bf16.mxu1 %v1053_v7  ;;  %v1056_v10 = vld [vmem:[%s1244_s7 + $0x14] ss:$8 sps:$4 sm:$0xff]   ;;  %v1058_v11 = vld [vmem:[%s1244_s7 + $0x10] ss:$8 sps:$4 sm:$0xff]   ;;  %v1059_v12 = vld [vmem:[%s1244_s7 + $0x24] ss:$8 sps:$4 sm:$0xff]  }
  0x2a   : > { %649 = vmatpush1.bf16.msra.mxu1 %v1055_v8  ;;  %v1061_v13 = vld [vmem:[%s1244_s7 + $0x20] ss:$8 sps:$4 sm:$0xff]   ;;  %v1062_v14 = vld [vmem:[%s1244_s7 + $0x34] ss:$8 sps:$4 sm:$0xff]   ;;  %v1064_v15 = vld [vmem:[%s1244_s7 + $0x30] ss:$8 sps:$4 sm:$0xff]  }
  0x2b   : > { %650 = vmatprep.subr.bf16.mxu1 %v1056_v10  ;;  %v1077_v16 = vld [vmem:[%s1244_s7 + $0x104] ss:$8 sps:$4 sm:$0xff]   ;;  %v1079_v17 = vld [vmem:[%s1244_s7 + $0x100] ss:$8 sps:$4 sm:$0xff]   ;;  %v1083_v19 = vld [vmem:[%s1244_s7 + $0x114] ss:$8 sps:$4 sm:$0xff]  }
  0x2c   : > { %v1065_v18 = vld [vmem:[%s1244_s7 + $0x44] ss:$8 sps:$4 sm:$0xff]   ;;  %699 = vmatprep.subr.bf16.mxu0 %v1077_v16  ;;  %v1085_v20 = vld [vmem:[%s1244_s7 + $0x110] ss:$8 sps:$4 sm:$0xff]   ;;  %v1067_v21 = vld [vmem:[%s1244_s7 + $0x40] ss:$8 sps:$4 sm:$0xff]  }
  0x2d   : > { %700 = vmatpush1.bf16.msra.mxu0 %v1079_v17  ;;  %v1068_v22 = vld [vmem:[%s1244_s7 + $0x54] ss:$8 sps:$4 sm:$0xff]   ;;  %v1089_v23 = vld [vmem:[%s1244_s7 + $0x124] ss:$8 sps:$4 sm:$0xff]   ;;  %v1091_v24 = vld [vmem:[%s1244_s7 + $0x120] ss:$8 sps:$4 sm:$0xff]  }
  0x2e   : > { %651 = vmatpush1.bf16.msra.mxu1 %v1058_v11  ;;  %701 = vmatprep.subr.bf16.mxu0 %v1083_v19  ;;  %v1070_v25 = vld [vmem:[%s1244_s7 + $0x50] ss:$8 sps:$4 sm:$0xff]   ;;  %v1095_v26 = vld [vmem:[%s1244_s7 + $0x134] ss:$8 sps:$4 sm:$0xff]   ;;  %v1071_v27 = vld [vmem:[%s1244_s7 + $0x64] ss:$8 sps:$4 sm:$0xff]  }
  0x2f   : > { %652 = vmatprep.subr.bf16.mxu1 %v1059_v12  ;;  %v1097_v28 = vld [vmem:[%s1244_s7 + $0x130] ss:$8 sps:$4 sm:$0xff]   ;;  %v1073_v29 = vld [vmem:[%s1244_s7 + $0x60] ss:$8 sps:$4 sm:$0xff]   ;;  %v1101_v30 = vld [vmem:[%s1244_s7 + $0x144] ss:$8 sps:$4 sm:$0xff]  }
  0x30   : > { %v1074_v31 = vld [vmem:[%s1244_s7 + $0x74] ss:$8 sps:$4 sm:$0xff]   ;;  %v1103_v32 = vld [vmem:[%s1244_s7 + $0x140] ss:$8 sps:$4 sm:$0xff]   ;;  %v1076_v33 = vld [vmem:[%s1244_s7 + $0x70] ss:$8 sps:$4 sm:$0xff]  }
  0x31   : > { %702 = vmatpush1.bf16.msra.mxu0 %v1085_v20  ;;  %v1107_v34 = vld [vmem:[%s1244_s7 + $0x154] ss:$8 sps:$4 sm:$0xff]   ;;  %v1080_v35 = vld [vmem:[%s1244_s7 + $0x84] ss:$8 sps:$4 sm:$0xff]   ;;  %v1109_v36 = vld [vmem:[%s1244_s7 + $0x150] ss:$8 sps:$4 sm:$0xff]  }
  0x32   : > { %653 = vmatpush1.bf16.msra.mxu1 %v1061_v13  ;;  %703 = vmatprep.subr.bf16.mxu0 %v1089_v23  ;;  %v1082_v37 = vld [vmem:[%s1244_s7 + $0x80] ss:$8 sps:$4 sm:$0xff]   ;;  %v1113_v38 = vld [vmem:[%s1244_s7 + $0x164] ss:$8 sps:$4 sm:$0xff]   ;;  %v1086_v39 = vld [vmem:[%s1244_s7 + $0x94] ss:$8 sps:$4 sm:$0xff]  }
  0x33   : > { %654 = vmatprep.subr.bf16.mxu1 %v1062_v14  ;;  %v1115_v40 = vld [vmem:[%s1244_s7 + $0x160] ss:$8 sps:$4 sm:$0xff]   ;;  %v1088_v42 = vld [vmem:[%s1244_s7 + $0x90] ss:$8 sps:$4 sm:$0xff]   ;;  %v1119_v43 = vld [vmem:[%s1244_s7 + $0x174] ss:$8 sps:$4 sm:$0xff]  }
  0x34   : > { %v1128_v41 = vld [vmem:[%s1246_s8 + $0x4] ss:$12 sps:$4 sm:$0xff]   ;;  %v1125_v48 = vld [vmem:[%s1246_s8 + $0x8] ss:$12 sps:$4 sm:$0xff]   ;;  %v1129_v53 = vld [vmem:[%s1246_s8 + $0x20] ss:$0 sps:$4 sm:$0xff]  }
  0x35   : > { %704 = vmatpush1.bf16.msra.mxu0 %v1091_v24  ;;  %v1092_v44 = vld [vmem:[%s1244_s7 + $0xa4] ss:$8 sps:$4 sm:$0xff]   ;;  %680 = vmatprep.mubr.bf16.mxu1 %v1128_v41  ;;  %v1121_v45 = vld [vmem:[%s1244_s7 + $0x170] ss:$8 sps:$4 sm:$0xff]   ;;  %v1094_v46 = vld [vmem:[%s1244_s7 + $0xa0] ss:$8 sps:$4 sm:$0xff]  }
  0x36   : > { %655 = vmatpush1.bf16.msra.mxu1 %v1064_v15  ;;  %705 = vmatprep.subr.bf16.mxu0 %v1095_v26  ;;  %v1098_v47 = vld [vmem:[%s1244_s7 + $0xb4] ss:$8 sps:$4 sm:$0xff]   ;;  %v1100_v49 = vld [vmem:[%s1244_s7 + $0xb0] ss:$8 sps:$4 sm:$0xff]   ;;  %v1104_v50 = vld [vmem:[%s1244_s7 + $0xc4] ss:$8 sps:$4 sm:$0xff]  }
  0x37   : > { %656 = vmatprep.subr.bf16.mxu1 %v1065_v18  ;;  %v1106_v51 = vld [vmem:[%s1244_s7 + $0xc0] ss:$8 sps:$4 sm:$0xff]   ;;  %v1110_v52 = vld [vmem:[%s1244_s7 + $0xd4] ss:$8 sps:$4 sm:$0xff]   ;;  %v1112_v54 = vld [vmem:[%s1244_s7 + $0xd0] ss:$8 sps:$4 sm:$0xff]  }
  0x38   : > { %v1116_v55 = vld [vmem:[%s1244_s7 + $0xe4] ss:$8 sps:$4 sm:$0xff]   ;;  %v1118_v56 = vld [vmem:[%s1244_s7 + $0xe0] ss:$8 sps:$4 sm:$0xff]   ;;  %v1122_v57 = vld [vmem:[%s1244_s7 + $0xf4] ss:$8 sps:$4 sm:$0xff]  }
  0x39   : > { %706 = vmatpush1.bf16.msra.mxu0 %v1097_v28  ;;  %v1124_v58 = vld [vmem:[%s1244_s7 + $0xf0] ss:$8 sps:$4 sm:$0xff]   ;;  %v321_v7 = vld [vmem:[#allocation2] sm:$0xff]  ;;  %v322_v10 = vld [vmem:[#allocation2 + $0x8] sm:$0xff] }
  0x3a   : > { %657 = vmatpush1.bf16.msra.mxu1 %v1067_v21  ;;  %707 = vmatprep.subr.bf16.mxu0 %v1101_v30  ;;  %v331_v59 = vld [vmem:[%s1246_s8 + $0x18] sm:$0xff]  ;;  %v1126_v60 = vld [vmem:[%s1246_s8] ss:$12 sps:$4 sm:$0xff]  }
  0x3b   : > { %658 = vmatprep.subr.bf16.mxu1 %v1068_v22  ;;  %v948_v61 = vcombine.high %v331_v59, %v331_v59  ;;  %v947_v62 = vcombine.low %v331_v59, %v331_v59  ;;  %v323_v13 = vld [vmem:[#allocation2 + $0x10] sm:$0xff]  ;;  %v324_v17 = vld [vmem:[#allocation2 + $0x18] sm:$0xff]  ;;  %v325_v23 = vld [vmem:[#allocation2 + $0x20] sm:$0xff] }
  0x3c   : > { %v326_v26 = vld [vmem:[#allocation2 + $0x28] sm:$0xff] }
  0x3d   : > { %708 = vmatpush1.bf16.msra.mxu0 %v1103_v32 }
  0x3e   : > { %659 = vmatpush1.bf16.msra.mxu1 %v1070_v25  ;;  %709 = vmatprep.subr.bf16.mxu0 %v1107_v34 }
  0x3f   : > { %660 = vmatprep.subr.bf16.mxu1 %v1071_v27 }
  0x41   : > { %710 = vmatpush1.bf16.msra.mxu0 %v1109_v36 }
  0x42   : > { %661 = vmatpush1.bf16.msra.mxu1 %v1073_v29  ;;  %711 = vmatprep.subr.bf16.mxu0 %v1113_v38 }
  0x43   : > { %662 = vmatprep.subr.bf16.mxu1 %v1074_v31 }
  0x45   : > { %712 = vmatpush1.bf16.msra.mxu0 %v1115_v40 }
  0x46   : > { %663 = vmatpush1.bf16.msra.mxu1 %v1076_v33  ;;  %713 = vmatprep.subr.bf16.mxu0 %v1119_v43  ;;  %v774_v33 = vlaneseq (!%p998_p11) }
  0x47   : > { %664 = vmatprep.subr.bf16.mxu1 %v1080_v35  ;;  %v772_v35 = vld [vmem:[%s1343_s2] sm:$0x3] (!%p998_p11) }
  0x48   : > { %v775_v34 = vshrl.u32 (!%p998_p11), %v774_v33, 7 }
  0x49   : > { %714 = vmatpush1.bf16.msra.mxu0 %v1121_v45 }
  0x4a   : > { %665 = vmatpush1.bf16.msra.mxu1 %v1082_v37  ;;  %v776_v37 = vsub.s32 (!%p998_p11), 0, %v775_v34  ;;  %v780_v38 = vsub.s32 (!%p998_p11), 1, %v775_v34 }
  0x4b   : > { %666 = vmatprep.subr.bf16.mxu1 %v1086_v39 }
  0x4c   : > { %732 = vmatmul.mubr.bf16.vlgmr.msra.gmra.mrb[0].mxu0 %v1125_v48  ;;  %v781_v43 = vrot.slane (!%p998_p11), %v772_v35, %v780_v38 }
  0x4d   : > { %741 = vmatprep.mubr.bf16.mxu0 %v1173_v9 }
  0x4e   : > { %667 = vmatpush1.bf16.msra.mxu1 %v1088_v42  ;;  %v777_v42 = vrot.slane (!%p998_p11), %v772_v35, %v776_v37 }
  0x4f   : > { %668 = vmatprep.subr.bf16.mxu1 %v1092_v44 }
  0x52   : > { %669 = vmatpush1.bf16.msra.mxu1 %v1094_v46 }
  0x53   : > { %670 = vmatprep.subr.bf16.mxu1 %v1098_v47 }
  0x54   : > { %742 = vmatmul.mubr.bf16.gmra.mrb[4].mxu0 %v1129_v53 }
  0x56   : > { %671 = vmatpush1.bf16.msra.mxu1 %v1100_v49 }
  0x57   : > { %672 = vmatprep.subr.bf16.mxu1 %v1104_v50 }
  0x5a   : > { %673 = vmatpush1.bf16.msra.mxu1 %v1106_v51 }
  0x5b   : > { %674 = vmatprep.subr.bf16.mxu1 %v1110_v52 }
  0x5e   : > { %675 = vmatpush1.bf16.msra.mxu1 %v1112_v54 }
  0x5f   : > { %676 = vmatprep.subr.bf16.mxu1 %v1116_v55 }
  0x62   : > { %677 = vmatpush1.bf16.msra.mxu1 %v1118_v56 }
  0x63   : > { %678 = vmatprep.subr.bf16.mxu1 %v1122_v57 }
  0x66   : > { %679 = vmatpush1.bf16.msra.mxu1 %v1124_v58 }
  0x69   : > { %681 = vmatmul.mubr.bf16.vlgmr.msra.gmra.mrb[0].mxu1 %v1126_v60 }
  0x6a   : > { %690 = vmatprep.mubr.bf16.mxu1 %v948_v61 }
  0x71   : > { %691 = vmatmul.mubr.bf16.gmra.mrb[4].mxu1 %v947_v62 }
 0x11f   : > { %v733_v63 = vpop.f32.mrb[0].mxu0 }
 0x120   : > { %v735_v0 = vpop.f32.mrb[1].mxu0 }
 0x121   : > { %v737_v1 = vpop.f32.mrb[2].mxu0 }
 0x122   : > { %v739_v2 = vpop.f32.mrb[3].mxu0 }
 0x127   : > { %v743_v3 = vpop.f32.mrb[4].mxu0 }
 0x128   : > { %v745_v4 = vpop.f32.mrb[5].mxu0 }
 0x129   : > { %v747_v5 = vpop.f32.mrb[6].mxu0 }
 0x12a   : > { %v748_v6 = vpop.f32.mrb[7].mxu0 }
 0x13c   : > { %v682_v8 = vpop.f32.mrb[0].mxu1 }
 0x13d   : > { %v734_v9 = vadd.f32 %v733_v63, %v682_v8  ;;  %v684_v11 = vpop.f32.mrb[1].mxu1 }
 0x13e   : > { %v736_v12 = vadd.f32 %v735_v0, %v684_v11  ;;  %v686_v14 = vpop.f32.mrb[2].mxu1 }
 0x13f   : > { %v750_v15 = vadd.f32 %v734_v9, %v321_v7  ;;  %v738_v16 = vadd.f32 %v737_v1, %v686_v14  ;;  %v688_v18 = vpop.f32.mrb[3].mxu1 }
 0x140   : > { %v751_v19 = vadd.f32 %v736_v12, %v322_v10  ;;  %v740_v20 = vadd.f32 %v739_v2, %v688_v18 }
 0x141   : > { %756 = vst [vmem:[#allocation2] sm:$0xff] %v750_v15  ;;  %v752_v21 = vadd.f32 %v738_v16, %v323_v13 }
 0x142   : > { %757 = vst [vmem:[#allocation2 + $0x8] sm:$0xff] %v751_v19  ;;  %v753_v22 = vadd.f32 %v740_v20, %v324_v17 }
 0x143   : > { %758 = vst [vmem:[#allocation2 + $0x10] sm:$0xff] %v752_v21 }
 0x144   : > { %759 = vst [vmem:[#allocation2 + $0x18] sm:$0xff] %v753_v22  ;;  %v692_v24 = vpop.f32.mrb[4].mxu1  ;;  %765 = sbr.rel (%p998_p11) target bundleno = 343 (0x157), region = 66 }
 0x145   : > { %v744_v25 = vadd.f32 %v743_v3, %v692_v24  ;;  %v694_v27 = vpop.f32.mrb[5].mxu1 }
 0x146   : > { %v746_v28 = vadd.f32 %v745_v4, %v694_v27  ;;  %v696_v29 = vpop.f32.mrb[6].mxu1 }
 0x147   : > { %v754_v30 = vadd.f32 %v744_v25, %v325_v23  ;;  %v697_v31 = vpop.f32.mrb[7].mxu1 }
 0x148   : > { %v755_v32 = vadd.f32 %v746_v28, %v326_v26  ;;  %v766_v36 = vld [vmem:[#allocation2] sm:$0xff] (!%p998_p11) }
 0x149   : > { %760 = vst [vmem:[#allocation2 + $0x20] sm:$0xff] %v754_v30  ;;  %v767_v39 = vld [vmem:[#allocation2 + $0x8] sm:$0xff] (!%p998_p11)  ;;  %v784_v46 = vadd.f32 (!%p998_p11), %v777_v42, %v766_v36 }
 0x14a   : > { %761 = vst [vmem:[#allocation2 + $0x28] sm:$0xff] %v755_v32  ;;  %v768_v40 = vld [vmem:[#allocation2 + $0x10] sm:$0xff] (!%p998_p11)  ;;  %v785_v47 = vadd.f32 (!%p998_p11), %v781_v43, %v767_v39 }
 0x14b   : > { %v769_v41 = vld [vmem:[#allocation2 + $0x18] sm:$0xff]  ;;  %v786_v48 = vadd.f32 %v777_v42, %v768_v40  ;;  %v790_v52 = vmax.f32 %v784_v46, 0.0 }
 0x14c   : > { %v787_v49 = vadd.f32 %v781_v43, %v769_v41  ;;  %v791_v53 = vmax.f32 %v785_v47, 0.0 }
 0x14d   : > { %v792_v54 = vmax.f32 %v786_v48, 0.0  ;;  %796 = vst [vmem:[%s1344_s3] sm:$0xff] %v790_v52 }
 0x14e   : > { %v793_v55 = vmax.f32 %v787_v49, 0.0  ;;  %797 = vst [vmem:[%s1344_s3 + $0x8] sm:$0xff] %v791_v53 }
 0x14f   : > { %798 = vst [vmem:[%s1344_s3 + $0x10] sm:$0xff] %v792_v54 }
 0x150   : > { %v770_v44 = vld [vmem:[#allocation2 + $0x20] sm:$0xff]  ;;  %799 = vst [vmem:[%s1344_s3 + $0x18] sm:$0xff] %v793_v55 }
 0x151   : > { %v771_v45 = vld [vmem:[#allocation2 + $0x28] sm:$0xff]  ;;  %v788_v50 = vadd.f32 %v777_v42, %v770_v44 }
 0x152   : > { %v789_v51 = vadd.f32 %v781_v43, %v771_v45 }
 0x153   : > { %v794_v56 = vmax.f32 %v788_v50, 0.0 }
 0x154   : > { %v795_v57 = vmax.f32 %v789_v51, 0.0 }
 0x155   : > { %800 = vst [vmem:[%s1344_s3 + $0x20] sm:$0xff] %v794_v56 }
 0x156   : > { %801 = vst [vmem:[%s1344_s3 + $0x28] sm:$0xff] %v795_v57 }
 0x157 PF: > { %s13_s16 = sadd.s32 1, %s1170_s16   ;;  %s1345_s12 = smov %s1158_s13 }
 0x158   : > { %p10_p12 = scmp.ge.s32.totalorder %s13_s16, 11   ;;  %s1346_s13 = smov %s1229_s20 }
 0x159   : > { %s1347_s14 = smov %s1166_s15  ;;  %s1348_s15 = smov %s1350_s17 }
 0x15a   :  { %12 = sbr.rel (!%p10_p12) target bundleno = 3 (0x3), region = 113 }

// kernel: classnet_forward.11
= control target key start
LH: loop header
LB: loop body
LE: loop exit
PB: predicated region body
PF: predicated region fallthrough
CT: control target
= control target key end

     0   :  { %s1194_s12 = smov 0   ;;  %s1196_s13 = smov 0   ;;  %s1341_s0 = inlined_call_operand.vmem [shape: bf16[24,2304], index: 0, kind: input, shape index: {}]   ;;  %s1342_s1 = inlined_call_operand.vmem [shape: bf16[2304,256], index: 1, kind: input, shape index: {}]   ;;  %s1343_s2 = inlined_call_operand.vmem [shape: f32[1,256], index: 2, kind: input, shape index: {}]   ;;  %s1344_s3 = inlined_call_operand.vmem [shape: f32[24,256], index: 3, kind: output, shape index: {}]  }
   0x1   :  { %s1198_s14 = smov 0   ;;  %s1200_s15 = smov 0  }
   0x2   :  { %s1202_s16 = smov 0  }
   0x3 LB: > { %s25_s17 = sadd.s32 1, %s1166_s15  ;;  %p48_p1 = scmp.ne.s32.totalorder %s1158_s13, %s1154_s12  ;;  %s1170_s16 = sphi %s1202_s16, %s13_s16   ;;  %s1166_s15 = sphi %s1200_s15, %s1348_s15   ;;  %s1162_s14 = sphi %s1198_s14, %s1347_s14   ;;  %s1158_s13 = sphi %s1196_s13, %s1346_s13   ;;  %s1154_s12 = sphi %s1194_s12, %s1345_s12  }
   0x4   : > { %p26_p0 = scmp.ge.s32.totalorder %s25_s17, 6  ;;  %p49_p2 = scmp.eq.s32.totalorder %s1170_s16, 0 }
   0x5   : > { %s41_s19 = sadd.s32 1, %s1158_s13  ;;  %p932_p5 = scmp.ge.s32.totalorder %s1170_s16, 6 }
   0x6   : > { %s1350_s17 = smov (%p26_p0, %s25_s17), 0  ;;  %p50_p3 = por %p49_p2, %p48_p1 }
   0x7   : > { %s37_s18 = ssub.s32 %s1166_s15, %s1350_s17  ;;  %164 = sbr.rel (%p932_p5) target bundleno = 22 (0x16), region = 20 }
   0x8   : > { %p39_p4 = scmp.eq.s32.totalorder %s37_s18, 0 }
   0xa   : > { %s1229_s20 = scalar_select %p39_p4, %s1158_s13, %s41_s19  }
   0xe   : > { %167 = sbr.rel (!%p50_p3) target bundleno = 22 (0x16), region = 24  ;;  %s169_s21 = sand.u32 (%p50_p3), 1, %s1158_s13  }
   0xf   : > { %s1003_s22 = smul.u32 (%p50_p3), 12, %s1166_s15 }
  0x10   : > { %s1009_s23 = smul.u32 (%p50_p3), 36, %s169_s21 }
  0x11   : > { %s177_s26 = scalar_lea.vmem (%p50_p3), %s1341_s0, %s1003_s22 }
  0x12   : > { %v192_v0 = vld [vmem:[%s177_s26] sm:$0xff] (%p50_p3)  ;;  %v194_v1 = vld [vmem:[%s177_s26 + $0x48] sm:$0xff] (%p50_p3)  ;;  %v196_v2 = vld [vmem:[%s177_s26 + $0x90] sm:$0xff] (%p50_p3)  ;;  %s171_s27 = scalar_lea.vmem (%p50_p3), [#allocation3], %s1009_s23 }
  0x13   : > { %193 = vst [vmem:[%s171_s27] sm:$0xff] (%p50_p3), %v192_v0  ;;  %195 = vst [vmem:[%s171_s27 + $0xc] sm:$0xff] (%p50_p3), %v194_v1  ;;  %v934_v3 = vld [vmem:[%s177_s26 + $0x8] sm:$0xf] (%p50_p3)  ;;  %v936_v4 = vld [vmem:[%s177_s26 + $0x50] sm:$0xf] (%p50_p3) }
  0x14   : > { %197 = vst [vmem:[%s171_s27 + $0x18] sm:$0xff] (%p50_p3), %v196_v2  ;;  %v938_v5 = vld [vmem:[%s177_s26 + $0x98] sm:$0xf] (%p50_p3)  ;;  %935 = vst [vmem:[%s171_s27 + $0x8] sm:$0xf] (%p50_p3), %v934_v3 }
  0x15   : > { %937 = vst [vmem:[%s171_s27 + $0x14] sm:$0xf] %v936_v4  ;;  %939 = vst [vmem:[%s171_s27 + $0x20] sm:$0xf] %v938_v5 }
  0x16 PF: > { %p940_p6 = scmp.ge.s32.totalorder %s1170_s16, 1  ;;  %p230_p7 = scmp.lt.s32.totalorder %s1170_s16, 7 }
  0x18   : > { %p231_p8 = pnand %p940_p6, %p230_p7 }
  0x19   : > { %s237_s28 = sand.u32 (!%p231_p8), 1, %s1154_s12   ;;  %s281_s29 = smul.u32 (!%p231_p8), 48, %s1162_s14 }
  0x1a   : > { %234 = sbr.rel (%p231_p8) target bundleno = 343 (0x157), region = 54  ;;  %p943_p10 = scmp.ne.s32.totalorder (!%p231_p8), %s1162_s14, 0 }
  0x1b   : > { %s1010_s30 = smul.u32 (!%p231_p8), 36, %s237_s28  ;;  %p283_p9 = scmp.lt.s32.totalorder (!%p231_p8), %s281_s29, 287 }
  0x1d   : > { %s1246_s8 = scalar_lea.vmem (!%p231_p8), [#allocation3], %s1010_s30 }
  0x21   : > { %s1352_s29 = smov (!%p283_p9, %s281_s29), 287  ;;  %314 = sbr.rel (%p943_p10) target bundleno = 40 (0x28), region = 62 }
  0x22   : > { %s1004_s4 = sshll.u32 %s1352_s29, 3  ;;  %v1172_v6 = vmov (!%p943_p10), 0.0  }
  0x23   : > { %s1244_s7 = scalar_lea.vmem %s1342_s1, %s1004_s4  ;;  %315 = vst [vmem:[#allocation2] sm:$0xff] (!%p943_p10), %v1172_v6  ;;  %316 = vst [vmem:[#allocation2 + $0x8] sm:$0xff] (!%p943_p10), %v1172_v6 }
  0x24   : > { %317 = vst [vmem:[#allocation2 + $0x10] sm:$0xff] (!%p943_p10), %v1172_v6  ;;  %318 = vst [vmem:[#allocation2 + $0x18] sm:$0xff] (!%p943_p10), %v1172_v6 }
  0x25   : > { %319 = vst [vmem:[#allocation2 + $0x20] sm:$0xff] (!%p943_p10), %v1172_v6  ;;  %320 = vst [vmem:[#allocation2 + $0x28] sm:$0xff] (!%p943_p10), %v1172_v6 }
  0x28 PF: > { %v1053_v7 = vld [vmem:[%s1244_s7 + $0x4] ss:$8 sps:$4 sm:$0xff]   ;;  %v1055_v8 = vld [vmem:[%s1244_s7] ss:$8 sps:$4 sm:$0xff]   ;;  %v1173_v9 = vmov 0   ;;  %p998_p11 = scmp.ne.s32.totalorder %s1162_s14, 5 }
  0x29   : > { %731 = vmatprep.mubr.bf16.mxu0 %v1173_v9  ;;  %648 = vmatprep.subr.bf16.mxu1 %v1053_v7  ;;  %v1056_v10 = vld [vmem:[%s1244_s7 + $0x14] ss:$8 sps:$4 sm:$0xff]   ;;  %v1058_v11 = vld [vmem:[%s1244_s7 + $0x10] ss:$8 sps:$4 sm:$0xff]   ;;  %v1059_v12 = vld [vmem:[%s1244_s7 + $0x24] ss:$8 sps:$4 sm:$0xff]  }
  0x2a   : > { %649 = vmatpush1.bf16.msra.mxu1 %v1055_v8  ;;  %v1061_v13 = vld [vmem:[%s1244_s7 + $0x20] ss:$8 sps:$4 sm:$0xff]   ;;  %v1062_v14 = vld [vmem:[%s1244_s7 + $0x34] ss:$8 sps:$4 sm:$0xff]   ;;  %v1064_v15 = vld [vmem:[%s1244_s7 + $0x30] ss:$8 sps:$4 sm:$0xff]  }
  0x2b   : > { %650 = vmatprep.subr.bf16.mxu1 %v1056_v10  ;;  %v1077_v16 = vld [vmem:[%s1244_s7 + $0x104] ss:$8 sps:$4 sm:$0xff]   ;;  %v1079_v17 = vld [vmem:[%s1244_s7 + $0x100] ss:$8 sps:$4 sm:$0xff]   ;;  %v1083_v19 = vld [vmem:[%s1244_s7 + $0x114] ss:$8 sps:$4 sm:$0xff]  }
  0x2c   : > { %v1065_v18 = vld [vmem:[%s1244_s7 + $0x44] ss:$8 sps:$4 sm:$0xff]   ;;  %699 = vmatprep.subr.bf16.mxu0 %v1077_v16  ;;  %v1085_v20 = vld [vmem:[%s1244_s7 + $0x110] ss:$8 sps:$4 sm:$0xff]   ;;  %v1067_v21 = vld [vmem:[%s1244_s7 + $0x40] ss:$8 sps:$4 sm:$0xff]  }
  0x2d   : > { %700 = vmatpush1.bf16.msra.mxu0 %v1079_v17  ;;  %v1068_v22 = vld [vmem:[%s1244_s7 + $0x54] ss:$8 sps:$4 sm:$0xff]   ;;  %v1089_v23 = vld [vmem:[%s1244_s7 + $0x124] ss:$8 sps:$4 sm:$0xff]   ;;  %v1091_v24 = vld [vmem:[%s1244_s7 + $0x120] ss:$8 sps:$4 sm:$0xff]  }
  0x2e   : > { %651 = vmatpush1.bf16.msra.mxu1 %v1058_v11  ;;  %701 = vmatprep.subr.bf16.mxu0 %v1083_v19  ;;  %v1070_v25 = vld [vmem:[%s1244_s7 + $0x50] ss:$8 sps:$4 sm:$0xff]   ;;  %v1095_v26 = vld [vmem:[%s1244_s7 + $0x134] ss:$8 sps:$4 sm:$0xff]   ;;  %v1071_v27 = vld [vmem:[%s1244_s7 + $0x64] ss:$8 sps:$4 sm:$0xff]  }
  0x2f   : > { %652 = vmatprep.subr.bf16.mxu1 %v1059_v12  ;;  %v1097_v28 = vld [vmem:[%s1244_s7 + $0x130] ss:$8 sps:$4 sm:$0xff]   ;;  %v1073_v29 = vld [vmem:[%s1244_s7 + $0x60] ss:$8 sps:$4 sm:$0xff]   ;;  %v1101_v30 = vld [vmem:[%s1244_s7 + $0x144] ss:$8 sps:$4 sm:$0xff]  }
  0x30   : > { %v1074_v31 = vld [vmem:[%s1244_s7 + $0x74] ss:$8 sps:$4 sm:$0xff]   ;;  %v1103_v32 = vld [vmem:[%s1244_s7 + $0x140] ss:$8 sps:$4 sm:$0xff]   ;;  %v1076_v33 = vld [vmem:[%s1244_s7 + $0x70] ss:$8 sps:$4 sm:$0xff]  }
  0x31   : > { %702 = vmatpush1.bf16.msra.mxu0 %v1085_v20  ;;  %v1107_v34 = vld [vmem:[%s1244_s7 + $0x154] ss:$8 sps:$4 sm:$0xff]   ;;  %v1080_v35 = vld [vmem:[%s1244_s7 + $0x84] ss:$8 sps:$4 sm:$0xff]   ;;  %v1109_v36 = vld [vmem:[%s1244_s7 + $0x150] ss:$8 sps:$4 sm:$0xff]  }
  0x32   : > { %653 = vmatpush1.bf16.msra.mxu1 %v1061_v13  ;;  %703 = vmatprep.subr.bf16.mxu0 %v1089_v23  ;;  %v1082_v37 = vld [vmem:[%s1244_s7 + $0x80] ss:$8 sps:$4 sm:$0xff]   ;;  %v1113_v38 = vld [vmem:[%s1244_s7 + $0x164] ss:$8 sps:$4 sm:$0xff]   ;;  %v1086_v39 = vld [vmem:[%s1244_s7 + $0x94] ss:$8 sps:$4 sm:$0xff]  }
  0x33   : > { %654 = vmatprep.subr.bf16.mxu1 %v1062_v14  ;;  %v1115_v40 = vld [vmem:[%s1244_s7 + $0x160] ss:$8 sps:$4 sm:$0xff]   ;;  %v1088_v42 = vld [vmem:[%s1244_s7 + $0x90] ss:$8 sps:$4 sm:$0xff]   ;;  %v1119_v43 = vld [vmem:[%s1244_s7 + $0x174] ss:$8 sps:$4 sm:$0xff]  }
  0x34   : > { %v1128_v41 = vld [vmem:[%s1246_s8 + $0x4] ss:$12 sps:$4 sm:$0xff]   ;;  %v1125_v48 = vld [vmem:[%s1246_s8 + $0x8] ss:$12 sps:$4 sm:$0xff]   ;;  %v1129_v53 = vld [vmem:[%s1246_s8 + $0x20] ss:$0 sps:$4 sm:$0xff]  }
  0x35   : > { %704 = vmatpush1.bf16.msra.mxu0 %v1091_v24  ;;  %v1092_v44 = vld [vmem:[%s1244_s7 + $0xa4] ss:$8 sps:$4 sm:$0xff]   ;;  %680 = vmatprep.mubr.bf16.mxu1 %v1128_v41  ;;  %v1121_v45 = vld [vmem:[%s1244_s7 + $0x170] ss:$8 sps:$4 sm:$0xff]   ;;  %v1094_v46 = vld [vmem:[%s1244_s7 + $0xa0] ss:$8 sps:$4 sm:$0xff]  }
  0x36   : > { %655 = vmatpush1.bf16.msra.mxu1 %v1064_v15  ;;  %705 = vmatprep.subr.bf16.mxu0 %v1095_v26  ;;  %v1098_v47 = vld [vmem:[%s1244_s7 + $0xb4] ss:$8 sps:$4 sm:$0xff]   ;;  %v1100_v49 = vld [vmem:[%s1244_s7 + $0xb0] ss:$8 sps:$4 sm:$0xff]   ;;  %v1104_v50 = vld [vmem:[%s1244_s7 + $0xc4] ss:$8 sps:$4 sm:$0xff]  }
  0x37   : > { %656 = vmatprep.subr.bf16.mxu1 %v1065_v18  ;;  %v1106_v51 = vld [vmem:[%s1244_s7 + $0xc0] ss:$8 sps:$4 sm:$0xff]   ;;  %v1110_v52 = vld [vmem:[%s1244_s7 + $0xd4] ss:$8 sps:$4 sm:$0xff]   ;;  %v1112_v54 = vld [vmem:[%s1244_s7 + $0xd0] ss:$8 sps:$4 sm:$0xff]  }
  0x38   : > { %v1116_v55 = vld [vmem:[%s1244_s7 + $0xe4] ss:$8 sps:$4 sm:$0xff]   ;;  %v1118_v56 = vld [vmem:[%s1244_s7 + $0xe0] ss:$8 sps:$4 sm:$0xff]   ;;  %v1122_v57 = vld [vmem:[%s1244_s7 + $0xf4] ss:$8 sps:$4 sm:$0xff]  }
  0x39   : > { %706 = vmatpush1.bf16.msra.mxu0 %v1097_v28  ;;  %v1124_v58 = vld [vmem:[%s1244_s7 + $0xf0] ss:$8 sps:$4 sm:$0xff]   ;;  %v321_v7 = vld [vmem:[#allocation2] sm:$0xff]  ;;  %v322_v10 = vld [vmem:[#allocation2 + $0x8] sm:$0xff] }
  0x3a   : > { %657 = vmatpush1.bf16.msra.mxu1 %v1067_v21  ;;  %707 = vmatprep.subr.bf16.mxu0 %v1101_v30  ;;  %v331_v59 = vld [vmem:[%s1246_s8 + $0x18] sm:$0xff]  ;;  %v1126_v60 = vld [vmem:[%s1246_s8] ss:$12 sps:$4 sm:$0xff]  }
  0x3b   : > { %658 = vmatprep.subr.bf16.mxu1 %v1068_v22  ;;  %v948_v61 = vcombine.high %v331_v59, %v331_v59  ;;  %v947_v62 = vcombine.low %v331_v59, %v331_v59  ;;  %v323_v13 = vld [vmem:[#allocation2 + $0x10] sm:$0xff]  ;;  %v324_v17 = vld [vmem:[#allocation2 + $0x18] sm:$0xff]  ;;  %v325_v23 = vld [vmem:[#allocation2 + $0x20] sm:$0xff] }
  0x3c   : > { %v326_v26 = vld [vmem:[#allocation2 + $0x28] sm:$0xff] }
  0x3d   : > { %708 = vmatpush1.bf16.msra.mxu0 %v1103_v32 }
  0x3e   : > { %659 = vmatpush1.bf16.msra.mxu1 %v1070_v25  ;;  %709 = vmatprep.subr.bf16.mxu0 %v1107_v34 }
  0x3f   : > { %660 = vmatprep.subr.bf16.mxu1 %v1071_v27 }
  0x41   : > { %710 = vmatpush1.bf16.msra.mxu0 %v1109_v36 }
  0x42   : > { %661 = vmatpush1.bf16.msra.mxu1 %v1073_v29  ;;  %711 = vmatprep.subr.bf16.mxu0 %v1113_v38 }
  0x43   : > { %662 = vmatprep.subr.bf16.mxu1 %v1074_v31 }
  0x45   : > { %712 = vmatpush1.bf16.msra.mxu0 %v1115_v40 }
  0x46   : > { %663 = vmatpush1.bf16.msra.mxu1 %v1076_v33  ;;  %713 = vmatprep.subr.bf16.mxu0 %v1119_v43  ;;  %v774_v33 = vlaneseq (!%p998_p11) }
  0x47   : > { %664 = vmatprep.subr.bf16.mxu1 %v1080_v35  ;;  %v772_v35 = vld [vmem:[%s1343_s2] sm:$0x3] (!%p998_p11) }
  0x48   : > { %v775_v34 = vshrl.u32 (!%p998_p11), %v774_v33, 7 }
  0x49   : > { %714 = vmatpush1.bf16.msra.mxu0 %v1121_v45 }
  0x4a   : > { %665 = vmatpush1.bf16.msra.mxu1 %v1082_v37  ;;  %v776_v37 = vsub.s32 (!%p998_p11), 0, %v775_v34  ;;  %v780_v38 = vsub.s32 (!%p998_p11), 1, %v775_v34 }
  0x4b   : > { %666 = vmatprep.subr.bf16.mxu1 %v1086_v39 }
  0x4c   : > { %732 = vmatmul.mubr.bf16.vlgmr.msra.gmra.mrb[0].mxu0 %v1125_v48  ;;  %v781_v43 = vrot.slane (!%p998_p11), %v772_v35, %v780_v38 }
  0x4d   : > { %741 = vmatprep.mubr.bf16.mxu0 %v1173_v9 }
  0x4e   : > { %667 = vmatpush1.bf16.msra.mxu1 %v1088_v42  ;;  %v777_v42 = vrot.slane (!%p998_p11), %v772_v35, %v776_v37 }
  0x4f   : > { %668 = vmatprep.subr.bf16.mxu1 %v1092_v44 }
  0x52   : > { %669 = vmatpush1.bf16.msra.mxu1 %v1094_v46 }
  0x53   : > { %670 = vmatprep.subr.bf16.mxu1 %v1098_v47 }
  0x54   : > { %742 = vmatmul.mubr.bf16.gmra.mrb[4].mxu0 %v1129_v53 }
  0x56   : > { %671 = vmatpush1.bf16.msra.mxu1 %v1100_v49 }
  0x57   : > { %672 = vmatprep.subr.bf16.mxu1 %v1104_v50 }
  0x5a   : > { %673 = vmatpush1.bf16.msra.mxu1 %v1106_v51 }
  0x5b   : > { %674 = vmatprep.subr.bf16.mxu1 %v1110_v52 }
  0x5e   : > { %675 = vmatpush1.bf16.msra.mxu1 %v1112_v54 }
  0x5f   : > { %676 = vmatprep.subr.bf16.mxu1 %v1116_v55 }
  0x62   : > { %677 = vmatpush1.bf16.msra.mxu1 %v1118_v56 }
  0x63   : > { %678 = vmatprep.subr.bf16.mxu1 %v1122_v57 }
  0x66   : > { %679 = vmatpush1.bf16.msra.mxu1 %v1124_v58 }
  0x69   : > { %681 = vmatmul.mubr.bf16.vlgmr.msra.gmra.mrb[0].mxu1 %v1126_v60 }
  0x6a   : > { %690 = vmatprep.mubr.bf16.mxu1 %v948_v61 }
  0x71   : > { %691 = vmatmul.mubr.bf16.gmra.mrb[4].mxu1 %v947_v62 }
 0x11f   : > { %v733_v63 = vpop.f32.mrb[0].mxu0 }
 0x120   : > { %v735_v0 = vpop.f32.mrb[1].mxu0 }
 0x121   : > { %v737_v1 = vpop.f32.mrb[2].mxu0 }
 0x122   : > { %v739_v2 = vpop.f32.mrb[3].mxu0 }
 0x127   : > { %v743_v3 = vpop.f32.mrb[4].mxu0 }
 0x128   : > { %v745_v4 = vpop.f32.mrb[5].mxu0 }
 0x129   : > { %v747_v5 = vpop.f32.mrb[6].mxu0 }
 0x12a   : > { %v748_v6 = vpop.f32.mrb[7].mxu0 }
 0x13c   : > { %v682_v8 = vpop.f32.mrb[0].mxu1 }
 0x13d   : > { %v734_v9 = vadd.f32 %v733_v63, %v682_v8  ;;  %v684_v11 = vpop.f32.mrb[1].mxu1 }
 0x13e   : > { %v736_v12 = vadd.f32 %v735_v0, %v684_v11  ;;  %v686_v14 = vpop.f32.mrb[2].mxu1 }
 0x13f   : > { %v750_v15 = vadd.f32 %v734_v9, %v321_v7  ;;  %v738_v16 = vadd.f32 %v737_v1, %v686_v14  ;;  %v688_v18 = vpop.f32.mrb[3].mxu1 }
 0x140   : > { %v751_v19 = vadd.f32 %v736_v12, %v322_v10  ;;  %v740_v20 = vadd.f32 %v739_v2, %v688_v18 }
 0x141   : > { %756 = vst [vmem:[#allocation2] sm:$0xff] %v750_v15  ;;  %v752_v21 = vadd.f32 %v738_v16, %v323_v13 }
 0x142   : > { %757 = vst [vmem:[#allocation2 + $0x8] sm:$0xff] %v751_v19  ;;  %v753_v22 = vadd.f32 %v740_v20, %v324_v17 }
 0x143   : > { %758 = vst [vmem:[#allocation2 + $0x10] sm:$0xff] %v752_v21 }
 0x144   : > { %759 = vst [vmem:[#allocation2 + $0x18] sm:$0xff] %v753_v22  ;;  %v692_v24 = vpop.f32.mrb[4].mxu1  ;;  %765 = sbr.rel (%p998_p11) target bundleno = 343 (0x157), region = 66 }
 0x145   : > { %v744_v25 = vadd.f32 %v743_v3, %v692_v24  ;;  %v694_v27 = vpop.f32.mrb[5].mxu1 }
 0x146   : > { %v746_v28 = vadd.f32 %v745_v4, %v694_v27  ;;  %v696_v29 = vpop.f32.mrb[6].mxu1 }
 0x147   : > { %v754_v30 = vadd.f32 %v744_v25, %v325_v23  ;;  %v697_v31 = vpop.f32.mrb[7].mxu1 }
 0x148   : > { %v755_v32 = vadd.f32 %v746_v28, %v326_v26  ;;  %v766_v36 = vld [vmem:[#allocation2] sm:$0xff] (!%p998_p11) }
 0x149   : > { %760 = vst [vmem:[#allocation2 + $0x20] sm:$0xff] %v754_v30  ;;  %v767_v39 = vld [vmem:[#allocation2 + $0x8] sm:$0xff] (!%p998_p11)  ;;  %v784_v46 = vadd.f32 (!%p998_p11), %v777_v42, %v766_v36 }
 0x14a   : > { %761 = vst [vmem:[#allocation2 + $0x28] sm:$0xff] %v755_v32  ;;  %v768_v40 = vld [vmem:[#allocation2 + $0x10] sm:$0xff] (!%p998_p11)  ;;  %v785_v47 = vadd.f32 (!%p998_p11), %v781_v43, %v767_v39 }
 0x14b   : > { %v769_v41 = vld [vmem:[#allocation2 + $0x18] sm:$0xff]  ;;  %v786_v48 = vadd.f32 %v777_v42, %v768_v40  ;;  %v790_v52 = vmax.f32 %v784_v46, 0.0 }
 0x14c   : > { %v787_v49 = vadd.f32 %v781_v43, %v769_v41  ;;  %v791_v53 = vmax.f32 %v785_v47, 0.0 }
 0x14d   : > { %v792_v54 = vmax.f32 %v786_v48, 0.0  ;;  %796 = vst [vmem:[%s1344_s3] sm:$0xff] %v790_v52 }
 0x14e   : > { %v793_v55 = vmax.f32 %v787_v49, 0.0  ;;  %797 = vst [vmem:[%s1344_s3 + $0x8] sm:$0xff] %v791_v53 }
 0x14f   : > { %798 = vst [vmem:[%s1344_s3 + $0x10] sm:$0xff] %v792_v54 }
 0x150   : > { %v770_v44 = vld [vmem:[#allocation2 + $0x20] sm:$0xff]  ;;  %799 = vst [vmem:[%s1344_s3 + $0x18] sm:$0xff] %v793_v55 }
 0x151   : > { %v771_v45 = vld [vmem:[#allocation2 + $0x28] sm:$0xff]  ;;  %v788_v50 = vadd.f32 %v777_v42, %v770_v44 }
 0x152   : > { %v789_v51 = vadd.f32 %v781_v43, %v771_v45 }
 0x153   : > { %v794_v56 = vmax.f32 %v788_v50, 0.0 }
 0x154   : > { %v795_v57 = vmax.f32 %v789_v51, 0.0 }
 0x155   : > { %800 = vst [vmem:[%s1344_s3 + $0x20] sm:$0xff] %v794_v56 }
 0x156   : > { %801 = vst [vmem:[%s1344_s3 + $0x28] sm:$0xff] %v795_v57 }
 0x157 PF: > { %s13_s16 = sadd.s32 1, %s1170_s16   ;;  %s1345_s12 = smov %s1158_s13 }
 0x158   : > { %p10_p12 = scmp.ge.s32.totalorder %s13_s16, 8   ;;  %s1346_s13 = smov %s1229_s20 }
 0x159   : > { %s1347_s14 = smov %s1166_s15  ;;  %s1348_s15 = smov %s1350_s17 }
 0x15a   :  { %12 = sbr.rel (!%p10_p12) target bundleno = 3 (0x3), region = 113 }

// kernel: classnet_forward.12
= control target key start
LH: loop header
LB: loop body
LE: loop exit
PB: predicated region body
PF: predicated region fallthrough
CT: control target
= control target key end

     0   :  { %s907_s12 = smov 0   ;;  %s909_s13 = smov 0   ;;  %s1065_s0 = inlined_call_operand.vmem [shape: bf16[8,256], index: 0, kind: input, shape index: {}]   ;;  %s1066_s1 = inlined_call_operand.vmem [shape: bf16[256,1152], index: 1, kind: input, shape index: {}]   ;;  %s1067_s2 = inlined_call_operand.vmem [shape: f32[1,1152], index: 2, kind: input, shape index: {}]   ;;  %s1068_s3 = inlined_call_operand.vmem [shape: f32[8,1152], index: 3, kind: output, shape index: {}]  }
   0x1   :  { %s911_s14 = smov 0   ;;  %s913_s15 = smov 0  }
   0x2   :  { %s915_s16 = smov 0  }
   0x3 LB: > { %s28_s17 = sadd.s32 1, %s881_s15  ;;  %p76_p1 = scmp.ne.s32.totalorder %s873_s13, %s869_s12  ;;  %s885_s16 = sphi %s915_s16, %s13_s16   ;;  %s881_s15 = sphi %s913_s15, %s1072_s15   ;;  %s877_s14 = sphi %s911_s14, %s1071_s14   ;;  %s873_s13 = sphi %s909_s13, %s1070_s13   ;;  %s869_s12 = sphi %s907_s12, %s1069_s12  }
   0x4   : > { %p30_p0 = scmp.ge.s32.totalorder %s28_s17, 9  ;;  %p77_p2 = scmp.eq.s32.totalorder %s885_s16, 0 }
   0x5   : > { %s69_s19 = sadd.s32 1, %s873_s13  ;;  %p740_p5 = scmp.ge.s32.totalorder %s885_s16, 9 }
   0x6   : > { %s1074_s17 = smov (%p30_p0, %s28_s17), 0  ;;  %p78_p3 = por %p77_p2, %p76_p1 }
   0x7   : > { %s65_s18 = ssub.s32 %s881_s15, %s1074_s17  ;;  %169 = sbr.rel (%p740_p5) target bundleno = 39 (0x27), region = 20 }
   0x8   : > { %p67_p4 = scmp.eq.s32.totalorder %s65_s18, 0 }
   0xa   : > { %s942_s20 = scalar_select %p67_p4, %s873_s13, %s69_s19  }
   0xe   : > { %172 = sbr.rel (!%p78_p3) target bundleno = 39 (0x27), region = 24  ;;  %s174_s21 = sand.u32 (%p78_p3), 1, %s873_s13  }
   0xf   : > { %s742_s22 = sshll.u32 (%p78_p3), %s881_s15, 2  ;;  %s741_s23 = sshll.u32 (%p78_p3), %s174_s21, 7 }
  0x10   : > { %s950_s26 = scalar_lea.vmem (%p78_p3), %s1066_s1, %s742_s22  ;;  %s954_s27 = scalar_lea.vmem (%p78_p3), [#allocation3], %s741_s23 }
  0x11   : > { %v197_v0 = vld [vmem:[%s950_s26] sm:$0xf] (%p78_p3)  ;;  %v199_v1 = vld [vmem:[%s950_s26 + $0x24] sm:$0xf] (%p78_p3)  ;;  %v201_v2 = vld [vmem:[%s950_s26 + $0x48] sm:$0xf] (%p78_p3) }
  0x12   : > { %198 = vst [vmem:[%s954_s27] sm:$0xf] (%p78_p3), %v197_v0  ;;  %200 = vst [vmem:[%s954_s27 + $0x4] sm:$0xf] (%p78_p3), %v199_v1  ;;  %v203_v3 = vld [vmem:[%s950_s26 + $0x6c] sm:$0xf] (%p78_p3) }
  0x13   : > { %v205_v4 = vld [vmem:[%s950_s26 + $0x90] sm:$0xf] (%p78_p3)  ;;  %202 = vst [vmem:[%s954_s27 + $0x8] sm:$0xf] (%p78_p3), %v201_v2  ;;  %204 = vst [vmem:[%s954_s27 + $0xc] sm:$0xf] (%p78_p3), %v203_v3 }
  0x14   : > { %206 = vst [vmem:[%s954_s27 + $0x10] sm:$0xf] (%p78_p3), %v205_v4  ;;  %v207_v5 = vld [vmem:[%s950_s26 + $0xb4] sm:$0xf] (%p78_p3)  ;;  %v209_v6 = vld [vmem:[%s950_s26 + $0xd8] sm:$0xf] (%p78_p3) }
  0x15   : > { %v211_v7 = vld [vmem:[%s950_s26 + $0xfc] sm:$0xf]  ;;  %208 = vst [vmem:[%s954_s27 + $0x14] sm:$0xf] %v207_v5  ;;  %210 = vst [vmem:[%s954_s27 + $0x18] sm:$0xf] %v209_v6 }
  0x16   : > { %212 = vst [vmem:[%s954_s27 + $0x1c] sm:$0xf] %v211_v7  ;;  %v213_v8 = vld [vmem:[%s950_s26 + $0x120] sm:$0xf]  ;;  %v215_v9 = vld [vmem:[%s950_s26 + $0x144] sm:$0xf] }
  0x17   : > { %v217_v10 = vld [vmem:[%s950_s26 + $0x168] sm:$0xf]  ;;  %214 = vst [vmem:[%s954_s27 + $0x20] sm:$0xf] %v213_v8  ;;  %216 = vst [vmem:[%s954_s27 + $0x24] sm:$0xf] %v215_v9 }
  0x18   : > { %218 = vst [vmem:[%s954_s27 + $0x28] sm:$0xf] %v217_v10  ;;  %v219_v11 = vld [vmem:[%s950_s26 + $0x18c] sm:$0xf]  ;;  %v221_v12 = vld [vmem:[%s950_s26 + $0x1b0] sm:$0xf] }
  0x19   : > { %v223_v13 = vld [vmem:[%s950_s26 + $0x1d4] sm:$0xf]  ;;  %220 = vst [vmem:[%s954_s27 + $0x2c] sm:$0xf] %v219_v11  ;;  %222 = vst [vmem:[%s954_s27 + $0x30] sm:$0xf] %v221_v12 }
  0x1a   : > { %224 = vst [vmem:[%s954_s27 + $0x34] sm:$0xf] %v223_v13  ;;  %v225_v14 = vld [vmem:[%s950_s26 + $0x1f8] sm:$0xf]  ;;  %v227_v15 = vld [vmem:[%s950_s26 + $0x21c] sm:$0xf] }
  0x1b   : > { %v229_v16 = vld [vmem:[%s950_s26 + $0x240] sm:$0xf]  ;;  %226 = vst [vmem:[%s954_s27 + $0x38] sm:$0xf] %v225_v14  ;;  %228 = vst [vmem:[%s954_s27 + $0x3c] sm:$0xf] %v227_v15 }
  0x1c   : > { %230 = vst [vmem:[%s954_s27 + $0x40] sm:$0xf] %v229_v16  ;;  %v231_v17 = vld [vmem:[%s950_s26 + $0x264] sm:$0xf]  ;;  %v233_v18 = vld [vmem:[%s950_s26 + $0x288] sm:$0xf] }
  0x1d   : > { %v235_v19 = vld [vmem:[%s950_s26 + $0x2ac] sm:$0xf]  ;;  %232 = vst [vmem:[%s954_s27 + $0x44] sm:$0xf] %v231_v17  ;;  %234 = vst [vmem:[%s954_s27 + $0x48] sm:$0xf] %v233_v18 }
  0x1e   : > { %236 = vst [vmem:[%s954_s27 + $0x4c] sm:$0xf] %v235_v19  ;;  %v237_v20 = vld [vmem:[%s950_s26 + $0x2d0] sm:$0xf]  ;;  %v239_v21 = vld [vmem:[%s950_s26 + $0x2f4] sm:$0xf] }
  0x1f   : > { %v241_v22 = vld [vmem:[%s950_s26 + $0x318] sm:$0xf]  ;;  %238 = vst [vmem:[%s954_s27 + $0x50] sm:$0xf] %v237_v20  ;;  %240 = vst [vmem:[%s954_s27 + $0x54] sm:$0xf] %v239_v21 }
  0x20   : > { %242 = vst [vmem:[%s954_s27 + $0x58] sm:$0xf] %v241_v22  ;;  %v243_v23 = vld [vmem:[%s950_s26 + $0x33c] sm:$0xf]  ;;  %v245_v24 = vld [vmem:[%s950_s26 + $0x360] sm:$0xf] }
  0x21   : > { %v247_v25 = vld [vmem:[%s950_s26 + $0x384] sm:$0xf]  ;;  %244 = vst [vmem:[%s954_s27 + $0x5c] sm:$0xf] %v243_v23  ;;  %246 = vst [vmem:[%s954_s27 + $0x60] sm:$0xf] %v245_v24 }
  0x22   : > { %248 = vst [vmem:[%s954_s27 + $0x64] sm:$0xf] %v247_v25  ;;  %v249_v26 = vld [vmem:[%s950_s26 + $0x3a8] sm:$0xf]  ;;  %v251_v27 = vld [vmem:[%s950_s26 + $0x3cc] sm:$0xf] }
  0x23   : > { %v253_v28 = vld [vmem:[%s950_s26 + $0x3f0] sm:$0xf]  ;;  %250 = vst [vmem:[%s954_s27 + $0x68] sm:$0xf] %v249_v26  ;;  %252 = vst [vmem:[%s954_s27 + $0x6c] sm:$0xf] %v251_v27 }
  0x24   : > { %254 = vst [vmem:[%s954_s27 + $0x70] sm:$0xf] %v253_v28  ;;  %v255_v29 = vld [vmem:[%s950_s26 + $0x414] sm:$0xf]  ;;  %v257_v30 = vld [vmem:[%s950_s26 + $0x438] sm:$0xf] }
  0x25   : > { %v259_v31 = vld [vmem:[%s950_s26 + $0x45c] sm:$0xf]  ;;  %256 = vst [vmem:[%s954_s27 + $0x74] sm:$0xf] %v255_v29  ;;  %258 = vst [vmem:[%s954_s27 + $0x78] sm:$0xf] %v257_v30 }
  0x26   : > { %260 = vst [vmem:[%s954_s27 + $0x7c] sm:$0xf] %v259_v31 }
  0x27 PF: > { %p743_p6 = scmp.ge.s32.totalorder %s885_s16, 1  ;;  %p352_p7 = scmp.lt.s32.totalorder %s885_s16, 10 }
  0x29   : > { %p353_p8 = pnand %p743_p6, %p352_p7 }
  0x2a   : > { %s359_s28 = sand.u32 (!%p353_p8), 1, %s869_s12   ;;  %v426_v32 = vld [vmem:[%s1065_s0] sm:$0xff] (!%p353_p8)  ;;  %p408_p9 = scmp.lt.s32.totalorder (!%p353_p8), %s877_s14, 8 }
  0x2b   : > { %356 = sbr.rel (%p353_p8) target bundleno = 296 (0x128), region = 69  ;;  %s744_s4 = sshll.u32 (!%p353_p8), %s359_s28, 7  ;;  %v747_v33 = vcombine.high (!%p353_p8), %v426_v32, %v426_v32  ;;  %v746_v50 = vcombine.low (!%p353_p8), %v426_v32, %v426_v32 }
  0x2c   : > { %s1024_s5 = scalar_lea.vmem (!%p353_p8), [#allocation3], %s744_s4 }
  0x2d   : > { %v829_v34 = vld [vmem:[%s1024_s5 + $0x40] sm:$0xff] (!%p353_p8)   ;;  %594 = vmatprep.mubr.bf16.mxu0 (!%p353_p8), %v747_v33  ;;  %v831_v36 = vld [vmem:[%s1024_s5 + $0x48] sm:$0xff] (!%p353_p8)   ;;  %v833_v38 = vld [vmem:[%s1024_s5 + $0x50] sm:$0xff] (!%p353_p8)  }
  0x2e   : > { %v830_v35 = vld [vmem:[%s1024_s5] sm:$0xff] (!%p353_p8)   ;;  %767 = vmatprep.subr.bf16.mxu0 (!%p353_p8), %v829_v34  ;;  %v832_v37 = vld [vmem:[%s1024_s5 + $0x8] sm:$0xff] (!%p353_p8)   ;;  %v834_v39 = vld [vmem:[%s1024_s5 + $0x10] sm:$0xff] (!%p353_p8)  }
  0x2f   : > { %768 = vmatpush3.bf16.msra.mxu0 (!%p353_p8), %v830_v35  ;;  %v835_v40 = vld [vmem:[%s1024_s5 + $0x58] sm:$0xff] (!%p353_p8)   ;;  %v837_v42 = vld [vmem:[%s1024_s5 + $0x60] sm:$0xff] (!%p353_p8)   ;;  %v839_v44 = vld [vmem:[%s1024_s5 + $0x68] sm:$0xff] (!%p353_p8)  }
  0x30   : > { %769 = vmatprep.subr.bf16.mxu0 (!%p353_p8), %v831_v36  ;;  %v836_v41 = vld [vmem:[%s1024_s5 + $0x18] sm:$0xff] (!%p353_p8)   ;;  %v838_v43 = vld [vmem:[%s1024_s5 + $0x20] sm:$0xff] (!%p353_p8)   ;;  %v840_v45 = vld [vmem:[%s1024_s5 + $0x28] sm:$0xff] (!%p353_p8)  }
  0x31   : > { %v841_v46 = vld [vmem:[%s1024_s5 + $0x70] sm:$0xff] (!%p353_p8)   ;;  %v843_v48 = vld [vmem:[%s1024_s5 + $0x78] sm:$0xff] (!%p353_p8)  }
  0x32   : > { %v842_v47 = vld [vmem:[%s1024_s5 + $0x30] sm:$0xff]   ;;  %v844_v49 = vld [vmem:[%s1024_s5 + $0x38] sm:$0xff]   ;;  %s1076_s14 = smov (!%p408_p9, %s877_s14), 8 }
  0x33   : > { %770 = vmatpush3.bf16.msra.mxu0 %v832_v37  ;;  %s410_s8 = scalar_lea.vmem %s1067_s2, %s1076_s14  ;;  %s745_s9 = sshll.u32 %s1076_s14, 3 }
  0x34   : > { %771 = vmatprep.subr.bf16.mxu0 %v833_v38  ;;  %v764_v53 = vld [vmem:[%s410_s8] ss:$0 sm:$0xff]  ;;  %s418_s12 = scalar_lea.vmem %s1068_s3, %s745_s9 }
  0x37   : > { %772 = vmatpush3.bf16.msra.mxu0 %v834_v39 }
  0x38   : > { %773 = vmatprep.subr.bf16.mxu0 %v835_v40 }
  0x3b   : > { %774 = vmatpush3.bf16.msra.mxu0 %v836_v41 }
  0x3c   : > { %775 = vmatprep.subr.bf16.mxu0 %v837_v42 }
  0x3f   : > { %776 = vmatpush3.bf16.msra.mxu0 %v838_v43 }
  0x40   : > { %777 = vmatprep.subr.bf16.mxu0 %v839_v44 }
  0x43   : > { %778 = vmatpush3.bf16.msra.mxu0 %v840_v45 }
  0x44   : > { %779 = vmatprep.subr.bf16.mxu0 %v841_v46 }
  0x47   : > { %780 = vmatpush3.bf16.msra.mxu0 %v842_v47 }
  0x48   : > { %781 = vmatprep.subr.bf16.mxu0 %v843_v48 }
  0x4b   : > { %782 = vmatpush3.bf16.msra.mxu0 %v844_v49 }
  0x4e   : > { %595 = vmatmul.mubr.bf16.vlgmr.msra.gmra.mrb[0].mxu0 %v746_v50 }
 0x121   : > { %v783_v51 = vpop.f32.mrb[0].mxu0 }
 0x122   : > { %v784_v52 = vpop.f32.mrb[1].mxu0 }
 0x123   : > { %v785_v54 = vadd.f32 %v784_v52, %v783_v51  ;;  %v786_v55 = vpop.f32.mrb[2].mxu0 }
 0x124   : > { %v787_v56 = vpop.f32.mrb[3].mxu0 }
 0x125   : > { %v615_v57 = vadd.f32 %v785_v54, %v764_v53 }
 0x127   : > { %616 = vst [vmem:[%s418_s12] sm:$0xff] %v615_v57 }
 0x128 PF: > { %s13_s16 = sadd.s32 1, %s885_s16   ;;  %s1069_s12 = smov %s873_s13 }
 0x129   : > { %p10_p10 = scmp.ge.s32.totalorder %s13_s16, 11   ;;  %s1070_s13 = smov %s942_s20 }
 0x12a   : > { %s1071_s14 = smov %s881_s15  ;;  %s1072_s15 = smov %s1074_s17 }
 0x12b   :  { %12 = sbr.rel (!%p10_p10) target bundleno = 3 (0x3), region = 122 }

// kernel: classnet_forward.13
= control target key start
LH: loop header
LB: loop body
LE: loop exit
PB: predicated region body
PF: predicated region fallthrough
CT: control target
= control target key end

     0   :  { %v892_v1 = vmov 0   ;;  %v48_v62 = vlaneseq  ;;  %s1149_s1 = inlined_call_operand.vmem [shape: bf16[128,256], index: 1, kind: input, shape index: {}]   ;;  %s1150_s0 = inlined_call_operand.vmem [shape: bf16[24,128], index: 0, kind: input, shape index: {}]   ;;  %s1151_s3 = inlined_call_operand.vmem [shape: bf16[256,256], index: 3, kind: input, shape index: {}]   ;;  %s1152_s5 = inlined_call_operand.vmem [shape: bf16[256,128], index: 5, kind: input, shape index: {}]   ;;  %s1153_s2 = inlined_call_operand.vmem [shape: f32[1,256], index: 2, kind: input, shape index: {}]   ;;  %s1154_s4 = inlined_call_operand.vmem [shape: f32[1,256], index: 4, kind: input, shape index: {}]   ;;  %s1155_s6 = inlined_call_operand.vmem [shape: f32[1,128], index: 6, kind: input, shape index: {}]   ;;  %s1156_s7 = inlined_call_operand.vmem [shape: f32[24,128], index: 7, kind: output, shape index: {}]  }
   0x1   :  { %v790_v0 = vld [vmem:[%s1149_s1 + $0x4] ss:$8 sps:$4 sm:$0xff]   ;;  %180 = vmatprep.mubr.bf16.mxu0 %v892_v1  ;;  %v792_v2 = vld [vmem:[%s1149_s1] ss:$8 sps:$4 sm:$0xff]   ;;  %v793_v3 = vld [vmem:[%s1149_s1 + $0x14] ss:$8 sps:$4 sm:$0xff]  }
   0x2   :  { %148 = vmatprep.subr.bf16.mxu0 %v790_v0  ;;  %v795_v4 = vld [vmem:[%s1149_s1 + $0x10] ss:$8 sps:$4 sm:$0xff]   ;;  %v796_v5 = vld [vmem:[%s1149_s1 + $0x24] ss:$8 sps:$4 sm:$0xff]   ;;  %v798_v6 = vld [vmem:[%s1149_s1 + $0x20] ss:$8 sps:$4 sm:$0xff]  }
   0x3   :  { %149 = vmatpush1.bf16.msra.mxu0 %v792_v2  ;;  %v799_v7 = vld [vmem:[%s1149_s1 + $0x34] ss:$8 sps:$4 sm:$0xff]   ;;  %v801_v8 = vld [vmem:[%s1149_s1 + $0x30] ss:$8 sps:$4 sm:$0xff]   ;;  %v802_v9 = vld [vmem:[%s1149_s1 + $0x44] ss:$8 sps:$4 sm:$0xff]  }
   0x4   :  { %150 = vmatprep.subr.bf16.mxu0 %v793_v3  ;;  %v816_v10 = vld [vmem:[%s1151_s3 + $0x4] ss:$8 sps:$4 sm:$0xff]   ;;  %v818_v11 = vld [vmem:[%s1151_s3] ss:$8 sps:$4 sm:$0xff]   ;;  %v819_v13 = vld [vmem:[%s1151_s3 + $0x14] ss:$8 sps:$4 sm:$0xff]  }
   0x5   :  { %v804_v12 = vld [vmem:[%s1149_s1 + $0x40] ss:$8 sps:$4 sm:$0xff]   ;;  %v805_v14 = vld [vmem:[%s1149_s1 + $0x54] ss:$8 sps:$4 sm:$0xff]   ;;  %413 = vmatprep.subr.bf16.mxu1 %v816_v10  ;;  %v821_v15 = vld [vmem:[%s1151_s3 + $0x10] ss:$8 sps:$4 sm:$0xff]  }
   0x6   :  { %414 = vmatpush1.bf16.msra.mxu1 %v818_v11  ;;  %v822_v16 = vld [vmem:[%s1151_s3 + $0x24] ss:$8 sps:$4 sm:$0xff]   ;;  %v807_v17 = vld [vmem:[%s1149_s1 + $0x50] ss:$8 sps:$4 sm:$0xff]   ;;  %v824_v19 = vld [vmem:[%s1151_s3 + $0x20] ss:$8 sps:$4 sm:$0xff]  }
   0x7   :  { %151 = vmatpush1.bf16.msra.mxu0 %v795_v4  ;;  %415 = vmatprep.subr.bf16.mxu1 %v819_v13  ;;  %v808_v18 = vld [vmem:[%s1149_s1 + $0x64] ss:$8 sps:$4 sm:$0xff]   ;;  %v825_v20 = vld [vmem:[%s1151_s3 + $0x34] ss:$8 sps:$4 sm:$0xff]   ;;  %v810_v21 = vld [vmem:[%s1149_s1 + $0x60] ss:$8 sps:$4 sm:$0xff]  }
   0x8   :  { %152 = vmatprep.subr.bf16.mxu0 %v796_v5  ;;  %v811_v22 = vld [vmem:[%s1149_s1 + $0x74] ss:$8 sps:$4 sm:$0xff]   ;;  %v827_v23 = vld [vmem:[%s1151_s3 + $0x30] ss:$8 sps:$4 sm:$0xff]   ;;  %v828_v24 = vld [vmem:[%s1151_s3 + $0x44] ss:$8 sps:$4 sm:$0xff]  }
   0x9   :  { %v813_v25 = vld [vmem:[%s1149_s1 + $0x70] ss:$8 sps:$4 sm:$0xff]   ;;  %v830_v26 = vld [vmem:[%s1151_s3 + $0x40] ss:$8 sps:$4 sm:$0xff]   ;;  %v831_v27 = vld [vmem:[%s1151_s3 + $0x54] ss:$8 sps:$4 sm:$0xff]  }
   0xa   :  { %416 = vmatpush1.bf16.msra.mxu1 %v821_v15  ;;  %v814_v28 = vld [vmem:[%s1150_s0] sm:$0xff]   ;;  %v833_v29 = vld [vmem:[%s1151_s3 + $0x50] ss:$8 sps:$4 sm:$0xff]   ;;  %v837_v32 = vld [vmem:[%s1151_s3 + $0x74] ss:$8 sps:$4 sm:$0xff]   ;;  %v49_v63 = vshrl.u32 %v48_v62, 7 }
   0xb   :  { %153 = vmatpush1.bf16.msra.mxu0 %v798_v6  ;;  %417 = vmatprep.subr.bf16.mxu1 %v822_v16  ;;  %v834_v30 = vld [vmem:[%s1151_s3 + $0x64] ss:$8 sps:$4 sm:$0xff]   ;;  %v836_v31 = vld [vmem:[%s1151_s3 + $0x60] ss:$8 sps:$4 sm:$0xff]   ;;  %v839_v34 = vld [vmem:[%s1151_s3 + $0x70] ss:$8 sps:$4 sm:$0xff]  }
   0xc   :  { %154 = vmatprep.subr.bf16.mxu0 %v799_v7  ;;  %v815_v33 = vld [vmem:[%s1150_s0 + $0x8] ss:$0 sps:$4 sm:$0xff]   ;;  %v840_v35 = vld [vmem:[%s1151_s3 + $0x84] ss:$8 sps:$4 sm:$0xff]   ;;  %v843_v37 = vld [vmem:[%s1151_s3 + $0x94] ss:$8 sps:$4 sm:$0xff]  }
   0xd   :  { %v842_v36 = vld [vmem:[%s1151_s3 + $0x80] ss:$8 sps:$4 sm:$0xff]   ;;  %v845_v38 = vld [vmem:[%s1151_s3 + $0x90] ss:$8 sps:$4 sm:$0xff]   ;;  %v846_v39 = vld [vmem:[%s1151_s3 + $0xa4] ss:$8 sps:$4 sm:$0xff]  }
   0xe   :  { %418 = vmatpush1.bf16.msra.mxu1 %v824_v19  ;;  %v848_v40 = vld [vmem:[%s1151_s3 + $0xa0] ss:$8 sps:$4 sm:$0xff]   ;;  %v849_v41 = vld [vmem:[%s1151_s3 + $0xb4] ss:$8 sps:$4 sm:$0xff]   ;;  %v851_v42 = vld [vmem:[%s1151_s3 + $0xb0] ss:$8 sps:$4 sm:$0xff]  }
   0xf   :  { %155 = vmatpush1.bf16.msra.mxu0 %v801_v8  ;;  %419 = vmatprep.subr.bf16.mxu1 %v825_v20  ;;  %v852_v43 = vld [vmem:[%s1151_s3 + $0xc4] ss:$8 sps:$4 sm:$0xff]   ;;  %v854_v44 = vld [vmem:[%s1151_s3 + $0xc0] ss:$8 sps:$4 sm:$0xff]   ;;  %v855_v45 = vld [vmem:[%s1151_s3 + $0xd4] ss:$8 sps:$4 sm:$0xff]  }
  0x10   :  { %156 = vmatprep.subr.bf16.mxu0 %v802_v9  ;;  %v857_v46 = vld [vmem:[%s1151_s3 + $0xd0] ss:$8 sps:$4 sm:$0xff]   ;;  %v858_v47 = vld [vmem:[%s1151_s3 + $0xe4] ss:$8 sps:$4 sm:$0xff]   ;;  %v860_v48 = vld [vmem:[%s1151_s3 + $0xe0] ss:$8 sps:$4 sm:$0xff]  }
  0x11   :  { %v861_v49 = vld [vmem:[%s1151_s3 + $0xf4] ss:$8 sps:$4 sm:$0xff]   ;;  %v863_v50 = vld [vmem:[%s1151_s3 + $0xf0] ss:$8 sps:$4 sm:$0xff]   ;;  %v864_v51 = vld [vmem:[%s1152_s5 + $0x40] sm:$0xff]   ;;  %v50_v0 = vsub.s32 0, %v49_v63 }
  0x12   :  { %420 = vmatpush1.bf16.msra.mxu1 %v827_v23  ;;  %v865_v52 = vld [vmem:[%s1152_s5] sm:$0xff]   ;;  %v866_v53 = vld [vmem:[%s1152_s5 + $0x48] sm:$0xff]   ;;  %v868_v55 = vld [vmem:[%s1152_s5 + $0x50] sm:$0xff]   ;;  %v54_v2 = vsub.s32 1, %v49_v63 }
  0x13   :  { %157 = vmatpush1.bf16.msra.mxu0 %v804_v12  ;;  %421 = vmatprep.subr.bf16.mxu1 %v828_v24  ;;  %v867_v54 = vld [vmem:[%s1152_s5 + $0x8] sm:$0xff]   ;;  %v869_v56 = vld [vmem:[%s1152_s5 + $0x10] sm:$0xff]   ;;  %v870_v57 = vld [vmem:[%s1152_s5 + $0x58] sm:$0xff]  }
  0x14   :  { %158 = vmatprep.subr.bf16.mxu0 %v805_v14  ;;  %v871_v58 = vld [vmem:[%s1152_s5 + $0x18] sm:$0xff]   ;;  %v872_v59 = vld [vmem:[%s1152_s5 + $0x60] sm:$0xff]   ;;  %v874_v61 = vld [vmem:[%s1152_s5 + $0x68] sm:$0xff]  }
  0x15   :  { %v873_v60 = vld [vmem:[%s1152_s5 + $0x20] sm:$0xff]  }
  0x16   :  { %422 = vmatpush1.bf16.msra.mxu1 %v830_v26  ;;  %v744_v63 = vld [vmem:[%s1155_s6] ss:$0 sm:$0xff] }
  0x17   :  { %159 = vmatpush1.bf16.msra.mxu0 %v807_v17  ;;  %423 = vmatprep.subr.bf16.mxu1 %v831_v27 }
  0x18   :  { %160 = vmatprep.subr.bf16.mxu0 %v808_v18 }
  0x1a   :  { %424 = vmatpush1.bf16.msra.mxu1 %v833_v29  ;;  %v875_v29 = vld [vmem:[%s1152_s5 + $0x28] sm:$0xff]  }
  0x1b   :  { %161 = vmatpush1.bf16.msra.mxu0 %v810_v21  ;;  %425 = vmatprep.subr.bf16.mxu1 %v834_v30  ;;  %v876_v30 = vld [vmem:[%s1152_s5 + $0x70] sm:$0xff]  }
  0x1c   :  { %162 = vmatprep.subr.bf16.mxu0 %v811_v22 }
  0x1e   :  { %426 = vmatpush1.bf16.msra.mxu1 %v836_v31  ;;  %v877_v31 = vld [vmem:[%s1152_s5 + $0x30] sm:$0xff]  }
  0x1f   :  { %163 = vmatpush1.bf16.msra.mxu0 %v813_v25  ;;  %427 = vmatprep.subr.bf16.mxu1 %v837_v32  ;;  %v878_v32 = vld [vmem:[%s1152_s5 + $0x78] sm:$0xff]  }
  0x20   :  { %761 = vmatprep.subr.bf16.mxu0 %v864_v51 }
  0x22   :  { %181 = vmatmul.mubr.bf16.vlgmr.msra.gmra.mrb[0].mxu0 %v814_v28  ;;  %428 = vmatpush1.bf16.msra.mxu1 %v839_v34  ;;  %v241_v34 = vld [vmem:[%s1154_s4] sm:$0x3] }
  0x23   :  { %190 = vmatprep.mubr.bf16.mxu0 %v892_v1  ;;  %429 = vmatprep.subr.bf16.mxu1 %v840_v35  ;;  %v46_v1 = vld [vmem:[%s1153_s2] sm:$0x3]  ;;  %v246_v35 = vrot.slane %v241_v34, %v50_v0 }
  0x24   :  { %762 = vmatpush3.bf16.msra.mxu0 %v865_v52  ;;  %v51_v3 = vrot.slane %v46_v1, %v50_v0  ;;  %v55_v4 = vrot.slane %v46_v1, %v54_v2 }
  0x25   :  { %763 = vmatprep.subr.bf16.mxu0 %v866_v53 }
  0x26   :  { %430 = vmatpush1.bf16.msra.mxu1 %v842_v36  ;;  %v250_v36 = vrot.slane %v241_v34, %v54_v2 }
  0x27   :  { %431 = vmatprep.subr.bf16.mxu1 %v843_v37 }
  0x28   :  { %764 = vmatpush3.bf16.msra.mxu0 %v867_v54 }
  0x29   :  { %765 = vmatprep.subr.bf16.mxu0 %v868_v55 }
  0x2a   :  { %191 = vmatmul.mubr.bf16.gmra.mrb[4].mxu0 %v815_v33  ;;  %432 = vmatpush1.bf16.msra.mxu1 %v845_v38  ;;  %v879_v33 = vld [vmem:[%s1152_s5 + $0x38] sm:$0xff]  }
  0x2b   :  { %433 = vmatprep.subr.bf16.mxu1 %v846_v39 }
  0x2c   :  { %766 = vmatpush3.bf16.msra.mxu0 %v869_v56 }
  0x2d   :  { %767 = vmatprep.subr.bf16.mxu0 %v870_v57 }
  0x2e   :  { %434 = vmatpush1.bf16.msra.mxu1 %v848_v40 }
  0x2f   :  { %435 = vmatprep.subr.bf16.mxu1 %v849_v41 }
  0x30   :  { %768 = vmatpush3.bf16.msra.mxu0 %v871_v58 }
  0x31   :  { %769 = vmatprep.subr.bf16.mxu0 %v872_v59 }
  0x32   :  { %436 = vmatpush1.bf16.msra.mxu1 %v851_v42 }
  0x33   :  { %437 = vmatprep.subr.bf16.mxu1 %v852_v43 }
  0x34   :  { %770 = vmatpush3.bf16.msra.mxu0 %v873_v60 }
  0x35   :  { %771 = vmatprep.subr.bf16.mxu0 %v874_v61 }
  0x36   :  { %438 = vmatpush1.bf16.msra.mxu1 %v854_v44 }
  0x37   :  { %439 = vmatprep.subr.bf16.mxu1 %v855_v45 }
  0x38   :  { %772 = vmatpush3.bf16.msra.mxu0 %v875_v29 }
  0x39   :  { %773 = vmatprep.subr.bf16.mxu0 %v876_v30 }
  0x3a   :  { %440 = vmatpush1.bf16.msra.mxu1 %v857_v46 }
  0x3b   :  { %441 = vmatprep.subr.bf16.mxu1 %v858_v47 }
  0x3c   :  { %774 = vmatpush3.bf16.msra.mxu0 %v877_v31 }
  0x3d   :  { %775 = vmatprep.subr.bf16.mxu0 %v878_v32 }
  0x3e   :  { %442 = vmatpush1.bf16.msra.mxu1 %v860_v48 }
  0x3f   :  { %443 = vmatprep.subr.bf16.mxu1 %v861_v49 }
  0x40   :  { %776 = vmatpush3.bf16.msra.mxu0 %v879_v33 }
  0x42   :  { %444 = vmatpush1.bf16.msra.mxu1 %v863_v50 }
  0xf5   :  { %v182_v5 = vpop.f32.mrb[0].mxu0 }
  0xf6   :  { %v183_v6 = vadd.f32 %v182_v5, %v51_v3  ;;  %v184_v7 = vpop.f32.mrb[1].mxu0 }
  0xf7   :  { %v185_v8 = vadd.f32 %v184_v7, %v55_v4  ;;  %v186_v9 = vpop.f32.mrb[2].mxu0 }
  0xf8   :  { %v187_v10 = vadd.f32 %v186_v9, %v51_v3  ;;  %v188_v11 = vpop.f32.mrb[3].mxu0  ;;  %v199_v13 = vmax.f32 %v183_v6, 0.0 }
  0xf9   :  { %v189_v12 = vadd.f32 %v188_v11, %v55_v4  ;;  %v200_v15 = vmax.f32 %v185_v8, 0.0 }
  0xfa   :  { %v201_v14 = vmax.f32 %v187_v10, 0.0 }
  0xfb   :  { %v202_v16 = vmax.f32 %v189_v12, 0.0 }
  0xfc   :  { %v205_v17 = vpack.c.bf16 %v201_v14, %v199_v13 }
  0xfd   :  { %v192_v18 = vpop.f32.mrb[4].mxu0  ;;  %v206_v19 = vpack.c.bf16 %v202_v16, %v200_v15 }
  0xfe   :  { %v193_v20 = vadd.f32 %v192_v18, %v51_v3  ;;  %v194_v21 = vpop.f32.mrb[5].mxu0 }
  0xff   :  { %v195_v22 = vadd.f32 %v194_v21, %v55_v4  ;;  %445 = vmatprep.mubr.bf16.mxu1 %v206_v19  ;;  %v196_v23 = vpop.f32.mrb[6].mxu0 }
 0x100   :  { %v203_v24 = vmax.f32 %v193_v20, 0.0  ;;  %446 = vmatmul.mubr.bf16.vlgmr.msra.gmra.mrb[0].mxu1 %v205_v17  ;;  %v197_v25 = vpop.f32.mrb[7].mxu0 }
 0x101   :  { %v204_v26 = vmax.f32 %v195_v22, 0.0 }
 0x102   :  { %v207_v28 = vpack.c.bf16 %v203_v24, %v203_v24 }
 0x103   :  { %v208_v27 = vpack.c.bf16 %v204_v26, %v204_v26 }
 0x105   :  { %455 = vmatprep.mubr.bf16.mxu1 %v208_v27 }
 0x108   :  { %456 = vmatmul.mubr.bf16.gmra.mrb[4].mxu1 %v207_v28 }
 0x1d3   :  { %v447_v37 = vpop.f32.mrb[0].mxu1 }
 0x1d4   :  { %v448_v38 = vadd.f32 %v447_v37, %v246_v35  ;;  %v449_v39 = vpop.f32.mrb[1].mxu1 }
 0x1d5   :  { %v450_v40 = vadd.f32 %v449_v39, %v250_v36  ;;  %v451_v41 = vpop.f32.mrb[2].mxu1 }
 0x1d6   :  { %v452_v42 = vadd.f32 %v451_v41, %v246_v35  ;;  %v453_v43 = vpop.f32.mrb[3].mxu1  ;;  %v464_v45 = vmax.f32 %v448_v38, 0.0 }
 0x1d7   :  { %v454_v44 = vadd.f32 %v453_v43, %v250_v36  ;;  %v465_v47 = vmax.f32 %v450_v40, 0.0 }
 0x1d8   :  { %v466_v46 = vmax.f32 %v452_v42, 0.0 }
 0x1d9   :  { %v467_v48 = vmax.f32 %v454_v44, 0.0 }
 0x1da   :  { %v470_v49 = vpack.c.bf16 %v466_v46, %v464_v45 }
 0x1db   :  { %v471_v50 = vpack.c.bf16 %v467_v48, %v465_v47  ;;  %v457_v51 = vpop.f32.mrb[4].mxu1 }
 0x1dc   :  { %v458_v52 = vadd.f32 %v457_v51, %v246_v35  ;;  %v459_v53 = vpop.f32.mrb[5].mxu1 }
 0x1dd   :  { %v460_v54 = vadd.f32 %v459_v53, %v250_v36  ;;  %v461_v55 = vpop.f32.mrb[6].mxu1  ;;  %641 = vmatprep.mubr.bf16.mxu0 %v471_v50 }
 0x1de   :  { %v462_v56 = vpop.f32.mrb[7].mxu1  ;;  %642 = vmatmul.mubr.bf16.vlgmr.msra.gmra.mrb[8].mxu0 %v470_v49  ;;  %v468_v58 = vmax.f32 %v458_v52, 0.0 }
 0x1df   :  { %v469_v57 = vmax.f32 %v460_v54, 0.0 }
 0x1e0   :  { %v472_v60 = vpack.c.bf16 %v468_v58, %v468_v58 }
 0x1e1   :  { %v473_v59 = vpack.c.bf16 %v469_v57, %v469_v57 }
 0x1e3   :  { %649 = vmatprep.mubr.bf16.mxu0 %v473_v59 }
 0x1e6   :  { %650 = vmatmul.mubr.bf16.gmra.mrb[12].mxu0 %v472_v60 }
 0x2b1   :  { %v777_v61 = vpop.f32.mrb[8].mxu0 }
 0x2b2   :  { %v778_v62 = vpop.f32.mrb[9].mxu0 }
 0x2b3   :  { %v779_v0 = vadd.f32 %v778_v62, %v777_v61  ;;  %v780_v1 = vpop.f32.mrb[10].mxu0 }
 0x2b4   :  { %v781_v2 = vpop.f32.mrb[11].mxu0 }
 0x2b5   :  { %v782_v3 = vadd.f32 %v781_v2, %v780_v1  ;;  %v644_v4 = vadd.f32 %v779_v0, %v744_v63 }
 0x2b7   :  { %657 = vmax.xlane.f32.xlu0 %v644_v4  ;;  %v647_v6 = vadd.f32 %v782_v3, %v744_v63 }
 0x2b9   :  { %v783_v5 = vpop.f32.mrb[12].mxu0 }
 0x2ba   :  { %v784_v7 = vpop.f32.mrb[13].mxu0 }
 0x2bb   :  { %v785_v8 = vadd.f32 %v784_v7, %v783_v5  ;;  %v786_v9 = vpop.f32.mrb[14].mxu0  ;;  %659 = vmax.xlane.f32.xlu0 %v647_v6 }
 0x2bc   :  { %v787_v10 = vpop.f32.mrb[15].mxu0 }
 0x2bd   :  { %v652_v11 = vadd.f32 %v785_v8, %v744_v63 }
 0x2bf   :  { %661 = vmax.xlane.f32.xlu1 %v652_v11 }
 0x344   :  { %v658_v12 = vpop.xlane.xlu0 %657 }
 0x345   :  { %v663_v13 = vsub.f32 %v644_v4, %v658_v12 }
 0x347   :  { %v666_v14 = vmul.f32 1.442695, %v663_v13 }
 0x348   :  { %v660_v15 = vpop.xlane.xlu0 %659 }
 0x349   :  { %880 = vpow2.f32 %v666_v14  ;;  %v664_v16 = vsub.f32 %v647_v6, %v660_v15 }
 0x34b   :  { %v668_v17 = vmul.f32 1.442695, %v664_v16 }
 0x34c   :  { %v662_v18 = vpop.xlane.xlu1 %661 }
 0x34d   :  { %882 = vpow2.f32 %v668_v17  ;;  %v665_v19 = vsub.f32 %v652_v11, %v662_v18 }
 0x34f   :  { %v670_v20 = vmul.f32 1.442695, %v665_v19 }
 0x351   :  { %884 = vpow2.f32 %v670_v20 }
 0x353   :  { %v881_v21 = vpop.eup %880 }
 0x354   :  { %672 = vadd.xlane.f32.xlu1 %v881_v21 }
 0x357   :  { %v883_v22 = vpop.eup %882 }
 0x358   :  { %674 = vadd.xlane.f32.xlu0 %v883_v22 }
 0x35b   :  { %v885_v23 = vpop.eup %884 }
 0x35c   :  { %676 = vadd.xlane.f32.xlu1 %v885_v23 }
 0x3e1   :  { %v673_v24 = vpop.xlane.xlu1 %672 }
 0x3e2   :  { %886 = vlog2.f32 %v673_v24 }
 0x3e5   :  { %v675_v25 = vpop.xlane.xlu0 %674 }
 0x3e6   :  { %888 = vlog2.f32 %v675_v25 }
 0x3e9   :  { %v677_v26 = vpop.xlane.xlu1 %676 }
 0x3ea   :  { %890 = vlog2.f32 %v677_v26 }
 0x3ec   :  { %v887_v27 = vpop.eup %886 }
 0x3ed   :  { %v679_v28 = vmul.f32 0.6931472, %v887_v27 }
 0x3ef   :  { %v684_v29 = vsub.f32 %v663_v13, %v679_v28 }
 0x3f0   :  { %v889_v30 = vpop.eup %888 }
 0x3f1   :  { %687 = vst [vmem:[%s1156_s7] sm:$0xff] %v684_v29  ;;  %v681_v31 = vmul.f32 0.6931472, %v889_v30 }
 0x3f3   :  { %v685_v32 = vsub.f32 %v664_v16, %v681_v31 }
 0x3f4   :  { %v891_v33 = vpop.eup %890 }
 0x3f5   :  { %688 = vst [vmem:[%s1156_s7 + $0x8] sm:$0xff] %v685_v32  ;;  %v683_v34 = vmul.f32 0.6931472, %v891_v33 }
 0x3f7   :  { %v686_v35 = vsub.f32 %v665_v19, %v683_v34 }
 0x3f9   :  { %689 = vst [vmem:[%s1156_s7 + $0x10] sm:$0xff] %v686_v35 }

</bundles_post_ra>
